<compile_context>
chip_gen: v5e
topology: v5e:2x2
jax: 0.10.0
libtpu: 0.0.40
codegen_flags: <defaults>
</compile_context>

<pallas_src>
import math
from functools import partial

import jax
import jax.numpy as jnp
from jax.experimental import pallas as pl
from jax.experimental.pallas import tpu as pltpu


# ---------------------------------------------------------------------------
# model hyper-parameters (small, consistent with the module)
# ---------------------------------------------------------------------------
B = 2          # batch
S = 8          # target sequence length
SE = 8         # source (encoder) sequence length
D_MODEL = 32   # d_model
NUM_HEADS = 4
D_K = D_MODEL // NUM_HEADS
D_FF = 64
LN_EPS = 1e-5
LANE = 128     # lane-tile width used for packing


# ---------------------------------------------------------------------------
# in-kernel helpers (operate on jnp arrays already loaded from VMEM)
# ---------------------------------------------------------------------------
def _layer_norm(x, gamma, beta):
    mu = jnp.mean(x, axis=-1, keepdims=True)
    var = jnp.mean((x - mu) ** 2, axis=-1, keepdims=True)
    return (x - mu) * jax.lax.rsqrt(var + LN_EPS) * gamma + beta


def _attention(Q, K, V, Wo, bo, nb, s_q, s_kv):
    """Head-batched multi-head attention core + output projection.

    Q: (nb*s_q, D), K/V: (nb*s_kv, D), Wo: (D, D) pre-transposed, bo: (1, D).
    The 1/sqrt(d_k) scale is already folded into the Q projection weights.
    One relayout to (nb*H, s, Dk), one softmax, one merged output projection.
    """
    H, dk = NUM_HEADS, D_K
    Qh = jnp.transpose(Q.reshape(nb, s_q, H, dk), (0, 2, 1, 3)).reshape(nb * H, s_q, dk)
    Kh = jnp.transpose(K.reshape(nb, s_kv, H, dk), (0, 2, 1, 3)).reshape(nb * H, s_kv, dk)
    Vh = jnp.transpose(V.reshape(nb, s_kv, H, dk), (0, 2, 1, 3)).reshape(nb * H, s_kv, dk)

    s = jnp.einsum("bqd,bkd->bqk", Qh, Kh, preferred_element_type=jnp.float32)
    m = jnp.max(s, axis=-1, keepdims=True)
    p = jnp.exp(s - m)
    inv = pl.reciprocal(jnp.sum(p, axis=-1, keepdims=True), approx=False)
    w = p * inv
    o = jnp.einsum("bqk,bkd->bqd", w, Vh, preferred_element_type=jnp.float32)

    o = jnp.transpose(o.reshape(nb, H, s_q, dk), (0, 2, 1, 3)).reshape(nb * s_q, D_MODEL)
    return jnp.dot(o, Wo, preferred_element_type=jnp.float32) + bo


# ---------------------------------------------------------------------------
# Pallas kernel: whole batch in a single grid step; 2-D activation slabs
# ---------------------------------------------------------------------------
def decoder_layer_kernel(x_ref, enc_ref, w_ref, w2_ref, p_ref, out_ref,
                         *, nb, s_q, s_kv):
    x = x_ref[...]        # (nb*s_q, D_MODEL)
    enc = enc_ref[...]    # (nb*s_kv, D_MODEL)

    def wblk(i, width=D_MODEL):
        # lane-0-aligned slice of one pre-transposed (in, out) weight block
        return w_ref[i][:, 0:width]          # (D_MODEL, width)

    def prow(i, width=D_MODEL):
        return p_ref[i:i + 1, 0:width]       # (1, width)

    # -- self attention + residual + LN --------------------------------------
    Q = jnp.dot(x, wblk(0), preferred_element_type=jnp.float32) + prow(0)  # scaled
    K = jnp.dot(x, wblk(1), preferred_element_type=jnp.float32) + prow(1)
    V = jnp.dot(x, wblk(2), preferred_element_type=jnp.float32) + prow(2)
    attn = _attention(Q, K, V, wblk(3), prow(3), nb, s_q, s_q)
    x = _layer_norm(x + attn, prow(10), prow(11))

    # -- cross attention + residual + LN --------------------------------------
    Q = jnp.dot(x, wblk(4), preferred_element_type=jnp.float32) + prow(4)  # scaled
    K = jnp.dot(enc, wblk(5), preferred_element_type=jnp.float32) + prow(5)
    V = jnp.dot(enc, wblk(6), preferred_element_type=jnp.float32) + prow(6)
    attn = _attention(Q, K, V, wblk(7), prow(7), nb, s_q, s_kv)
    x = _layer_norm(x + attn, prow(12), prow(13))

    # -- feed-forward + residual + LN ------------------------------------------
    h = jnp.maximum(
        jnp.dot(x, wblk(8, D_FF), preferred_element_type=jnp.float32) + prow(8, D_FF),
        0.0)
    ff = jnp.dot(h, w2_ref[...], preferred_element_type=jnp.float32) + prow(9)
    x = _layer_norm(x + ff, prow(14), prow(15))

    out_ref[...] = x


# ---------------------------------------------------------------------------
# host-side packing: lane-aligned weight slab + bias/LN slab
# ---------------------------------------------------------------------------
def pack_params(p):
    t = jnp.transpose                     # PyTorch (out, in) -> (in, out)
    scale = 1.0 / math.sqrt(D_K)

    def pad_block(w):                     # (32, n) -> (32, 128), lane-0 aligned
        return jnp.pad(w, ((0, 0), (0, LANE - w.shape[1])))

    blocks = [
        pad_block(t(p["wq1"]) * scale),   # 0: self Q (scale folded in)
        pad_block(t(p["wk1"])),           # 1: self K
        pad_block(t(p["wv1"])),           # 2: self V
        pad_block(t(p["wo1"])),           # 3: self out proj
        pad_block(t(p["wq2"]) * scale),   # 4: cross Q (scale folded in)
        pad_block(t(p["wk2"])),           # 5: cross K
        pad_block(t(p["wv2"])),           # 6: cross V
        pad_block(t(p["wo2"])),           # 7: cross out proj
        pad_block(t(p["w1"])),            # 8: FFN linear1 (32, 64)
    ]
    w = jnp.stack(blocks, axis=0)         # (9, 32, 128)
    w2 = t(p["w2"])                       # (64, 32)  FFN linear2

    def row(v):
        v = jnp.reshape(v, (-1,))
        return jnp.pad(v, (0, LANE - v.shape[0]))[None, :]

    small = jnp.concatenate([
        row(p["bq1"] * scale), row(p["bk1"]), row(p["bv1"]), row(p["bo1"]),   # 0-3
        row(p["bq2"] * scale), row(p["bk2"]), row(p["bv2"]), row(p["bo2"]),   # 4-7
        row(p["b1"]), row(p["b2"]),                                           # 8-9
        row(p["g1"]), row(p["be1"]),                                          # 10-11
        row(p["g2"]), row(p["be2"]),                                          # 12-13
        row(p["g3"]), row(p["be3"]),                                          # 14-15
    ], axis=0)                            # (16, 128)
    return w, w2, small


def decoder_layer(x, enc_output, params):
    """x: (B, S, D), enc_output: (B, SE, D) -> (B, S, D).

    Whole batch processed in a single grid step (latency-bound kernel; do not
    shard it across TensorCores — per-core work would be below per-step
    overhead even on v7x)."""
    Bx, Sx, D = x.shape
    _, Se, _ = enc_output.shape
    w, w2, small = pack_params(params)

    x2 = x.reshape(Bx * Sx, D)
    e2 = enc_output.reshape(Bx * Se, D)

    kernel = partial(decoder_layer_kernel, nb=Bx, s_q=Sx, s_kv=Se)

    out2 = pl.pallas_call(
        kernel,
        out_shape=jax.ShapeDtypeStruct((Bx * Sx, D), jnp.float32),
        grid_spec=pltpu.PrefetchScalarGridSpec(
            num_scalar_prefetch=0,
            grid=(1,),
            in_specs=[
                pl.BlockSpec((Bx * Sx, D), lambda i: (0, 0)),        # x slab
                pl.BlockSpec((Bx * Se, D), lambda i: (0, 0)),        # enc slab
                pl.BlockSpec(w.shape, lambda i: (0, 0, 0)),          # weight slab
                pl.BlockSpec(w2.shape, lambda i: (0, 0)),            # FFN W2
                pl.BlockSpec(small.shape, lambda i: (0, 0)),         # biases / LN
            ],
            out_specs=pl.BlockSpec((Bx * Sx, D), lambda i: (0, 0)),
        ),
        compiler_params=pltpu.CompilerParams(
            dimension_semantics=("arbitrary",)),
    )(x2, e2, w, w2, small)
    return out2.reshape(Bx, Sx, D)


# ---------------------------------------------------------------------------
# pure-JAX reference (mirrors the PyTorch forward, eval-mode dropout)
# ---------------------------------------------------------------------------
def _mha_ref(q, kv, Wq, bq, Wk, bk, Wv, bv, Wo, bo):
    Bn, Sq, D = q.shape
    Q = (q @ Wq.T + bq).reshape(Bn, -1, NUM_HEADS, D_K).transpose(0, 2, 1, 3)
    K = (kv @ Wk.T + bk).reshape(Bn, -1, NUM_HEADS, D_K).transpose(0, 2, 1, 3)
    V = (kv @ Wv.T + bv).reshape(Bn, -1, NUM_HEADS, D_K).transpose(0, 2, 1, 3)
    s = Q @ jnp.swapaxes(K, -1, -2) / math.sqrt(D_K)
    w = jax.nn.softmax(s, axis=-1)
    o = (w @ V).transpose(0, 2, 1, 3).reshape(Bn, -1, D)
    return o @ Wo.T + bo


def _ln_ref(x, g, b):
    mu = jnp.mean(x, axis=-1, keepdims=True)
    var = jnp.mean((x - mu) ** 2, axis=-1, keepdims=True)
    return (x - mu) / jnp.sqrt(var + LN_EPS) * g + b


def decoder_layer_ref(x, enc, p):
    a = _mha_ref(x, x, p["wq1"], p["bq1"], p["wk1"], p["bk1"],
                 p["wv1"], p["bv1"], p["wo1"], p["bo1"])
    x = _ln_ref(x + a, p["g1"], p["be1"])
    a = _mha_ref(x, enc, p["wq2"], p["bq2"], p["wk2"], p["bk2"],
                 p["wv2"], p["bv2"], p["wo2"], p["bo2"])
    x = _ln_ref(x + a, p["g2"], p["be2"])
    h = jnp.maximum(x @ p["w1"].T + p["b1"], 0.0)
    ff = h @ p["w2"].T + p["b2"]
    return _ln_ref(x + ff, p["g3"], p["be3"])


# ---------------------------------------------------------------------------
# deterministic parameter init (PyTorch-Linear-like uniform fan-in scaling)
# ---------------------------------------------------------------------------
def init_params(key):
    params = {}
    keys = jax.random.split(key, 32)
    ki = iter(range(32))

    def linear(out_dim, in_dim):
        bound = 1.0 / math.sqrt(in_dim)
        w = jax.random.uniform(keys[next(ki)], (out_dim, in_dim),
                               jnp.float32, -bound, bound)
        b = jax.random.uniform(keys[next(ki)], (1, out_dim),
                               jnp.float32, -bound, bound)
        return w, b

    for pref in ("1", "2"):  # self- and cross-attention
        for name in ("q", "k", "v", "o"):
            w, b = linear(D_MODEL, D_MODEL)
            params[f"w{name}{pref}"] = w
            params[f"b{name}{pref}"] = b

    params["w1"], params["b1"] = linear(D_FF, D_MODEL)
    params["w2"], params["b2"] = linear(D_MODEL, D_FF)

    for i in ("1", "2", "3"):
        params[f"g{i}"] = jnp.ones((1, D_MODEL), jnp.float32)
        params[f"be{i}"] = jnp.zeros((1, D_MODEL), jnp.float32)
    return params


if __name__ == "__main__":
    key = jax.random.PRNGKey(0)
    k_x, k_enc, k_p = jax.random.split(key, 3)

    x = jax.random.normal(k_x, (B, S, D_MODEL), jnp.float32)
    enc_output = jax.random.normal(k_enc, (B, SE, D_MODEL), jnp.float32)
    params = init_params(k_p)

    out = decoder_layer(x, enc_output, params)
    out = jax.block_until_ready(out)

    ref = decoder_layer_ref(x, enc_output, params)
    assert out.shape == (B, S, D_MODEL)
    assert jnp.allclose(out, ref, atol=1e-4, rtol=1e-4), (
        f"max abs err = {jnp.max(jnp.abs(out - ref))}")

    print("KERNEL_OK")
</pallas_src>

<mosaic_0001>
module attributes {stable_mosaic.version = 11 : i64} {
  func.func @decoder_layer_kernel(%arg0: i32, %arg1: memref<16x32xf32, #tpu.memory_space<vmem>>, %arg2: memref<16x32xf32, #tpu.memory_space<vmem>>, %arg3: memref<9x32x128xf32, #tpu.memory_space<vmem>>, %arg4: memref<64x32xf32, #tpu.memory_space<vmem>>, %arg5: memref<16x128xf32, #tpu.memory_space<vmem>>, %arg6: memref<16x32xf32, #tpu.memory_space<vmem>>) attributes {dimension_semantics = [#tpu.dimension_semantics<arbitrary>], iteration_bounds = array<i64: 1>, scalar_prefetch = 0 : i64, scratch_operands = 0 : i64, tpu.core_type = #tpu.core_type<tc>, window_params = [{pipeline_mode = #tpu.pipeline_mode<synchronous>, transform_indices = @transform_0, window_bounds = array<i64: 16, 32>}, {pipeline_mode = #tpu.pipeline_mode<synchronous>, transform_indices = @transform_1, window_bounds = array<i64: 16, 32>}, {pipeline_mode = #tpu.pipeline_mode<synchronous>, transform_indices = @transform_2, window_bounds = array<i64: 9, 32, 128>}, {pipeline_mode = #tpu.pipeline_mode<synchronous>, transform_indices = @transform_3, window_bounds = array<i64: 64, 32>}, {pipeline_mode = #tpu.pipeline_mode<synchronous>, transform_indices = @transform_4, window_bounds = array<i64: 16, 128>}, {pipeline_mode = #tpu.pipeline_mode<synchronous>, transform_indices = @transform_5, window_bounds = array<i64: 16, 32>}]} {
    %c0 = arith.constant 0 : index
    %c0_0 = arith.constant 0 : index
    %0 = vector.load %arg1[%c0, %c0_0] : memref<16x32xf32, #tpu.memory_space<vmem>>, vector<16x32xf32>
    %c0_1 = arith.constant 0 : index
    %c0_2 = arith.constant 0 : index
    %1 = vector.load %arg2[%c0_1, %c0_2] : memref<16x32xf32, #tpu.memory_space<vmem>>, vector<16x32xf32>
    %c0_3 = arith.constant 0 : index
    %c0_4 = arith.constant 0 : index
    %c0_5 = arith.constant 0 : index
    %2 = vector.load %arg3[%c0_3, %c0_4, %c0_5] : memref<9x32x128xf32, #tpu.memory_space<vmem>>, vector<1x32x128xf32>
    %3 = vector.shape_cast %2 : vector<1x32x128xf32> to vector<32x128xf32>
    %4 = vector.extract_strided_slice %3 {offsets = [0, 0], sizes = [32, 32], strides = [1, 1]} : vector<32x128xf32> to vector<32x32xf32>
    %cst = arith.constant dense<0.000000e+00> : vector<16x32xf32>
    %5 = tpu.matmul %0, %4, %cst {dimension_numbers = #tpu.dot_dimension_numbers<[1], [0], [0], [1], [0, 0, 1, 1], [], []>} : vector<16x32xf32>, vector<32x32xf32>, vector<16x32xf32> -> vector<16x32xf32>
    %c0_6 = arith.constant 0 : index
    %c0_7 = arith.constant 0 : index
    %6 = vector.load %arg5[%c0_6, %c0_7] : memref<16x128xf32, #tpu.memory_space<vmem>>, vector<1x32xf32>
    %7 = vector.broadcast %6 : vector<1x32xf32> to vector<16x32xf32>
    %8 = arith.addf %5, %7 : vector<16x32xf32>
    %c1 = arith.constant 1 : index
    %c0_8 = arith.constant 0 : index
    %c0_9 = arith.constant 0 : index
    %9 = vector.load %arg3[%c1, %c0_8, %c0_9] : memref<9x32x128xf32, #tpu.memory_space<vmem>>, vector<1x32x128xf32>
    %10 = vector.shape_cast %9 : vector<1x32x128xf32> to vector<32x128xf32>
    %11 = vector.extract_strided_slice %10 {offsets = [0, 0], sizes = [32, 32], strides = [1, 1]} : vector<32x128xf32> to vector<32x32xf32>
    %cst_10 = arith.constant dense<0.000000e+00> : vector<16x32xf32>
    %12 = tpu.matmul %0, %11, %cst_10 {dimension_numbers = #tpu.dot_dimension_numbers<[1], [0], [0], [1], [0, 0, 1, 1], [], []>} : vector<16x32xf32>, vector<32x32xf32>, vector<16x32xf32> -> vector<16x32xf32>
    %c1_11 = arith.constant 1 : index
    %c0_12 = arith.constant 0 : index
    %13 = vector.load %arg5[%c1_11, %c0_12] : memref<16x128xf32, #tpu.memory_space<vmem>>, vector<1x32xf32>
    %14 = vector.broadcast %13 : vector<1x32xf32> to vector<16x32xf32>
    %15 = arith.addf %12, %14 : vector<16x32xf32>
    %c2 = arith.constant 2 : index
    %c0_13 = arith.constant 0 : index
    %c0_14 = arith.constant 0 : index
    %16 = vector.load %arg3[%c2, %c0_13, %c0_14] : memref<9x32x128xf32, #tpu.memory_space<vmem>>, vector<1x32x128xf32>
    %17 = vector.shape_cast %16 : vector<1x32x128xf32> to vector<32x128xf32>
    %18 = vector.extract_strided_slice %17 {offsets = [0, 0], sizes = [32, 32], strides = [1, 1]} : vector<32x128xf32> to vector<32x32xf32>
    %cst_15 = arith.constant dense<0.000000e+00> : vector<16x32xf32>
    %19 = tpu.matmul %0, %18, %cst_15 {dimension_numbers = #tpu.dot_dimension_numbers<[1], [0], [0], [1], [0, 0, 1, 1], [], []>} : vector<16x32xf32>, vector<32x32xf32>, vector<16x32xf32> -> vector<16x32xf32>
    %c2_16 = arith.constant 2 : index
    %c0_17 = arith.constant 0 : index
    %20 = vector.load %arg5[%c2_16, %c0_17] : memref<16x128xf32, #tpu.memory_space<vmem>>, vector<1x32xf32>
    %21 = vector.broadcast %20 : vector<1x32xf32> to vector<16x32xf32>
    %22 = arith.addf %19, %21 : vector<16x32xf32>
    %c3 = arith.constant 3 : index
    %c0_18 = arith.constant 0 : index
    %c0_19 = arith.constant 0 : index
    %23 = vector.load %arg3[%c3, %c0_18, %c0_19] : memref<9x32x128xf32, #tpu.memory_space<vmem>>, vector<1x32x128xf32>
    %24 = vector.shape_cast %23 : vector<1x32x128xf32> to vector<32x128xf32>
    %25 = vector.extract_strided_slice %24 {offsets = [0, 0], sizes = [32, 32], strides = [1, 1]} : vector<32x128xf32> to vector<32x32xf32>
    %c3_20 = arith.constant 3 : index
    %c0_21 = arith.constant 0 : index
    %26 = vector.load %arg5[%c3_20, %c0_21] : memref<16x128xf32, #tpu.memory_space<vmem>>, vector<1x32xf32>
    %27 = vector.shape_cast %8 : vector<16x32xf32> to vector<2x8x4x8xf32>
    %28 = tpu.transpose %27, [0, 2, 1, 3] : vector<2x8x4x8xf32> -> vector<2x4x8x8xf32>
    %29 = vector.shape_cast %28 : vector<2x4x8x8xf32> to vector<8x8x8xf32>
    %30 = vector.shape_cast %15 : vector<16x32xf32> to vector<2x8x4x8xf32>
    %31 = tpu.transpose %30, [0, 2, 1, 3] : vector<2x8x4x8xf32> -> vector<2x4x8x8xf32>
    %32 = vector.shape_cast %31 : vector<2x4x8x8xf32> to vector<8x8x8xf32>
    %33 = vector.shape_cast %22 : vector<16x32xf32> to vector<2x8x4x8xf32>
    %34 = tpu.transpose %33, [0, 2, 1, 3] : vector<2x8x4x8xf32> -> vector<2x4x8x8xf32>
    %35 = vector.shape_cast %34 : vector<2x4x8x8xf32> to vector<8x8x8xf32>
    "tpu.trace_start"() <{level = 10 : i32, message = "bqd,bkd->bqk"}> : () -> ()
    %cst_22 = arith.constant dense<0.000000e+00> : vector<8x8x8xf32>
    %36 = tpu.matmul %29, %32, %cst_22 {dimension_numbers = #tpu.dot_dimension_numbers<[2], [2], [1], [1], [0, 0, 0, 1, 1, 1], [0], [0]>} : vector<8x8x8xf32>, vector<8x8x8xf32>, vector<8x8x8xf32> -> vector<8x8x8xf32>
    "tpu.trace_stop"() : () -> ()
    %cst_23 = arith.constant dense<0xFF800000> : vector<8x8xf32>
    %37 = vector.multi_reduction <maximumf>, %36, %cst_23 [2] : vector<8x8x8xf32> to vector<8x8xf32>
    %38 = vector.shape_cast %37 : vector<8x8xf32> to vector<8x8x1xf32>
    %39 = vector.broadcast %38 : vector<8x8x1xf32> to vector<8x8x8xf32>
    %40 = arith.subf %36, %39 : vector<8x8x8xf32>
    %41 = math.exp %40 : vector<8x8x8xf32>
    %cst_24 = arith.constant dense<0.000000e+00> : vector<8x8xf32>
    %42 = vector.multi_reduction <add>, %41, %cst_24 [2] : vector<8x8x8xf32> to vector<8x8xf32>
    %43 = vector.shape_cast %42 : vector<8x8xf32> to vector<8x8x1xf32>
    %44 = tpu.reciprocal %43 : vector<8x8x1xf32> -> vector<8x8x1xf32>
    %45 = vector.broadcast %44 : vector<8x8x1xf32> to vector<8x8x8xf32>
    %46 = arith.mulf %41, %45 : vector<8x8x8xf32>
    "tpu.trace_start"() <{level = 10 : i32, message = "bqk,bkd->bqd"}> : () -> ()
    %cst_25 = arith.constant dense<0.000000e+00> : vector<8x8x8xf32>
    %47 = tpu.matmul %46, %35, %cst_25 {dimension_numbers = #tpu.dot_dimension_numbers<[2], [1], [1], [2], [0, 0, 0, 1, 1, 2], [0], [0]>} : vector<8x8x8xf32>, vector<8x8x8xf32>, vector<8x8x8xf32> -> vector<8x8x8xf32>
    "tpu.trace_stop"() : () -> ()
    %48 = vector.shape_cast %47 : vector<8x8x8xf32> to vector<2x4x8x8xf32>
    %49 = tpu.transpose %48, [0, 2, 1, 3] : vector<2x4x8x8xf32> -> vector<2x8x4x8xf32>
    %50 = vector.shape_cast %49 : vector<2x8x4x8xf32> to vector<16x32xf32>
    %cst_26 = arith.constant dense<0.000000e+00> : vector<16x32xf32>
    %51 = tpu.matmul %50, %25, %cst_26 {dimension_numbers = #tpu.dot_dimension_numbers<[1], [0], [0], [1], [0, 0, 1, 1], [], []>} : vector<16x32xf32>, vector<32x32xf32>, vector<16x32xf32> -> vector<16x32xf32>
    %52 = vector.broadcast %26 : vector<1x32xf32> to vector<16x32xf32>
    %53 = arith.addf %51, %52 : vector<16x32xf32>
    %54 = arith.addf %0, %53 : vector<16x32xf32>
    %c10 = arith.constant 10 : index
    %c0_27 = arith.constant 0 : index
    %55 = vector.load %arg5[%c10, %c0_27] : memref<16x128xf32, #tpu.memory_space<vmem>>, vector<1x32xf32>
    %c11 = arith.constant 11 : index
    %c0_28 = arith.constant 0 : index
    %56 = vector.load %arg5[%c11, %c0_28] : memref<16x128xf32, #tpu.memory_space<vmem>>, vector<1x32xf32>
    %cst_29 = arith.constant dense<0.000000e+00> : vector<16xf32>
    %57 = vector.multi_reduction <add>, %54, %cst_29 [1] : vector<16x32xf32> to vector<16xf32>
    %58 = vector.shape_cast %57 : vector<16xf32> to vector<16x1xf32>
    %cst_30 = arith.constant 3.200000e+01 : f32
    %59 = vector.broadcast %cst_30 : f32 to vector<16x1xf32>
    %60 = arith.divf %58, %59 : vector<16x1xf32>
    %61 = vector.broadcast %60 : vector<16x1xf32> to vector<16x32xf32>
    %62 = arith.subf %54, %61 : vector<16x32xf32>
    %63 = arith.mulf %62, %62 : vector<16x32xf32>
    %cst_31 = arith.constant dense<0.000000e+00> : vector<16xf32>
    %64 = vector.multi_reduction <add>, %63, %cst_31 [1] : vector<16x32xf32> to vector<16xf32>
    %65 = vector.shape_cast %64 : vector<16xf32> to vector<16x1xf32>
    %cst_32 = arith.constant 3.200000e+01 : f32
    %66 = vector.broadcast %cst_32 : f32 to vector<16x1xf32>
    %67 = arith.divf %65, %66 : vector<16x1xf32>
    %68 = vector.broadcast %60 : vector<16x1xf32> to vector<16x32xf32>
    %69 = arith.subf %54, %68 : vector<16x32xf32>
    %cst_33 = arith.constant 9.99999974E-6 : f32
    %70 = vector.broadcast %cst_33 : f32 to vector<16x1xf32>
    %71 = arith.addf %67, %70 : vector<16x1xf32>
    %72 = math.rsqrt %71 : vector<16x1xf32>
    %73 = vector.broadcast %72 : vector<16x1xf32> to vector<16x32xf32>
    %74 = arith.mulf %69, %73 : vector<16x32xf32>
    %75 = vector.broadcast %55 : vector<1x32xf32> to vector<16x32xf32>
    %76 = arith.mulf %74, %75 : vector<16x32xf32>
    %77 = vector.broadcast %56 : vector<1x32xf32> to vector<16x32xf32>
    %78 = arith.addf %76, %77 : vector<16x32xf32>
    %c4 = arith.constant 4 : index
    %c0_34 = arith.constant 0 : index
    %c0_35 = arith.constant 0 : index
    %79 = vector.load %arg3[%c4, %c0_34, %c0_35] : memref<9x32x128xf32, #tpu.memory_space<vmem>>, vector<1x32x128xf32>
    %80 = vector.shape_cast %79 : vector<1x32x128xf32> to vector<32x128xf32>
    %81 = vector.extract_strided_slice %80 {offsets = [0, 0], sizes = [32, 32], strides = [1, 1]} : vector<32x128xf32> to vector<32x32xf32>
    %cst_36 = arith.constant dense<0.000000e+00> : vector<16x32xf32>
    %82 = tpu.matmul %78, %81, %cst_36 {dimension_numbers = #tpu.dot_dimension_numbers<[1], [0], [0], [1], [0, 0, 1, 1], [], []>} : vector<16x32xf32>, vector<32x32xf32>, vector<16x32xf32> -> vector<16x32xf32>
    %c4_37 = arith.constant 4 : index
    %c0_38 = arith.constant 0 : index
    %83 = vector.load %arg5[%c4_37, %c0_38] : memref<16x128xf32, #tpu.memory_space<vmem>>, vector<1x32xf32>
    %84 = vector.broadcast %83 : vector<1x32xf32> to vector<16x32xf32>
    %85 = arith.addf %82, %84 : vector<16x32xf32>
    %c5 = arith.constant 5 : index
    %c0_39 = arith.constant 0 : index
    %c0_40 = arith.constant 0 : index
    %86 = vector.load %arg3[%c5, %c0_39, %c0_40] : memref<9x32x128xf32, #tpu.memory_space<vmem>>, vector<1x32x128xf32>
    %87 = vector.shape_cast %86 : vector<1x32x128xf32> to vector<32x128xf32>
    %88 = vector.extract_strided_slice %87 {offsets = [0, 0], sizes = [32, 32], strides = [1, 1]} : vector<32x128xf32> to vector<32x32xf32>
    %cst_41 = arith.constant dense<0.000000e+00> : vector<16x32xf32>
    %89 = tpu.matmul %1, %88, %cst_41 {dimension_numbers = #tpu.dot_dimension_numbers<[1], [0], [0], [1], [0, 0, 1, 1], [], []>} : vector<16x32xf32>, vector<32x32xf32>, vector<16x32xf32> -> vector<16x32xf32>
    %c5_42 = arith.constant 5 : index
    %c0_43 = arith.constant 0 : index
    %90 = vector.load %arg5[%c5_42, %c0_43] : memref<16x128xf32, #tpu.memory_space<vmem>>, vector<1x32xf32>
    %91 = vector.broadcast %90 : vector<1x32xf32> to vector<16x32xf32>
    %92 = arith.addf %89, %91 : vector<16x32xf32>
    %c6 = arith.constant 6 : index
    %c0_44 = arith.constant 0 : index
    %c0_45 = arith.constant 0 : index
    %93 = vector.load %arg3[%c6, %c0_44, %c0_45] : memref<9x32x128xf32, #tpu.memory_space<vmem>>, vector<1x32x128xf32>
    %94 = vector.shape_cast %93 : vector<1x32x128xf32> to vector<32x128xf32>
    %95 = vector.extract_strided_slice %94 {offsets = [0, 0], sizes = [32, 32], strides = [1, 1]} : vector<32x128xf32> to vector<32x32xf32>
    %cst_46 = arith.constant dense<0.000000e+00> : vector<16x32xf32>
    %96 = tpu.matmul %1, %95, %cst_46 {dimension_numbers = #tpu.dot_dimension_numbers<[1], [0], [0], [1], [0, 0, 1, 1], [], []>} : vector<16x32xf32>, vector<32x32xf32>, vector<16x32xf32> -> vector<16x32xf32>
    %c6_47 = arith.constant 6 : index
    %c0_48 = arith.constant 0 : index
    %97 = vector.load %arg5[%c6_47, %c0_48] : memref<16x128xf32, #tpu.memory_space<vmem>>, vector<1x32xf32>
    %98 = vector.broadcast %97 : vector<1x32xf32> to vector<16x32xf32>
    %99 = arith.addf %96, %98 : vector<16x32xf32>
    %c7 = arith.constant 7 : index
    %c0_49 = arith.constant 0 : index
    %c0_50 = arith.constant 0 : index
    %100 = vector.load %arg3[%c7, %c0_49, %c0_50] : memref<9x32x128xf32, #tpu.memory_space<vmem>>, vector<1x32x128xf32>
    %101 = vector.shape_cast %100 : vector<1x32x128xf32> to vector<32x128xf32>
    %102 = vector.extract_strided_slice %101 {offsets = [0, 0], sizes = [32, 32], strides = [1, 1]} : vector<32x128xf32> to vector<32x32xf32>
    %c7_51 = arith.constant 7 : index
    %c0_52 = arith.constant 0 : index
    %103 = vector.load %arg5[%c7_51, %c0_52] : memref<16x128xf32, #tpu.memory_space<vmem>>, vector<1x32xf32>
    %104 = vector.shape_cast %85 : vector<16x32xf32> to vector<2x8x4x8xf32>
    %105 = tpu.transpose %104, [0, 2, 1, 3] : vector<2x8x4x8xf32> -> vector<2x4x8x8xf32>
    %106 = vector.shape_cast %105 : vector<2x4x8x8xf32> to vector<8x8x8xf32>
    %107 = vector.shape_cast %92 : vector<16x32xf32> to vector<2x8x4x8xf32>
    %108 = tpu.transpose %107, [0, 2, 1, 3] : vector<2x8x4x8xf32> -> vector<2x4x8x8xf32>
    %109 = vector.shape_cast %108 : vector<2x4x8x8xf32> to vector<8x8x8xf32>
    %110 = vector.shape_cast %99 : vector<16x32xf32> to vector<2x8x4x8xf32>
    %111 = tpu.transpose %110, [0, 2, 1, 3] : vector<2x8x4x8xf32> -> vector<2x4x8x8xf32>
    %112 = vector.shape_cast %111 : vector<2x4x8x8xf32> to vector<8x8x8xf32>
    "tpu.trace_start"() <{level = 10 : i32, message = "bqd,bkd->bqk"}> : () -> ()
    %cst_53 = arith.constant dense<0.000000e+00> : vector<8x8x8xf32>
    %113 = tpu.matmul %106, %109, %cst_53 {dimension_numbers = #tpu.dot_dimension_numbers<[2], [2], [1], [1], [0, 0, 0, 1, 1, 1], [0], [0]>} : vector<8x8x8xf32>, vector<8x8x8xf32>, vector<8x8x8xf32> -> vector<8x8x8xf32>
    "tpu.trace_stop"() : () -> ()
    %cst_54 = arith.constant dense<0xFF800000> : vector<8x8xf32>
    %114 = vector.multi_reduction <maximumf>, %113, %cst_54 [2] : vector<8x8x8xf32> to vector<8x8xf32>
    %115 = vector.shape_cast %114 : vector<8x8xf32> to vector<8x8x1xf32>
    %116 = vector.broadcast %115 : vector<8x8x1xf32> to vector<8x8x8xf32>
    %117 = arith.subf %113, %116 : vector<8x8x8xf32>
    %118 = math.exp %117 : vector<8x8x8xf32>
    %cst_55 = arith.constant dense<0.000000e+00> : vector<8x8xf32>
    %119 = vector.multi_reduction <add>, %118, %cst_55 [2] : vector<8x8x8xf32> to vector<8x8xf32>
    %120 = vector.shape_cast %119 : vector<8x8xf32> to vector<8x8x1xf32>
    %121 = tpu.reciprocal %120 : vector<8x8x1xf32> -> vector<8x8x1xf32>
    %122 = vector.broadcast %121 : vector<8x8x1xf32> to vector<8x8x8xf32>
    %123 = arith.mulf %118, %122 : vector<8x8x8xf32>
    "tpu.trace_start"() <{level = 10 : i32, message = "bqk,bkd->bqd"}> : () -> ()
    %cst_56 = arith.constant dense<0.000000e+00> : vector<8x8x8xf32>
    %124 = tpu.matmul %123, %112, %cst_56 {dimension_numbers = #tpu.dot_dimension_numbers<[2], [1], [1], [2], [0, 0, 0, 1, 1, 2], [0], [0]>} : vector<8x8x8xf32>, vector<8x8x8xf32>, vector<8x8x8xf32> -> vector<8x8x8xf32>
    "tpu.trace_stop"() : () -> ()
    %125 = vector.shape_cast %124 : vector<8x8x8xf32> to vector<2x4x8x8xf32>
    %126 = tpu.transpose %125, [0, 2, 1, 3] : vector<2x4x8x8xf32> -> vector<2x8x4x8xf32>
    %127 = vector.shape_cast %126 : vector<2x8x4x8xf32> to vector<16x32xf32>
    %cst_57 = arith.constant dense<0.000000e+00> : vector<16x32xf32>
    %128 = tpu.matmul %127, %102, %cst_57 {dimension_numbers = #tpu.dot_dimension_numbers<[1], [0], [0], [1], [0, 0, 1, 1], [], []>} : vector<16x32xf32>, vector<32x32xf32>, vector<16x32xf32> -> vector<16x32xf32>
    %129 = vector.broadcast %103 : vector<1x32xf32> to vector<16x32xf32>
    %130 = arith.addf %128, %129 : vector<16x32xf32>
    %131 = arith.addf %78, %130 : vector<16x32xf32>
    %c12 = arith.constant 12 : index
    %c0_58 = arith.constant 0 : index
    %132 = vector.load %arg5[%c12, %c0_58] : memref<16x128xf32, #tpu.memory_space<vmem>>, vector<1x32xf32>
    %c13 = arith.constant 13 : index
    %c0_59 = arith.constant 0 : index
    %133 = vector.load %arg5[%c13, %c0_59] : memref<16x128xf32, #tpu.memory_space<vmem>>, vector<1x32xf32>
    %cst_60 = arith.constant dense<0.000000e+00> : vector<16xf32>
    %134 = vector.multi_reduction <add>, %131, %cst_60 [1] : vector<16x32xf32> to vector<16xf32>
    %135 = vector.shape_cast %134 : vector<16xf32> to vector<16x1xf32>
    %cst_61 = arith.constant 3.200000e+01 : f32
    %136 = vector.broadcast %cst_61 : f32 to vector<16x1xf32>
    %137 = arith.divf %135, %136 : vector<16x1xf32>
    %138 = vector.broadcast %137 : vector<16x1xf32> to vector<16x32xf32>
    %139 = arith.subf %131, %138 : vector<16x32xf32>
    %140 = arith.mulf %139, %139 : vector<16x32xf32>
    %cst_62 = arith.constant dense<0.000000e+00> : vector<16xf32>
    %141 = vector.multi_reduction <add>, %140, %cst_62 [1] : vector<16x32xf32> to vector<16xf32>
    %142 = vector.shape_cast %141 : vector<16xf32> to vector<16x1xf32>
    %cst_63 = arith.constant 3.200000e+01 : f32
    %143 = vector.broadcast %cst_63 : f32 to vector<16x1xf32>
    %144 = arith.divf %142, %143 : vector<16x1xf32>
    %145 = vector.broadcast %137 : vector<16x1xf32> to vector<16x32xf32>
    %146 = arith.subf %131, %145 : vector<16x32xf32>
    %cst_64 = arith.constant 9.99999974E-6 : f32
    %147 = vector.broadcast %cst_64 : f32 to vector<16x1xf32>
    %148 = arith.addf %144, %147 : vector<16x1xf32>
    %149 = math.rsqrt %148 : vector<16x1xf32>
    %150 = vector.broadcast %149 : vector<16x1xf32> to vector<16x32xf32>
    %151 = arith.mulf %146, %150 : vector<16x32xf32>
    %152 = vector.broadcast %132 : vector<1x32xf32> to vector<16x32xf32>
    %153 = arith.mulf %151, %152 : vector<16x32xf32>
    %154 = vector.broadcast %133 : vector<1x32xf32> to vector<16x32xf32>
    %155 = arith.addf %153, %154 : vector<16x32xf32>
    %c8 = arith.constant 8 : index
    %c0_65 = arith.constant 0 : index
    %c0_66 = arith.constant 0 : index
    %156 = vector.load %arg3[%c8, %c0_65, %c0_66] : memref<9x32x128xf32, #tpu.memory_space<vmem>>, vector<1x32x128xf32>
    %157 = vector.shape_cast %156 : vector<1x32x128xf32> to vector<32x128xf32>
    %158 = vector.extract_strided_slice %157 {offsets = [0, 0], sizes = [32, 64], strides = [1, 1]} : vector<32x128xf32> to vector<32x64xf32>
    %cst_67 = arith.constant dense<0.000000e+00> : vector<16x64xf32>
    %159 = tpu.matmul %155, %158, %cst_67 {dimension_numbers = #tpu.dot_dimension_numbers<[1], [0], [0], [1], [0, 0, 1, 1], [], []>} : vector<16x32xf32>, vector<32x64xf32>, vector<16x64xf32> -> vector<16x64xf32>
    %c8_68 = arith.constant 8 : index
    %c0_69 = arith.constant 0 : index
    %160 = vector.load %arg5[%c8_68, %c0_69] : memref<16x128xf32, #tpu.memory_space<vmem>>, vector<1x64xf32>
    %161 = vector.broadcast %160 : vector<1x64xf32> to vector<16x64xf32>
    %162 = arith.addf %159, %161 : vector<16x64xf32>
    %cst_70 = arith.constant 0.000000e+00 : f32
    %163 = vector.broadcast %cst_70 : f32 to vector<16x64xf32>
    %164 = arith.maximumf %162, %163 : vector<16x64xf32>
    %c0_71 = arith.constant 0 : index
    %c0_72 = arith.constant 0 : index
    %165 = vector.load %arg4[%c0_71, %c0_72] : memref<64x32xf32, #tpu.memory_space<vmem>>, vector<64x32xf32>
    %cst_73 = arith.constant dense<0.000000e+00> : vector<16x32xf32>
    %166 = tpu.matmul %164, %165, %cst_73 {dimension_numbers = #tpu.dot_dimension_numbers<[1], [0], [0], [1], [0, 0, 1, 1], [], []>} : vector<16x64xf32>, vector<64x32xf32>, vector<16x32xf32> -> vector<16x32xf32>
    %c9 = arith.constant 9 : index
    %c0_74 = arith.constant 0 : index
    %167 = vector.load %arg5[%c9, %c0_74] : memref<16x128xf32, #tpu.memory_space<vmem>>, vector<1x32xf32>
    %168 = vector.broadcast %167 : vector<1x32xf32> to vector<16x32xf32>
    %169 = arith.addf %166, %168 : vector<16x32xf32>
    %170 = arith.addf %155, %169 : vector<16x32xf32>
    %c14 = arith.constant 14 : index
    %c0_75 = arith.constant 0 : index
    %171 = vector.load %arg5[%c14, %c0_75] : memref<16x128xf32, #tpu.memory_space<vmem>>, vector<1x32xf32>
    %c15 = arith.constant 15 : index
    %c0_76 = arith.constant 0 : index
    %172 = vector.load %arg5[%c15, %c0_76] : memref<16x128xf32, #tpu.memory_space<vmem>>, vector<1x32xf32>
    %cst_77 = arith.constant dense<0.000000e+00> : vector<16xf32>
    %173 = vector.multi_reduction <add>, %170, %cst_77 [1] : vector<16x32xf32> to vector<16xf32>
    %174 = vector.shape_cast %173 : vector<16xf32> to vector<16x1xf32>
    %cst_78 = arith.constant 3.200000e+01 : f32
    %175 = vector.broadcast %cst_78 : f32 to vector<16x1xf32>
    %176 = arith.divf %174, %175 : vector<16x1xf32>
    %177 = vector.broadcast %176 : vector<16x1xf32> to vector<16x32xf32>
    %178 = arith.subf %170, %177 : vector<16x32xf32>
    %179 = arith.mulf %178, %178 : vector<16x32xf32>
    %cst_79 = arith.constant dense<0.000000e+00> : vector<16xf32>
    %180 = vector.multi_reduction <add>, %179, %cst_79 [1] : vector<16x32xf32> to vector<16xf32>
    %181 = vector.shape_cast %180 : vector<16xf32> to vector<16x1xf32>
    %cst_80 = arith.constant 3.200000e+01 : f32
    %182 = vector.broadcast %cst_80 : f32 to vector<16x1xf32>
    %183 = arith.divf %181, %182 : vector<16x1xf32>
    %184 = vector.broadcast %176 : vector<16x1xf32> to vector<16x32xf32>
    %185 = arith.subf %170, %184 : vector<16x32xf32>
    %cst_81 = arith.constant 9.99999974E-6 : f32
    %186 = vector.broadcast %cst_81 : f32 to vector<16x1xf32>
    %187 = arith.addf %183, %186 : vector<16x1xf32>
    %188 = math.rsqrt %187 : vector<16x1xf32>
    %189 = vector.broadcast %188 : vector<16x1xf32> to vector<16x32xf32>
    %190 = arith.mulf %185, %189 : vector<16x32xf32>
    %191 = vector.broadcast %171 : vector<1x32xf32> to vector<16x32xf32>
    %192 = arith.mulf %190, %191 : vector<16x32xf32>
    %193 = vector.broadcast %172 : vector<1x32xf32> to vector<16x32xf32>
    %194 = arith.addf %192, %193 : vector<16x32xf32>
    %c0_82 = arith.constant 0 : index
    %c0_83 = arith.constant 0 : index
    %195 = vector.load %arg6[%c0_82, %c0_83] : memref<16x32xf32, #tpu.memory_space<vmem>>, vector<16x32xf32>
    tpu.vector_store %arg6[%c0_82, %c0_83], %194 {strides = array<i32>} : memref<16x32xf32, #tpu.memory_space<vmem>>, vector<16x32xf32>,
    return
  }
  func.func @transform_0(%arg0: i32) -> (i32, i32) {
    %c0_i32 = arith.constant 0 : i32
    %c0_i32_0 = arith.constant 0 : i32
    %c0_i32_1 = arith.constant 0 : i32
    return %c0_i32, %c0_i32_0 : i32, i32
  }
  func.func @transform_1(%arg0: i32) -> (i32, i32) {
    %c0_i32 = arith.constant 0 : i32
    %c0_i32_0 = arith.constant 0 : i32
    %c0_i32_1 = arith.constant 0 : i32
    return %c0_i32, %c0_i32_0 : i32, i32
  }
  func.func @transform_2(%arg0: i32) -> (i32, i32, i32) {
    %c0_i32 = arith.constant 0 : i32
    %c0_i32_0 = arith.constant 0 : i32
    %c0_i32_1 = arith.constant 0 : i32
    %c0_i32_2 = arith.constant 0 : i32
    return %c0_i32, %c0_i32_0, %c0_i32_1 : i32, i32, i32
  }
  func.func @transform_3(%arg0: i32) -> (i32, i32) {
    %c0_i32 = arith.constant 0 : i32
    %c0_i32_0 = arith.constant 0 : i32
    %c0_i32_1 = arith.constant 0 : i32
    return %c0_i32, %c0_i32_0 : i32, i32
  }
  func.func @transform_4(%arg0: i32) -> (i32, i32) {
    %c0_i32 = arith.constant 0 : i32
    %c0_i32_0 = arith.constant 0 : i32
    %c0_i32_1 = arith.constant 0 : i32
    return %c0_i32, %c0_i32_0 : i32, i32
  }
  func.func @transform_5(%arg0: i32) -> (i32, i32) {
    %c0_i32 = arith.constant 0 : i32
    %c0_i32_0 = arith.constant 0 : i32
    %c0_i32_1 = arith.constant 0 : i32
    return %c0_i32, %c0_i32_0 : i32, i32
  }
}

</mosaic_0001>

<bundles_post_ra>
// kernel: tpu_custom_call.1
= control target key start
LH: loop header
LB: loop body
LE: loop exit
PB: predicated region body
PF: predicated region fallthrough
CT: control target
= control target key end

     0   :  { %10 = vsyncpa [#allocation3], 0  ;;  %s5190_s0 = inlined_call_operand.vmem [shape: f32[16,32], index: 0, kind: input, shape index: {}]   ;;  %s5191_s1 = inlined_call_operand.vmem [shape: f32[16,32], index: 1, kind: input, shape index: {}]   ;;  %s5192_s2 = inlined_call_operand.hbm [shape: f32[9,32,128], index: 2, kind: input, shape index: {}]   ;;  %s5193_s3 = inlined_call_operand.vmem [shape: f32[64,32], index: 3, kind: input, shape index: {}]   ;;  %s5194_s4 = inlined_call_operand.vmem [shape: f32[16,128], index: 4, kind: input, shape index: {}]   ;;  %s5195_s5 = inlined_call_operand.hbm [shape: f32[16,32], index: 5, kind: output, shape index: {}]  }
   0x1   :  { %11 = vsyncpa [#allocation4], 0  ;;  %s20_s20 = sshll.u32 %s5192_s2, 4  ;;  %s3949_s21 = smov [#allocation2]   ;;  %s21_s20 = int_to_ptr.hbm [resolvable:$true] %s20_s20 }
   0x2   :  { %s22_s22 = sshll.u32 %s3949_s21, 4  ;;  %s3950_s23 = smov 128   ;;  %s23_s22 = int_to_ptr.vmem [resolvable:$true] %s22_s22 }
   0x3   :  { %s3951_s24 = smov 8  }
   0x4   :  { %28 = dma.hbm_to_vmem [thread:$0]  %s21_s20, 4608, %s23_s22, [#allocation3], %s3950_s23, %s3950_s23, %s3951_s24  }
   0x5   :  { %3945 = dma.done.wait [#allocation3], 4608  }
   0x6   :  { %3946 = vsyncadd [#allocation3], 4294962688  ;;  %v44_v0 = vld [vmem:[#allocation2 + $0x18] sm:$0xff]  ;;  %v43_v2 = vld [vmem:[#allocation2 + $0x10] sm:$0xff]  ;;  %vm47_vm0 = vcmask 261120   ;;  %s3952_s7 = smov 112  }
   0x7   :  { %v81_v1 = vld [vmem:[#allocation2 + $0x38] sm:$0xff]  ;;  %66 = vmatpush.msra.mxu0 %v44_v0  ;;  %v80_v3 = vld [vmem:[#allocation2 + $0x30] sm:$0xff]  ;;  %v42_v4 = vld [vmem:[#allocation2 + $0x8] sm:$0xff]  ;;  %s3953_s8 = smov 104   ;;  %s3954_s9 = smov 120   ;;  %vm164_vm1 = vcmask 1047556  }
   0x8   :  { %96 = vmatpush.msra.mxu1 %v81_v1  ;;  %v79_v5 = vld [vmem:[#allocation2 + $0x28] sm:$0xff]  ;;  %v41_v6 = vld [vmem:[#allocation2] sm:$0xff]  ;;  %v3955_v22 = vmov 1983009808   ;;  %v3956_v29 = vmov 1934713408  }
   0x9   :  { %67 = vmatpush.msra.mxu0 %v43_v2  ;;  %v78_v7 = vld [vmem:[#allocation2 + $0x20] sm:$0xff]  ;;  %v4009_v9 = vld [vmem:[%s5190_s0 + $0x8] sm:$0xff]  ;;  %v169_v23 = vunpack.c.l.s4 %v3955_v22  ;;  %v193_v30 = vunpack.c.l.s4 %v3956_v29  ;;  %v111_v38 = vld [vmem:[#allocation2 + $0x58] sm:$0xff]  ;;  %vm864_vm2 = vcmask 64512   ;;  %s3957_s12 = smov 16   ;;  %s3958_s13 = smov 24  }
   0xa   :  { %97 = vmatpush.msra.mxu1 %v80_v3  ;;  %v4000_v8 = vld [vmem:[%s5190_s0] sm:$0xff]  ;;  %126 = vmatpush.msra.mxu2 %v111_v38  ;;  %v110_v45 = vld [vmem:[#allocation2 + $0x50] sm:$0xff]  ;;  %v109_v53 = vld [vmem:[#allocation2 + $0x48] sm:$0xff]  ;;  %s3960_s11 = smov [#allocation5]  }
   0xb   :  { %68 = vmatpush.msra.mxu0 %v42_v4  ;;  %v3801_v10 = vld [vmem:[%s5194_s4] ss:$0 sm:$0xff]  ;;  %v3802_v11 = vld [vmem:[%s5194_s4 + $0x1] ss:$0 sm:$0xff]  ;;  %v4043_v26 = vunpack.c.0.s8 %v169_v23  ;;  %v4051_v40 = vunpack.c.0.s8 %v193_v30 }
   0xc   :  { %98 = vmatpush.msra.mxu1 %v79_v5  ;;  %127 = vmatpush.msra.mxu2 %v110_v45 }
   0xd   :  { %69 = vmatpush.msra.mxu0 %v41_v6 }
   0xe   :  { %99 = vmatpush.msra.mxu1 %v78_v7  ;;  %3691 = vmatmul.msk.f32.vlgmr.msra.gmra.mxu0 %vm47_vm0, %v4000_v8 }
   0xf   :  { %3693 = vmatmul.msk.f32.vlgmr.msra.gmra.mxu1 %vm47_vm0, %v4000_v8  ;;  %128 = vmatpush.msra.mxu2 %v109_v53 }
  0x16   :  { %3692 = vmatmul.msk.f32.gmra.mxu0 %vm47_vm0, %v4009_v9 }
  0x17   :  { %3694 = vmatmul.msk.f32.gmra.mxu1 %vm47_vm0, %v4009_v9 }
  0x8b   :  { %v71_v12 = vpop.f32.mrf.mxu0 }
  0x8c   :  { %v101_v13 = vpop.f32.mrf.mxu1  ;;  %v72_v14 = vadd.f32 %v3801_v10, %v71_v12 }
  0x8d   :  { %v102_v15 = vadd.f32 %v3802_v11, %v101_v13 }
  0x8e   :  { %157 = vrot.lane.b32.xlu2 %v72_v14, %s3953_s8  ;;  %151 = vrot.lane.b32.xlu1 %v72_v14, %s3952_s7  ;;  %v166_v35 = vrot.slane %v72_v14, 4 }
  0x8f   :  { %392 = vrot.lane.b32.xlu0 %v102_v15, %s3952_s7  ;;  %v406_v39 = vrot.slane %v102_v15, 4 }
  0x93   :  { %v74_v18 = vpop.f32.mrf.mxu0 }
  0x94   :  { %v104_v16 = vpop.f32.mrf.mxu1  ;;  %v4035_v19 = vadd.f32 %v3801_v10, %v74_v18 }
  0x95   :  { %v4027_v17 = vadd.f32 %v3802_v11, %v104_v16 }
  0x96   :  { %145 = vrot.lane.b32.xlu2 %v72_v14, %s3954_s9  ;;  %386 = vrot.lane.b32.xlu1 %v102_v15, %s3954_s9  ;;  %v222_v5 = vrot.slane %v4035_v19, 4 }
  0x97   :  { %398 = vrot.lane.b32.xlu0 %v102_v15, %s3953_s8  ;;  %v462_v0 = vrot.slane %v4027_v17, 4 }
  0x9e   :  { %400 = vrot.lane.b32.xlu2 %v4027_v17, %s3953_s8  ;;  %394 = vrot.lane.b32.xlu1 %v4027_v17, %s3952_s7 }
  0x9f   :  { %388 = vrot.lane.b32.xlu0 %v4027_v17, %s3954_s9 }
  0xa6   :  { %159 = vrot.lane.b32.xlu2 %v4035_v19, %s3953_s8  ;;  %153 = vrot.lane.b32.xlu1 %v4035_v19, %s3952_s7 }
  0xa7   :  { %147 = vrot.lane.b32.xlu0 %v4035_v19, %s3954_s9 }
  0xe8   :  { %v158_v20 = vpop.permute.xlu2 %157 }
  0xe9   :  { %v176_v25 = vrot.slane %v158_v20, 4 }
  0xf0   :  { %v146_v21 = vpop.permute.xlu2 %145 }
  0xf1   :  { %v178_v24 = vrot.slane %v146_v21, 4  ;;  %v177_v28 = vsel %vm164_vm1, %v176_v25, %v146_v21 }
  0xf2   :  { %v183_v33 = vperm.slane %v177_v28, %v4043_v26 }
  0xf3   :  { %v179_v27 = vsel %vm164_vm1, %v158_v20, %v178_v24 }
  0xf4   :  { %v187_v32 = vperm.slane %v179_v27, %v4043_v26  ;;  %v188_v46 = vrot.slane %v183_v33, 4 }
  0xf6   :  { %v200_v43 = vrot.slane %v187_v32, 4 }
  0xf8   :  { %v4047_v31 = vpop.permute.xlu2 %400 }
  0xf9   :  { %v472_v11 = vrot.slane %v4047_v31, 4 }
 0x100   :  { %v152_v37 = vpop.permute.xlu1 %151  ;;  %v4067_v63 = vpop.permute.xlu2 %159 }
 0x101   :  { %v393_v34 = vpop.permute.xlu0 %392  ;;  %v163_v41 = vrot.slane %v152_v37, 4  ;;  %v167_v42 = vsel %vm164_vm1, %v152_v37, %v166_v35 }
 0x102   :  { %v404_v36 = vrot.slane %v393_v34, 4  ;;  %v175_v44 = vperm.slane %v167_v42, %v4043_v26  ;;  %v407_v47 = vsel %vm164_vm1, %v393_v34, %v406_v39  ;;  %v108_v42 = vld [vmem:[#allocation2 + $0x40] sm:$0xff] }
 0x103   :  { %v165_v48 = vsel %vm164_vm1, %v163_v41, %v72_v14  ;;  %v415_v55 = vperm.slane %v407_v47, %v4043_v26  ;;  %129 = vmatpush.msra.mxu2 %v108_v42 }
 0x104   :  { %v405_v49 = vsel %vm164_vm1, %v404_v36, %v102_v15  ;;  %v171_v50 = vperm.slane %v165_v48, %v4043_v26  ;;  %v201_v51 = vsel %vm164_vm1, %v200_v43, %v175_v44  ;;  %v202_v52 = vrot.slane %v175_v44, 4  ;;  %3695 = vmatmul.msk.f32.vlgmr.msra.gmra.mxu2 %vm47_vm0, %v4000_v8 }
 0x105   :  { %v207_v54 = vperm.slane %v201_v51, %v4051_v40  ;;  %v411_v59 = vperm.slane %v405_v49, %v4043_v26  ;;  %v442_v12 = vrot.slane %v415_v55, 4  ;;  %v232_v15 = vrot.slane %v4067_v63, 4 }
 0x106   :  { %v189_v56 = vsel %vm164_vm1, %v188_v46, %v171_v50  ;;  %v190_v57 = vrot.slane %v171_v50, 4  ;;  %v203_v58 = vsel %vm164_vm1, %v187_v32, %v202_v52 }
 0x107   :  { %v195_v60 = vperm.slane %v189_v56, %v4051_v40  ;;  %v211_v61 = vperm.slane %v203_v58, %v4051_v40  ;;  %v216_v2 = vrot.slane %v207_v54, 4  ;;  %v430_v16 = vrot.slane %v411_v59, 4 }
 0x108   :  { %v191_v1 = vsel %vm164_vm1, %v183_v33, %v190_v57  ;;  %v387_v4 = vpop.permute.xlu1 %386 }
 0x109   :  { %v399_v62 = vpop.permute.xlu0 %398  ;;  %v199_v6 = vperm.slane %v191_v1, %v4051_v40  ;;  %v212_v7 = vrot.slane %v195_v60, 4  ;;  %v218_v10 = vrot.slane %v211_v61, 4  ;;  %v418_v14 = vrot.slane %v387_v4, 4 }
 0x10a   :  { %v416_v3 = vrot.slane %v399_v62, 4  ;;  %v217_v22 = vsel %vm164_vm1, 0.0, %v216_v2 }
 0x10b   :  { %v214_v18 = vrot.slane %v199_v6, 4  ;;  %v219_v20 = vsel %vm164_vm1, 0.0, %v218_v10  ;;  %v287_v21 = vsel %vm164_vm1, %v218_v10, %v207_v54  ;;  %v419_v24 = vsel %vm164_vm1, %v399_v62, %v418_v14 }
 0x10c   :  { %v417_v13 = vsel %vm164_vm1, %v416_v3, %v387_v4  ;;  %v292_v23 = vrot.slane %v219_v20, 4  ;;  %v4082_v27 = vsel %vm164_vm1, 0.0, %v212_v7  ;;  %v4088_v29 = vperm.slane %v287_v21, %v4043_v26  ;;  %3696 = vmatmul.msk.f32.gmra.mxu2 %vm47_vm0, %v4009_v9 }
 0x10d   :  { %v423_v25 = vperm.slane %v417_v13, %v4043_v26  ;;  %v4085_v28 = vsel %vm164_vm1, 0.0, %v214_v18  ;;  %v427_v30 = vperm.slane %v419_v24, %v4043_v26  ;;  %v4094_v35 = vsel %vm164_vm1, %v214_v18, %v195_v60 }
 0x10e   :  { %v281_v32 = vrot.slane %v4085_v28, 4  ;;  %v293_v36 = vsel %vm164_vm1, %v292_v23, %v217_v22 }
 0x10f   :  { %v428_v33 = vrot.slane %v423_v25, 4  ;;  %v431_v34 = vsel %vm164_vm1, %v423_v25, %v430_v16  ;;  %v440_v38 = vrot.slane %v427_v30, 4  ;;  %v443_v39 = vsel %vm164_vm1, %v427_v30, %v442_v12 }
 0x110   :  { %v439_v37 = vperm.slane %v431_v34, %v4051_v40  ;;  %v451_v44 = vperm.slane %v443_v39, %v4051_v40  ;;  %v395_v47 = vpop.permute.xlu1 %394  ;;  %v4116_v1 = vperm.slane %v293_v36, %v4043_v26 }
 0x111   :  { %v389_v41 = vpop.permute.xlu0 %388  ;;  %v429_v43 = vsel %vm164_vm1, %v428_v33, %v411_v59  ;;  %v441_v49 = vsel %vm164_vm1, %v440_v38, %v415_v55  ;;  %v460_v56 = vrot.slane %v395_v47, 4  ;;  %v463_v3 = vsel %vm164_vm1, %v395_v47, %v462_v0 }
 0x112   :  { %v473_v45 = vsel %vm164_vm1, %v472_v11, %v389_v41  ;;  %v474_v46 = vrot.slane %v389_v41, 4  ;;  %v435_v48 = vperm.slane %v429_v43, %v4051_v40  ;;  %v454_v50 = vrot.slane %v439_v37, 4 }
 0x113   :  { %v479_v51 = vperm.slane %v473_v45, %v4043_v26  ;;  %v447_v52 = vperm.slane %v441_v49, %v4051_v40  ;;  %v458_v53 = vrot.slane %v451_v44, 4  ;;  %v461_v8 = vsel %vm164_vm1, %v460_v56, %v4027_v17 }
 0x114   :  { %v475_v54 = vsel %vm164_vm1, %v4047_v31, %v474_v46  ;;  %v452_v57 = vrot.slane %v435_v48, 4  ;;  %v455_v58 = vsel %vm164_vm1, 0.0, %v454_v50  ;;  %v467_v6 = vperm.slane %v461_v8, %v4043_v26 }
 0x115   :  { %v483_v59 = vperm.slane %v475_v54, %v4043_v26  ;;  %v484_v60 = vrot.slane %v479_v51, 4  ;;  %v456_v55 = vrot.slane %v447_v52, 4  ;;  %v459_v61 = vsel %vm164_vm1, 0.0, %v458_v53 }
 0x116   :  { %v521_v62 = vrot.slane %v455_v58, 4  ;;  %v453_v2 = vsel %vm164_vm1, 0.0, %v452_v57  ;;  %v532_v4 = vrot.slane %v459_v61, 4  ;;  %v471_v7 = vperm.slane %v463_v3, %v4043_v26 }
 0x117   :  { %v496_v31 = vrot.slane %v483_v59, 4  ;;  %v516_v10 = vsel %vm164_vm1, %v454_v50, %v435_v48  ;;  %v457_v11 = vsel %vm164_vm1, 0.0, %v456_v55  ;;  %v527_v16 = vsel %vm164_vm1, %v458_v53, %v447_v52 }
 0x118   :  { %v4127_v13 = vperm.slane %v516_v10, %v4043_v26  ;;  %v522_v14 = vsel %vm164_vm1, %v521_v62, %v453_v2  ;;  %v485_v17 = vsel %vm164_vm1, %v484_v60, %v467_v6  ;;  %v486_v0 = vrot.slane %v467_v6, 4  ;;  %v154_v21 = vpop.permute.xlu1 %153 }
 0x119   :  { %v148_v12 = vpop.permute.xlu0 %147  ;;  %v497_v18 = vsel %vm164_vm1, %v496_v31, %v471_v7  ;;  %v498_v20 = vrot.slane %v471_v7, 4  ;;  %v491_v22 = vperm.slane %v485_v17, %v4051_v40  ;;  %v220_v36 = vrot.slane %v154_v21, 4 }
 0x11a   :  { %v503_v23 = vperm.slane %v497_v18, %v4051_v40  ;;  %v233_v24 = vsel %vm164_vm1, %v232_v15, %v148_v12  ;;  %v234_v25 = vrot.slane %v148_v12, 4  ;;  %v487_v30 = vsel %vm164_vm1, %v479_v51, %v486_v0 }
 0x11b   :  { %v499_v33 = vsel %vm164_vm1, %v483_v59, %v498_v20  ;;  %v239_v34 = vperm.slane %v233_v24, %v4043_v26  ;;  %v495_v37 = vperm.slane %v487_v30, %v4051_v40  ;;  %v508_v39 = vrot.slane %v491_v22, 4 }
 0x11c   :  { %v507_v38 = vperm.slane %v499_v33, %v4051_v40  ;;  %v512_v41 = vrot.slane %v503_v23, 4  ;;  %v235_v15 = vsel %vm164_vm1, %v4067_v63, %v234_v25  ;;  %v221_v42 = vsel %vm164_vm1, %v220_v36, %v4035_v19 }
 0x11d   :  { %v223_v9 = vsel %vm164_vm1, %v154_v21, %v222_v5  ;;  %v533_v43 = vsel %vm164_vm1, %v532_v4, %v457_v11  ;;  %v4154_v44 = vsel %vm164_vm1, 0.0, %v508_v39  ;;  %v510_v45 = vrot.slane %v495_v37, 4 }
 0x11e   :  { %v514_v46 = vrot.slane %v507_v38, 4  ;;  %v244_v47 = vrot.slane %v239_v34, 4  ;;  %v513_v48 = vsel %vm164_vm1, 0.0, %v512_v41  ;;  %v243_v49 = vperm.slane %v235_v15, %v4043_v26 }
 0x11f   :  { %v227_v63 = vperm.slane %v221_v42, %v4043_v26  ;;  %v231_v50 = vperm.slane %v223_v9, %v4043_v26  ;;  %v4161_v19 = vsel %vm164_vm1, 0.0, %v510_v45  ;;  %v526_v52 = vperm.slane %v522_v14, %v4043_v26 }
 0x120   :  { %v515_v5 = vsel %vm164_vm1, 0.0, %v514_v46  ;;  %v581_v51 = vsel %vm164_vm1, %v514_v46, %v503_v23  ;;  %v570_v53 = vsel %vm164_vm1, %v510_v45, %v491_v22  ;;  %v256_v57 = vrot.slane %v243_v49, 4 }
 0x121   :  { %v4168_v54 = vperm.slane %v581_v51, %v4043_v26  ;;  %v586_v56 = vrot.slane %v515_v5, 4  ;;  %v575_v58 = vrot.slane %v4161_v19, 4  ;;  %v245_v59 = vsel %vm164_vm1, %v244_v47, %v227_v63 }
 0x122   :  { %v246_v60 = vrot.slane %v227_v63, 4  ;;  %v258_v55 = vrot.slane %v231_v50, 4  ;;  %v4174_v62 = vperm.slane %v245_v59, %v4051_v40  ;;  %v257_v8 = vsel %vm164_vm1, %v256_v57, %v231_v50 }
 0x123   :  { %v587_v61 = vsel %vm164_vm1, %v586_v56, %v513_v48  ;;  %v531_v2 = vperm.slane %v527_v16, %v4043_v26  ;;  %v606_v31 = vrot.slane %v4168_v54, 4  ;;  %v263_v6 = vperm.slane %v257_v8, %v4051_v40 }
 0x124   :  { %v247_v3 = vsel %vm164_vm1, %v239_v34, %v246_v60  ;;  %v259_v4 = vsel %vm164_vm1, %v243_v49, %v258_v55  ;;  %v4183_v7 = vperm.slane %v587_v61, %v4043_v26  ;;  %v537_v12 = vperm.slane %v533_v43, %v4043_v26 }
 0x125   :  { %v255_v10 = vperm.slane %v247_v3, %v4051_v40  ;;  %v267_v11 = vperm.slane %v259_v4, %v4051_v40  ;;  %v268_v14 = vrot.slane %v4174_v62, 4  ;;  %v272_v16 = vrot.slane %v263_v6, 4 }
 0x126   :  { %v538_v17 = vrot.slane %v526_v52, 4  ;;  %v540_v0 = vrot.slane %v4127_v13, 4  ;;  %v550_v21 = vrot.slane %v537_v12, 4  ;;  %v552_v25 = vrot.slane %v531_v2, 4 }
 0x127   :  { %v4190_v18 = vrot.slane %v255_v10, 4  ;;  %v274_v20 = vrot.slane %v267_v11, 4  ;;  %v273_v22 = vsel %vm164_vm1, 0.0, %v272_v16  ;;  %v4204_v37 = vsel %vm164_vm1, 0.0, %v268_v14 }
 0x128   :  { %v539_v23 = vsel %vm164_vm1, %v538_v17, %v4127_v13  ;;  %v541_v24 = vsel %vm164_vm1, %v526_v52, %v540_v0  ;;  %v551_v13 = vsel %vm164_vm1, %v550_v21, %v531_v2  ;;  %v553_v9 = vsel %vm164_vm1, %v537_v12, %v552_v25 }
 0x129   :  { %v4198_v30 = vsel %vm164_vm1, 0.0, %v4190_v18  ;;  %v275_v33 = vsel %vm164_vm1, 0.0, %v274_v20  ;;  %v341_v34 = vsel %vm164_vm1, %v274_v20, %v263_v6  ;;  %v545_v36 = vperm.slane %v539_v23, %v4051_v40 }
 0x12a   :  { %v335_v38 = vrot.slane %v4198_v30, 4  ;;  %v346_v39 = vrot.slane %v275_v33, 4  ;;  %v557_v41 = vperm.slane %v551_v13, %v4051_v40  ;;  %v549_v42 = vperm.slane %v541_v24, %v4051_v40 }
 0x12b   :  { %v564_v15 = vrot.slane %v545_v36, 4  ;;  %v4212_v43 = vperm.slane %v341_v34, %v4043_v26  ;;  %v561_v46 = vperm.slane %v553_v9, %v4051_v40  ;;  %v280_v47 = vperm.slane %v4094_v35, %v4043_v26 }
 0x12c   :  { %v347_v45 = vsel %vm164_vm1, %v346_v39, %v273_v22  ;;  %v562_v49 = vrot.slane %v557_v41, 4  ;;  %v568_v50 = vrot.slane %v549_v42, 4  ;;  %v282_v5 = vsel %vm164_vm1, %v281_v32, %v4082_v27 }
 0x12d   :  { %v4219_v48 = vperm.slane %v347_v45, %v4043_v26  ;;  %v565_v63 = vsel %vm164_vm1, %v557_v41, %v564_v15  ;;  %v566_v19 = vrot.slane %v561_v46, 4  ;;  %v310_v51 = vrot.slane %v4116_v1, 4 }
 0x12e   :  { %3699 = vmatpush.xpose.msk.msra.mxu3 %vm864_vm2, %v565_v63  ;;  %v574_v52 = vperm.slane %v570_v53, %v4043_v26  ;;  %v563_v35 = vsel %vm164_vm1, %v562_v49, %v545_v36  ;;  %v569_v56 = vsel %vm164_vm1, %v561_v46, %v568_v50  ;;  %v286_v57 = vperm.slane %v282_v5, %v4043_v26 }
 0x12f   :  { %v576_v59 = vsel %vm164_vm1, %v575_v58, %v4154_v44  ;;  %3697 = vmatpush.xpose.msk.msrb.mxu0 %vm864_vm2, %v563_v35  ;;  %v567_v60 = vsel %vm164_vm1, %v566_v19, %v549_v42  ;;  %v311_v27 = vsel %vm164_vm1, %v310_v51, %v4088_v29  ;;  %v607_v44 = vsel %vm164_vm1, %v4183_v7, %v606_v31 }
 0x130   :  { %v580_v28 = vperm.slane %v576_v59, %v4043_v26  ;;  %v594_v32 = vrot.slane %v574_v52, 4  ;;  %v298_v53 = vrot.slane %v286_v57, 4  ;;  %v317_v55 = vperm.slane %v311_v27, %v4051_v40 }
 0x131   :  { %v604_v58 = vrot.slane %v4183_v7, 4  ;;  %v615_v8 = vperm.slane %v607_v44, %v4051_v40  ;;  %v300_v3 = vrot.slane %v280_v47, 4  ;;  %v312_v20 = vrot.slane %v4088_v29, 4 }
 0x132   :  { %3701 = vmatpush.xpose.msk.msrb.mxu3 %vm864_vm2, %v567_v60  ;;  %v595_v61 = vsel %vm164_vm1, %v580_v28, %v594_v32  ;;  %v592_v2 = vrot.slane %v580_v28, 4  ;;  %v299_v4 = vsel %vm164_vm1, %v298_v53, %v280_v47  ;;  %v322_v6 = vrot.slane %v317_v55, 4 }
 0x133   :  { %3703 = vmatpush.xpose.msk.msra.mxu0 %vm864_vm2, %v569_v56  ;;  %v603_v10 = vperm.slane %v595_v61, %v4051_v40  ;;  %v605_v11 = vsel %vm164_vm1, %v604_v58, %v4168_v54  ;;  %v305_v12 = vperm.slane %v299_v4, %v4051_v40  ;;  %v620_v14 = vrot.slane %v615_v8, 4 }
 0x134   :  { %v593_v31 = vsel %vm164_vm1, %v592_v2, %v574_v52  ;;  %v611_v7 = vperm.slane %v605_v11, %v4051_v40  ;;  %v301_v0 = vsel %vm164_vm1, %v286_v57, %v300_v3  ;;  %v313_v34 = vsel %vm164_vm1, %v4116_v1, %v312_v20 }
 0x135   :  { %v599_v16 = vperm.slane %v593_v31, %v4051_v40  ;;  %v622_v17 = vrot.slane %v603_v10, 4  ;;  %v323_v21 = vsel %vm164_vm1, %v322_v6, %v305_v12  ;;  %v324_v22 = vrot.slane %v305_v12, 4 }
 0x136   :  { %v621_v23 = vsel %vm164_vm1, %v620_v14, %v603_v10  ;;  %v616_v54 = vrot.slane %v611_v7, 4  ;;  %3698 = vmatmul.msk.f32.vlgmr.msrb.gmra.mxu0 %vm864_vm2, %v323_v21  ;;  %v309_v33 = vperm.slane %v301_v0, %v4051_v40  ;;  %v321_v39 = vperm.slane %v313_v34, %v4051_v40 }
 0x137   :  { %v623_v24 = vsel %vm164_vm1, %v615_v8, %v622_v17  ;;  %v618_v25 = vrot.slane %v599_v16, 4  ;;  %v325_v36 = vsel %vm164_vm1, %v317_v55, %v324_v22  ;;  %v330_v13 = vsel %vm164_vm1, %v4190_v18, %v4174_v62 }
 0x138   :  { %v617_v29 = vsel %vm164_vm1, %v616_v54, %v599_v16  ;;  %3711 = vmatpush.xpose.msk.msrb.mxu0 %vm864_vm2, %v623_v24  ;;  %v366_v41 = vrot.slane %v4212_v43, 4  ;;  %3700 = vmatmul.msk.f32.vlgmr.msra.gmra.mxu3 %vm864_vm2, %v325_v36  ;;  %v334_v15 = vperm.slane %v330_v13, %v4043_v26  ;;  %v336_v42 = vsel %vm164_vm1, %v335_v38, %v4204_v37 }
 0x139   :  { %3705 = vmatpush.xpose.msk.msrb.mxu1 %vm864_vm2, %v617_v29  ;;  %v619_v1 = vsel %vm164_vm1, %v611_v7, %v618_v25  ;;  %3709 = vmatpush.xpose.msk.msra.mxu3 %vm864_vm2, %v621_v23  ;;  %v328_v62 = vrot.slane %v309_v33, 4  ;;  %v340_v18 = vperm.slane %v336_v42, %v4043_v26  ;;  %v364_v9 = vrot.slane %v4219_v48, 4  ;;  %v3803_v7 = vld [vmem:[%s5194_s4 + $0x2] ss:$0 sm:$0xff] }
 0x13a   :  { %3707 = vmatpush.xpose.msk.msrb.mxu2 %vm864_vm2, %v619_v1  ;;  %v354_v45 = vrot.slane %v334_v15, 4  ;;  %v326_v46 = vrot.slane %v321_v39, 4  ;;  %v367_v37 = vsel %vm164_vm1, %v4219_v48, %v366_v41 }
 0x13b   :  { %v352_v47 = vrot.slane %v340_v18, 4  ;;  %v365_v49 = vsel %vm164_vm1, %v364_v9, %v4212_v43  ;;  %v329_v38 = vsel %vm164_vm1, %v321_v39, %v328_v62  ;;  %v375_v52 = vperm.slane %v367_v37, %v4051_v40 }
 0x13c   :  { %v371_v63 = vperm.slane %v365_v49, %v4051_v40  ;;  %v355_v30 = vsel %vm164_vm1, %v340_v18, %v354_v45  ;;  %v327_v43 = vsel %vm164_vm1, %v326_v46, %v309_v33 }
 0x13d   :  { %v353_v50 = vsel %vm164_vm1, %v352_v47, %v334_v15  ;;  %v363_v19 = vperm.slane %v355_v30, %v4051_v40  ;;  %v380_v59 = vrot.slane %v375_v52, 4 }
 0x13e   :  { %3704 = vmatmul.msk.f32.vlgmr.msra.gmra.mxu0 %vm864_vm2, %v329_v38  ;;  %v359_v5 = vperm.slane %v353_v50, %v4051_v40  ;;  %v376_v51 = vrot.slane %v371_v63, 4 }
 0x13f   :  { %v382_v56 = vrot.slane %v363_v19, 4  ;;  %v381_v27 = vsel %vm164_vm1, %v380_v59, %v363_v19 }
 0x140   :  { %3702 = vmatmul.msk.f32.vlgmr.msrb.gmra.mxu3 %vm864_vm2, %v327_v43  ;;  %v377_v35 = vsel %vm164_vm1, %v376_v51, %v359_v5  ;;  %v378_v48 = vrot.slane %v359_v5, 4 }
 0x141   :  { %3706 = vmatmul.msk.f32.vlgmr.msrb.gmra.mxu1 %vm864_vm2, %v377_v35  ;;  %v383_v60 = vsel %vm164_vm1, %v375_v52, %v382_v56 }
 0x142   :  { %v379_v57 = vsel %vm164_vm1, %v371_v63, %v378_v48 }
 0x143   :  { %3708 = vmatmul.msk.f32.vlgmr.msrb.gmra.mxu2 %vm864_vm2, %v379_v57 }
 0x146   :  { %3712 = vmatmul.msk.f32.vlgmr.msrb.gmra.mxu0 %vm864_vm2, %v383_v60 }
 0x148   :  { %3710 = vmatmul.msk.f32.vlgmr.msra.gmra.mxu3 %vm864_vm2, %v381_v27 }
 0x187   :  { %v131_v28 = vpop.f32.mrf.mxu2 }
 0x188   :  { %v4317_v17 = vadd.f32 %v3803_v7, %v131_v28 }
 0x18f   :  { %v134_v8 = vpop.f32.mrf.mxu2 }
 0x190   :  { %v4319_v0 = vadd.f32 %v3803_v7, %v134_v8 }
 0x192   :  { %v3776_v20 = vpack.i.bf16 %v4319_v0, %v4317_v17 }
 0x1b3   :  { %v888_v32 = vpop.f32.mrf.mxu0 }
 0x1b4   :  { %v1073_v53 = vsel %vm864_vm2, %v888_v32, -inf }
 0x1b5   :  { %1074 = vmax.xlane.f32.xlu2 %v1073_v53  ;;  %v702_v53 = vrot.slane %v4319_v0, 4 }
 0x1bb   :  { %v914_v55 = vpop.f32.mrf.mxu3  ;;  %v966_v44 = vpop.f32.mrf.mxu0 }
 0x1bc   :  { %v1076_v58 = vsel %vm864_vm2, %v914_v55, -inf  ;;  %v1082_v61 = vsel %vm864_vm2, %v966_v44, -inf }
 0x1bd   :  { %1077 = vmax.xlane.f32.xlu1 %v1076_v58  ;;  %1083 = vmax.xlane.f32.xlu2 %v1082_v61 }
 0x1be   :  { %v992_v2 = vpop.f32.mrf.mxu1 }
 0x1bf   :  { %v1085_v6 = vsel %vm864_vm2, %v992_v2, -inf }
 0x1c3   :  { %v940_v3 = vpop.f32.mrf.mxu3  ;;  %v1070_v12 = vpop.f32.mrf.mxu0 }
 0x1c4   :  { %v1079_v4 = vsel %vm864_vm2, %v940_v3, -inf  ;;  %v1094_v14 = vsel %vm864_vm2, %v1070_v12, -inf }
 0x1c5   :  { %1080 = vmax.xlane.f32.xlu0 %v1079_v4  ;;  %1086 = vmax.xlane.f32.xlu2 %v1085_v6 }
 0x1c6   :  { %v1018_v10 = vpop.f32.mrf.mxu2 }
 0x1c7   :  { %v1088_v11 = vsel %vm864_vm2, %v1018_v10, -inf }
 0x1c8   :  { %1089 = vmax.xlane.f32.xlu1 %v1088_v11 }
 0x1cb   :  { %v1044_v31 = vpop.f32.mrf.mxu3 }
 0x1cc   :  { %v1091_v16 = vsel %vm864_vm2, %v1044_v31, -inf }
 0x1cd   :  { %1095 = vmax.xlane.f32.xlu0 %v1094_v14 }
 0x1d5   :  { %1092 = vmax.xlane.f32.xlu0 %v1091_v16 }
 0x1dd   :  { %3777 = vrot.lane.b32.xlu2 %v3776_v20, %s3952_s7 }
 0x1e1   :  { %3772 = vrot.lane.b32.xlu1 %v3776_v20, %s3954_s9 }
 0x1e9   :  { %3782 = vrot.lane.b32.xlu0 %v3776_v20, %s3953_s8 }
 0x228   :  { %v1075_v21 = vpop.xlane.xlu2 %1074 }
 0x229   :  { %v1097_v22 = vsub.f32 %v888_v32, %v1075_v21 }
 0x22b   :  { %v1105_v23 = vmul.f32 1.442695, %v1097_v22 }
 0x22d   :  { %3817 = vpow2.f32 %v1105_v23 }
 0x230   :  { %v1078_v54 = vpop.xlane.xlu1 %1077  ;;  %v1084_v36 = vpop.xlane.xlu2 %1083 }
 0x231   :  { %v1098_v24 = vsub.f32 %v914_v55, %v1078_v54  ;;  %v1100_v41 = vsub.f32 %v966_v44, %v1084_v36  ;;  %v646_v44 = vrot.slane %v4317_v17, 4 }
 0x233   :  { %v4326_v25 = vpop.eup %3817  ;;  %v1107_v33 = vmul.f32 1.442695, %v1098_v24  ;;  %v1111_v9 = vmul.f32 1.442695, %v1100_v41 }
 0x234   :  { %v1121_v34 = vsel %vm864_vm2, %v4326_v25, 0.0 }
 0x235   :  { %3819 = vpow2.f32 %v1107_v33  ;;  %1122 = vadd.xlane.f32.xlu2 %v1121_v34 }
 0x238   :  { %v1081_v29 = vpop.xlane.xlu0 %1080  ;;  %v1087_v45 = vpop.xlane.xlu2 %1086 }
 0x239   :  { %v1099_v39 = vsub.f32 %v940_v3, %v1081_v29  ;;  %v1101_v49 = vsub.f32 %v992_v2, %v1087_v45 }
 0x23b   :  { %v4330_v13 = vpop.eup %3819  ;;  %v1109_v1 = vmul.f32 1.442695, %v1099_v39  ;;  %v1090_v15 = vpop.xlane.xlu1 %1089  ;;  %v1113_v37 = vmul.f32 1.442695, %v1101_v49 }
 0x23c   :  { %v1124_v42 = vsel %vm864_vm2, %v4330_v13, 0.0  ;;  %v1102_v62 = vsub.f32 %v1018_v10, %v1090_v15 }
 0x23d   :  { %3821 = vpow2.f32 %v1109_v1  ;;  %1125 = vadd.xlane.f32.xlu0 %v1124_v42 }
 0x23e   :  { %v1115_v18 = vmul.f32 1.442695, %v1102_v62 }
 0x240   :  { %3823 = vpow2.f32 %v1115_v18  ;;  %v1096_v46 = vpop.xlane.xlu0 %1095  ;;  %v3778_v35 = vpop.permute.xlu2 %3777 }
 0x241   :  { %3825 = vpow2.f32 %v1111_v9  ;;  %v1104_v51 = vsub.f32 %v1070_v12, %v1096_v46  ;;  %v3780_v56 = vunpack.i.h.bf16 %v3778_v35  ;;  %v3779_v59 = vunpack.i.l.bf16 %v3778_v35 }
 0x242   :  { %3827 = vpow2.f32 %v1113_v37 }
 0x243   :  { %v4334_v47 = vpop.eup %3821  ;;  %v1119_v48 = vmul.f32 1.442695, %v1104_v51  ;;  %v700_v27 = vrot.slane %v3780_v56, 4  ;;  %v644_v58 = vrot.slane %v3779_v59, 4  ;;  %v703_v61 = vsel %vm164_vm1, %v3780_v56, %v702_v53 }
 0x244   :  { %v1127_v63 = vsel %vm864_vm2, %v4334_v47, 0.0  ;;  %v647_v3 = vsel %vm164_vm1, %v3779_v59, %v646_v44  ;;  %v711_v12 = vperm.slane %v703_v61, %v4043_v26 }
 0x245   :  { %1128 = vadd.xlane.f32.xlu1 %v1127_v63  ;;  %v701_v2 = vsel %vm164_vm1, %v700_v27, %v4319_v0  ;;  %v645_v10 = vsel %vm164_vm1, %v644_v58, %v4317_v17  ;;  %v655_v14 = vperm.slane %v647_v3, %v4043_v26 }
 0x246   :  { %v4338_v30 = vpop.eup %3823  ;;  %v707_v11 = vperm.slane %v701_v2, %v4043_v26  ;;  %v651_v22 = vperm.slane %v645_v10, %v4043_v26  ;;  %v738_v33 = vrot.slane %v711_v12, 4 }
 0x247   :  { %v1136_v38 = vsel %vm864_vm2, %v4338_v30, 0.0  ;;  %v4342_v19 = vpop.eup %3825  ;;  %v682_v39 = vrot.slane %v655_v14, 4 }
 0x248   :  { %v1093_v50 = vpop.xlane.xlu0 %1092  ;;  %1137 = vadd.xlane.f32.xlu2 %v1136_v38  ;;  %v1130_v52 = vsel %vm864_vm2, %v4342_v19, 0.0  ;;  %v4346_v57 = vpop.eup %3827  ;;  %v726_v29 = vrot.slane %v707_v11, 4  ;;  %v670_v9 = vrot.slane %v651_v22, 4 }
 0x249   :  { %v1103_v5 = vsub.f32 %v1044_v31, %v1093_v50  ;;  %v1133_v28 = vsel %vm864_vm2, %v4346_v57, 0.0 }
 0x24b   :  { %v1117_v43 = vmul.f32 1.442695, %v1103_v5 }
 0x24d   :  { %3829 = vpow2.f32 %v1117_v43  ;;  %1131 = vadd.xlane.f32.xlu1 %v1130_v52 }
 0x24e   :  { %3831 = vpow2.f32 %v1119_v48 }
 0x253   :  { %v4348_v60 = vpop.eup %3829  ;;  %v3773_v55 = vpop.permute.xlu1 %3772 }
 0x254   :  { %v1139_v32 = vsel %vm864_vm2, %v4348_v60, 0.0  ;;  %v4357_v8 = vpop.eup %3831  ;;  %v3775_v4 = vunpack.i.h.bf16 %v3773_v55  ;;  %v3774_v6 = vunpack.i.l.bf16 %v3773_v55 }
 0x255   :  { %1134 = vadd.xlane.f32.xlu1 %v1133_v28  ;;  %1140 = vadd.xlane.f32.xlu0 %v1139_v32  ;;  %v1142_v7 = vsel %vm864_vm2, %v4357_v8, 0.0 }
 0x256   :  { %v714_v16 = vrot.slane %v3775_v4, 4  ;;  %v658_v20 = vrot.slane %v3774_v6, 4 }
 0x25b   :  { %v3783_v31 = vpop.permute.xlu0 %3782 }
 0x25c   :  { %v3785_v0 = vunpack.i.h.bf16 %v3783_v31  ;;  %v3784_v21 = vunpack.i.l.bf16 %v3783_v31 }
 0x25d   :  { %1143 = vadd.xlane.f32.xlu0 %v1142_v7 }
 0x25e   :  { %v712_v23 = vrot.slane %v3785_v0, 4  ;;  %v715_v17 = vsel %vm164_vm1, %v3785_v0, %v714_v16  ;;  %v656_v54 = vrot.slane %v3784_v21, 4  ;;  %v659_v24 = vsel %vm164_vm1, %v3784_v21, %v658_v20 }
 0x25f   :  { %v723_v34 = vperm.slane %v715_v17, %v4043_v26  ;;  %v667_v36 = vperm.slane %v659_v24, %v4043_v26 }
 0x260   :  { %v713_v41 = vsel %vm164_vm1, %v712_v23, %v3775_v4  ;;  %v657_v1 = vsel %vm164_vm1, %v656_v54, %v3774_v6 }
 0x261   :  { %v719_v15 = vperm.slane %v713_v41, %v4043_v26  ;;  %v736_v42 = vrot.slane %v723_v34, 4  ;;  %v739_v62 = vsel %vm164_vm1, %v723_v34, %v738_v33  ;;  %v663_v18 = vperm.slane %v657_v1, %v4043_v26 }
 0x262   :  { %v747_v45 = vperm.slane %v739_v62, %v4051_v40  ;;  %v680_v46 = vrot.slane %v667_v36, 4  ;;  %v683_v49 = vsel %vm164_vm1, %v667_v36, %v682_v39 }
 0x263   :  { %v724_v63 = vrot.slane %v719_v15, 4  ;;  %v727_v37 = vsel %vm164_vm1, %v719_v15, %v726_v29  ;;  %v737_v38 = vsel %vm164_vm1, %v736_v42, %v711_v12  ;;  %v668_v50 = vrot.slane %v663_v18, 4 }
 0x264   :  { %v735_v5 = vperm.slane %v727_v37, %v4051_v40  ;;  %v743_v51 = vperm.slane %v737_v38, %v4051_v40  ;;  %v754_v43 = vrot.slane %v747_v45, 4  ;;  %v671_v52 = vsel %vm164_vm1, %v663_v18, %v670_v9 }
 0x265   :  { %v725_v35 = vsel %vm164_vm1, %v724_v63, %v707_v11  ;;  %v669_v48 = vsel %vm164_vm1, %v668_v50, %v651_v22  ;;  %v679_v56 = vperm.slane %v671_v52, %v4051_v40  ;;  %v681_v59 = vsel %vm164_vm1, %v680_v46, %v655_v14 }
 0x266   :  { %v731_v27 = vperm.slane %v725_v35, %v4051_v40  ;;  %v750_v28 = vrot.slane %v735_v5, 4  ;;  %v752_v32 = vrot.slane %v743_v51, 4  ;;  %v755_v53 = vsel %vm164_vm1, 0.0, %v754_v43 }
 0x267   :  { %v821_v55 = vsel %vm164_vm1, %v754_v43, %v743_v51  ;;  %v826_v44 = vrot.slane %v755_v53, 4  ;;  %v675_v58 = vperm.slane %v669_v48, %v4051_v40  ;;  %v687_v61 = vperm.slane %v681_v59, %v4051_v40 }
 0x268   :  { %v751_v2 = vsel %vm164_vm1, 0.0, %v750_v28  ;;  %v691_v3 = vperm.slane %v683_v49, %v4051_v40  ;;  %v694_v4 = vrot.slane %v679_v56, 4  ;;  %v748_v6 = vrot.slane %v731_v27, 4 }
 0x269   :  { %v815_v10 = vrot.slane %v751_v2, 4  ;;  %v696_v11 = vrot.slane %v687_v61, 4  ;;  %v692_v12 = vrot.slane %v675_v58, 4  ;;  %v753_v14 = vsel %vm164_vm1, 0.0, %v752_v32 }
 0x26a   :  { %v695_v31 = vsel %vm164_vm1, 0.0, %v694_v4  ;;  %v698_v7 = vrot.slane %v691_v3, 4  ;;  %v756_v16 = vsel %vm164_vm1, %v694_v4, %v675_v58  ;;  %v749_v20 = vsel %vm164_vm1, 0.0, %v748_v6 }
 0x26b   :  { %v761_v0 = vrot.slane %v695_v31, 4  ;;  %v693_v21 = vsel %vm164_vm1, 0.0, %v692_v12  ;;  %v697_v22 = vsel %vm164_vm1, 0.0, %v696_v11  ;;  %v760_v23 = vperm.slane %v756_v16, %v4043_v26 }
 0x26c   :  { %v699_v17 = vsel %vm164_vm1, 0.0, %v698_v7  ;;  %v767_v54 = vsel %vm164_vm1, %v698_v7, %v687_v61  ;;  %v810_v24 = vsel %vm164_vm1, %v750_v28, %v731_v27  ;;  %v816_v33 = vsel %vm164_vm1, %v815_v10, %v749_v20 }
 0x26d   :  { %v772_v34 = vrot.slane %v699_v17, 4  ;;  %v762_v36 = vsel %vm164_vm1, %v761_v0, %v693_v21  ;;  %v771_v29 = vperm.slane %v767_v54, %v4043_v26  ;;  %v780_v39 = vrot.slane %v760_v23, 4 }
 0x26e   :  { %v766_v41 = vperm.slane %v762_v36, %v4043_v26  ;;  %v814_v1 = vperm.slane %v810_v24, %v4043_v26  ;;  %v820_v15 = vperm.slane %v816_v33, %v4043_v26  ;;  %v825_v42 = vperm.slane %v821_v55, %v4043_v26 }
 0x26f   :  { %v773_v62 = vsel %vm164_vm1, %v772_v34, %v697_v22  ;;  %v792_v18 = vrot.slane %v771_v29, 4  ;;  %v827_v9 = vsel %vm164_vm1, %v826_v44, %v753_v14 }
 0x270   :  { %v777_v45 = vperm.slane %v773_v62, %v4043_v26  ;;  %v781_v46 = vsel %vm164_vm1, %v766_v41, %v780_v39  ;;  %v831_v49 = vperm.slane %v827_v9, %v4043_v26  ;;  %v834_v63 = vrot.slane %v814_v1, 4 }
 0x271   :  { %v789_v37 = vperm.slane %v781_v46, %v4051_v40  ;;  %v846_v38 = vrot.slane %v825_v42, 4  ;;  %v778_v50 = vrot.slane %v766_v41, 4  ;;  %v832_v5 = vrot.slane %v820_v15, 4 }
 0x272   :  { %v793_v51 = vsel %vm164_vm1, %v777_v45, %v792_v18  ;;  %v835_v43 = vsel %vm164_vm1, %v820_v15, %v834_v63  ;;  %v790_v52 = vrot.slane %v777_v45, 4  ;;  %v844_v35 = vrot.slane %v831_v49, 4 }
 0x273   :  { %v801_v48 = vperm.slane %v793_v51, %v4051_v40  ;;  %v843_v56 = vperm.slane %v835_v43, %v4051_v40  ;;  %v847_v59 = vsel %vm164_vm1, %v831_v49, %v846_v38  ;;  %v779_v27 = vsel %vm164_vm1, %v778_v50, %v760_v23 }
 0x274   :  { %v855_v28 = vperm.slane %v847_v59, %v4051_v40  ;;  %v785_v32 = vperm.slane %v779_v27, %v4051_v40  ;;  %v791_v53 = vsel %vm164_vm1, %v790_v52, %v771_v29  ;;  %v808_v55 = vrot.slane %v789_v37, 4 }
 0x275   :  { %v806_v44 = vrot.slane %v801_v48, 4  ;;  %v797_v58 = vperm.slane %v791_v53, %v4051_v40  ;;  %v833_v61 = vsel %vm164_vm1, %v832_v5, %v814_v1  ;;  %v845_v2 = vsel %vm164_vm1, %v844_v35, %v825_v42 }
 0x276   :  { %v860_v3 = vrot.slane %v855_v28, 4  ;;  %v809_v4 = vsel %vm164_vm1, %v801_v48, %v808_v55  ;;  %v839_v6 = vperm.slane %v833_v61, %v4051_v40  ;;  %v851_v10 = vperm.slane %v845_v2, %v4051_v40 }
 0x277   :  { %v807_v11 = vsel %vm164_vm1, %v806_v44, %v789_v37  ;;  %v802_v12 = vrot.slane %v797_v58, 4  ;;  %1352 = vmatpush.msra.mxu0 %v809_v4  ;;  %v862_v14 = vrot.slane %v843_v56, 4  ;;  %v804_v31 = vrot.slane %v785_v32, 4 }
 0x278   :  { %1329 = vmatpush.msrb.mxu3 %v807_v11  ;;  %v861_v7 = vsel %vm164_vm1, %v860_v3, %v843_v56  ;;  %v856_v16 = vrot.slane %v851_v10, 4  ;;  %v858_v20 = vrot.slane %v839_v6, 4 }
 0x279   :  { %v803_v0 = vsel %vm164_vm1, %v802_v12, %v785_v32  ;;  %v863_v21 = vsel %vm164_vm1, %v855_v28, %v862_v14  ;;  %v805_v22 = vsel %vm164_vm1, %v797_v58, %v804_v31 }
 0x27a   :  { %1421 = vmatpush.msra.mxu3 %v861_v7  ;;  %1283 = vmatpush.msra.mxu1 %v803_v0  ;;  %v857_v23 = vsel %vm164_vm1, %v856_v16, %v839_v6  ;;  %v859_v17 = vsel %vm164_vm1, %v851_v10, %v858_v20 }
 0x27b   :  { %1444 = vmatpush.msrb.mxu0 %v863_v21  ;;  %1306 = vmatpush.msra.mxu2 %v805_v22 }
 0x27c   :  { %1375 = vmatpush.msrb.mxu1 %v857_v23 }
 0x27d   :  { %1398 = vmatpush.msrb.mxu2 %v859_v17 }
 0x2a8   :  { %v1123_v54 = vpop.xlane.xlu2 %1122 }
 0x2a9   :  { %3833 = vrcp.f32 %v1123_v54  ;;  %v1156_v29 = vand.u32 2147483648, %v1123_v54  ;;  %v1154_v41 = vand.u32 2147483647, %v1123_v54  ;;  %vm1150_vm4 = vweird.f32 %v1123_v54 }
 0x2ab   :  { %v1157_v42 = vor.u32 1.1754944e-38, %v1156_v29  ;;  %vm1155_vm6 = vcmp.eq.f32.partialorder %v1154_v41, 8.507059e+37 }
 0x2af   :  { %v3834_v24 = vpop.eup %3833 }
 0x2b0   :  { %v1146_v33 = vmul.f32 %v3834_v24, %v1123_v54  ;;  %v1126_v34 = vpop.xlane.xlu0 %1125  ;;  %vm1151_vm3 = vweird.f32 %v3834_v24 }
 0x2b1   :  { %3835 = vrcp.f32 %v1126_v34  ;;  %vm1152_vm5 = vmor %vm1150_vm4, %vm1151_vm3  ;;  %v1170_v63 = vand.u32 2147483648, %v1126_v34  ;;  %v1168_v50 = vand.u32 2147483647, %v1126_v34  ;;  %vm1164_vm8 = vweird.f32 %v1126_v34 }
 0x2b2   :  { %v1147_v36 = vsub.f32 1.0, %v1146_v33 }
 0x2b3   :  { %v1171_v43 = vor.u32 1.1754944e-38, %v1170_v63  ;;  %vm1169_vm10 = vcmp.eq.f32.partialorder %v1168_v50, 8.507059e+37 }
 0x2b4   :  { %v1148_v39 = vmul.f32 %v3834_v24, %v1147_v36 }
 0x2b6   :  { %v1149_v1 = vadd.f32 %v3834_v24, %v1148_v39 }
 0x2b7   :  { %v3836_v15 = vpop.eup %3835 }
 0x2b8   :  { %v1153_v62 = vsel %vm1152_vm5, %v3834_v24, %v1149_v1  ;;  %v1160_v18 = vmul.f32 %v3836_v15, %v1126_v34  ;;  %v1129_v9 = vpop.xlane.xlu1 %1128  ;;  %vm1165_vm7 = vweird.f32 %v3836_v15 }
 0x2b9   :  { %v1158_v45 = vsel %vm1155_vm6, %v1157_v42, %v1153_v62  ;;  %3837 = vrcp.f32 %v1129_v9  ;;  %vm1166_vm9 = vmor %vm1164_vm8, %vm1165_vm7  ;;  %v1184_v53 = vand.u32 2147483648, %v1129_v9  ;;  %v1182_v55 = vand.u32 2147483647, %v1129_v9 }
 0x2ba   :  { %v1161_v46 = vsub.f32 1.0, %v1160_v18  ;;  %v1257_v49 = vmul.f32 %v4326_v25, %v1158_v45  ;;  %vm1178_vm12 = vweird.f32 %v1129_v9 }
 0x2bb   :  { %v1138_v37 = vpop.xlane.xlu2 %1137  ;;  %v1185_v10 = vor.u32 1.1754944e-38, %v1184_v53  ;;  %vm1183_vm15 = vcmp.eq.f32.partialorder %v1182_v55, 8.507059e+37 }
 0x2bc   :  { %v1162_v38 = vmul.f32 %v3836_v15, %v1161_v46  ;;  %3713 = vmatmul.msk.f32.vlgmr.msra.gmra.mxu1 %vm864_vm2, %v1257_v49  ;;  %3839 = vrcp.f32 %v1138_v37  ;;  %v1226_v61 = vand.u32 2147483648, %v1138_v37  ;;  %v1224_v4 = vand.u32 2147483647, %v1138_v37 }
 0x2bd   :  { %vm1220_vm3 = vweird.f32 %v1138_v37 }
 0x2be   :  { %v1163_v5 = vadd.f32 %v3836_v15, %v1162_v38  ;;  %v1227_v7 = vor.u32 1.1754944e-38, %v1226_v61  ;;  %vm1225_vm5 = vcmp.eq.f32.partialorder %v1224_v4, 8.507059e+37 }
 0x2bf   :  { %v3838_v51 = vpop.eup %3837 }
 0x2c0   :  { %v1167_v52 = vsel %vm1166_vm9, %v3836_v15, %v1163_v5  ;;  %v1174_v35 = vmul.f32 %v3838_v51, %v1129_v9  ;;  %v1132_v48 = vpop.xlane.xlu1 %1131  ;;  %vm1179_vm11 = vweird.f32 %v3838_v51 }
 0x2c1   :  { %v1172_v56 = vsel %vm1169_vm10, %v1171_v43, %v1167_v52  ;;  %3841 = vrcp.f32 %v1132_v48  ;;  %vm1180_vm13 = vmor %vm1178_vm12, %vm1179_vm11  ;;  %v1198_v0 = vand.u32 2147483648, %v1132_v48  ;;  %v1196_v23 = vand.u32 2147483647, %v1132_v48 }
 0x2c2   :  { %v3840_v25 = vpop.eup %3839  ;;  %v1175_v59 = vsub.f32 1.0, %v1174_v35  ;;  %v1258_v27 = vmul.f32 %v4330_v13, %v1172_v56  ;;  %vm1192_vm7 = vweird.f32 %v1132_v48 }
 0x2c3   :  { %v1216_v28 = vmul.f32 %v3840_v25, %v1138_v37  ;;  %vm1221_vm14 = vweird.f32 %v3840_v25  ;;  %v1199_v34 = vor.u32 1.1754944e-38, %v1198_v0  ;;  %vm1197_vm9 = vcmp.eq.f32.partialorder %v1196_v23, 8.507059e+37 }
 0x2c4   :  { %v1176_v32 = vmul.f32 %v3838_v51, %v1175_v59  ;;  %3714 = vmatmul.msk.f32.vlgmr.msra.gmra.mxu2 %vm864_vm2, %v1258_v27  ;;  %vm1222_vm4 = vmor %vm1220_vm3, %vm1221_vm14 }
 0x2c5   :  { %v1217_v44 = vsub.f32 1.0, %v1216_v28 }
 0x2c6   :  { %v1177_v58 = vadd.f32 %v3838_v51, %v1176_v32 }
 0x2c7   :  { %v3842_v2 = vpop.eup %3841  ;;  %v1218_v3 = vmul.f32 %v3840_v25, %v1217_v44 }
 0x2c8   :  { %v1181_v6 = vsel %vm1180_vm13, %v3838_v51, %v1177_v58  ;;  %v1188_v11 = vmul.f32 %v3842_v2, %v1132_v48  ;;  %v1135_v13 = vpop.xlane.xlu1 %1134  ;;  %v1141_v12 = vpop.xlane.xlu0 %1140  ;;  %vm1193_vm6 = vweird.f32 %v3842_v2 }
 0x2c9   :  { %v1219_v14 = vadd.f32 %v3840_v25, %v1218_v3  ;;  %3843 = vrcp.f32 %v1135_v13  ;;  %v1186_v31 = vsel %vm1183_vm15, %v1185_v10, %v1181_v6  ;;  %vm1194_vm8 = vmor %vm1192_vm7, %vm1193_vm6  ;;  %v1212_v42 = vand.u32 2147483648, %v1135_v13 }
 0x2ca   :  { %v1189_v16 = vsub.f32 1.0, %v1188_v11  ;;  %3845 = vrcp.f32 %v1141_v12  ;;  %v1259_v17 = vmul.f32 %v4334_v47, %v1186_v31  ;;  %v1210_v9 = vand.u32 2147483647, %v1135_v13 }
 0x2cb   :  { %v1223_v20 = vsel %vm1222_vm4, %v3840_v25, %v1219_v14  ;;  %v1240_v45 = vand.u32 2147483648, %v1141_v12  ;;  %v1238_v49 = vand.u32 2147483647, %v1141_v12  ;;  %vm1206_vm12 = vweird.f32 %v1135_v13 }
 0x2cc   :  { %v1228_v21 = vsel %vm1225_vm5, %v1227_v7, %v1223_v20  ;;  %v1190_v22 = vmul.f32 %v3842_v2, %v1189_v16  ;;  %3715 = vmatmul.msk.f32.vlgmr.msrb.gmra.mxu3 %vm864_vm2, %v1259_v17  ;;  %v1213_v38 = vor.u32 1.1754944e-38, %v1212_v42  ;;  %vm1234_vm14 = vweird.f32 %v1141_v12 }
 0x2cd   :  { %v1262_v54 = vmul.f32 %v4338_v30, %v1228_v21  ;;  %vm1211_vm15 = vcmp.eq.f32.partialorder %v1210_v9, 8.507059e+37  ;;  %vm1239_vm4 = vcmp.eq.f32.partialorder %v1238_v49, 8.507059e+37 }
 0x2ce   :  { %v1191_v24 = vadd.f32 %v3842_v2, %v1190_v22 }
 0x2cf   :  { %v3844_v33 = vpop.eup %3843  ;;  %3718 = vmatmul.msk.f32.vlgmr.msrb.gmra.mxu2 %vm864_vm2, %v1262_v54 }
 0x2d0   :  { %v3846_v36 = vpop.eup %3845  ;;  %v1195_v29 = vsel %vm1194_vm8, %v3842_v2, %v1191_v24  ;;  %v1202_v39 = vmul.f32 %v3844_v33, %v1135_v13  ;;  %v1144_v41 = vpop.xlane.xlu0 %1143  ;;  %vm1207_vm10 = vweird.f32 %v3844_v33 }
 0x2d1   :  { %v1200_v1 = vsel %vm1197_vm9, %v1199_v34, %v1195_v29  ;;  %v1230_v15 = vmul.f32 %v3846_v36, %v1141_v12  ;;  %3847 = vrcp.f32 %v1144_v41  ;;  %vm1235_vm11 = vweird.f32 %v3846_v36  ;;  %vm1208_vm13 = vmor %vm1206_vm12, %vm1207_vm10 }
 0x2d2   :  { %v1203_v47 = vsub.f32 1.0, %v1202_v39  ;;  %v1260_v62 = vmul.f32 %v4342_v19, %v1200_v1  ;;  %vm1236_vm3 = vmor %vm1234_vm14, %vm1235_vm11  ;;  %v1241_v19 = vor.u32 1.1754944e-38, %v1240_v45  ;;  %v1254_v25 = vand.u32 2147483648, %v1144_v41 }
 0x2d3   :  { %v1231_v30 = vsub.f32 1.0, %v1230_v15  ;;  %v1252_v28 = vand.u32 2147483647, %v1144_v41  ;;  %vm1248_vm6 = vweird.f32 %v1144_v41  ;;  %vm1695_vm9 = vcmask 130048  }
 0x2d4   :  { %v1204_v18 = vmul.f32 %v3844_v33, %v1203_v47  ;;  %3716 = vmatmul.msk.f32.vlgmr.msra.gmra.mxu0 %vm864_vm2, %v1260_v62  ;;  %v1255_v53 = vor.u32 1.1754944e-38, %v1254_v25  ;;  %vm1698_vm10 = vcmask 195584  }
 0x2d5   :  { %v1232_v46 = vmul.f32 %v3846_v36, %v1231_v30  ;;  %vm1253_vm8 = vcmp.eq.f32.partialorder %v1252_v28, 8.507059e+37 }
 0x2d6   :  { %v1205_v63 = vadd.f32 %v3844_v33, %v1204_v18 }
 0x2d7   :  { %v3848_v37 = vpop.eup %3847  ;;  %v1233_v50 = vadd.f32 %v3846_v36, %v1232_v46 }
 0x2d8   :  { %v1209_v5 = vsel %vm1208_vm13, %v3844_v33, %v1205_v63  ;;  %v1244_v51 = vmul.f32 %v3848_v37, %v1144_v41  ;;  %vm1249_vm5 = vweird.f32 %v3848_v37 }
 0x2d9   :  { %v1214_v43 = vsel %vm1211_vm15, %v1213_v38, %v1209_v5  ;;  %v1237_v52 = vsel %vm1236_vm3, %v3846_v36, %v1233_v50  ;;  %vm1250_vm7 = vmor %vm1248_vm6, %vm1249_vm5 }
 0x2da   :  { %v1242_v35 = vsel %vm1239_vm4, %v1241_v19, %v1237_v52  ;;  %v1245_v48 = vsub.f32 1.0, %v1244_v51  ;;  %v1261_v56 = vmul.f32 %v4346_v57, %v1214_v43 }
 0x2db   :  { %v1263_v59 = vmul.f32 %v4348_v60, %v1242_v35 }
 0x2dc   :  { %v1246_v27 = vmul.f32 %v3848_v37, %v1245_v48  ;;  %3717 = vmatmul.msk.f32.vlgmr.msrb.gmra.mxu1 %vm864_vm2, %v1261_v56 }
 0x2dd   :  { %3719 = vmatmul.msk.f32.vlgmr.msra.gmra.mxu3 %vm864_vm2, %v1263_v59 }
 0x2de   :  { %v1247_v32 = vadd.f32 %v3848_v37, %v1246_v27 }
 0x2e0   :  { %v1251_v55 = vsel %vm1250_vm7, %v3848_v37, %v1247_v32 }
 0x2e1   :  { %v1256_v44 = vsel %vm1253_vm8, %v1255_v53, %v1251_v55 }
 0x2e2   :  { %v1264_v58 = vmul.f32 %v4357_v8, %v1256_v44 }
 0x2e4   :  { %3720 = vmatmul.msk.f32.vlgmr.msrb.gmra.mxu0 %vm864_vm2, %v1264_v58 }
 0x339   :  { %v1285_v57 = vpop.f32.mrf.mxu1 }
 0x33a   :  { %v1451_v61 = vrot.slane %v1285_v57, 4 }
 0x347   :  { %v1308_v60 = vpop.f32.mrf.mxu2 }
 0x348   :  { %v1463_v2 = vrot.slane %v1308_v60, 4 }
 0x34f   :  { %v1331_v3 = vpop.f32.mrf.mxu3 }
 0x350   :  { %v1449_v6 = vrot.slane %v1331_v3, 4  ;;  %v1452_v10 = vsel %vm164_vm1, %v1331_v3, %v1451_v61 }
 0x351   :  { %v1354_v4 = vpop.f32.mrf.mxu0  ;;  %v1460_v12 = vperm.slane %v1452_v10, %v4043_v26 }
 0x352   :  { %v1461_v11 = vrot.slane %v1354_v4, 4  ;;  %v1464_v13 = vsel %vm164_vm1, %v1354_v4, %v1463_v2  ;;  %v1450_v8 = vsel %vm164_vm1, %v1449_v6, %v1285_v57  ;;  %v1400_v62 = vpop.f32.mrf.mxu2 }
 0x353   :  { %v1472_v14 = vperm.slane %v1464_v13, %v4043_v26  ;;  %v1456_v7 = vperm.slane %v1450_v8, %v4043_v26  ;;  %v1487_v16 = vrot.slane %v1460_v12, 4  ;;  %v1519_v50 = vrot.slane %v1400_v62, 4 }
 0x354   :  { %v1462_v31 = vsel %vm164_vm1, %v1461_v11, %v1308_v60 }
 0x355   :  { %v1468_v20 = vperm.slane %v1462_v31, %v4043_v26  ;;  %v1485_v0 = vrot.slane %v1472_v14, 4  ;;  %v1475_v21 = vrot.slane %v1456_v7, 4  ;;  %v1488_v17 = vsel %vm164_vm1, %v1472_v14, %v1487_v16 }
 0x356   :  { %v1496_v24 = vperm.slane %v1488_v17, %v4051_v40 }
 0x357   :  { %v1473_v22 = vrot.slane %v1468_v20, 4  ;;  %v1486_v23 = vsel %vm164_vm1, %v1485_v0, %v1460_v12  ;;  %v1476_v34 = vsel %vm164_vm1, %v1468_v20, %v1475_v21 }
 0x358   :  { %v1492_v54 = vperm.slane %v1486_v23, %v4051_v40  ;;  %v1484_v29 = vperm.slane %v1476_v34, %v4051_v40  ;;  %v1503_v41 = vrot.slane %v1496_v24, 4 }
 0x359   :  { %v1474_v33 = vsel %vm164_vm1, %v1473_v22, %v1456_v7  ;;  %v1377_v1 = vpop.f32.mrf.mxu1 }
 0x35a   :  { %v1480_v36 = vperm.slane %v1474_v33, %v4051_v40  ;;  %v1501_v39 = vrot.slane %v1492_v54, 4  ;;  %v1499_v47 = vrot.slane %v1484_v29, 4  ;;  %v1504_v30 = vsel %vm164_vm1, 0.0, %v1503_v41 }
 0x35b   :  { %v1572_v18 = vsel %vm164_vm1, %v1503_v41, %v1492_v54  ;;  %v1577_v9 = vrot.slane %v1504_v30, 4  ;;  %v1507_v45 = vrot.slane %v1377_v1, 4 }
 0x35c   :  { %v1497_v15 = vrot.slane %v1480_v36, 4  ;;  %v1502_v42 = vsel %vm164_vm1, 0.0, %v1501_v39  ;;  %v1500_v46 = vsel %vm164_vm1, 0.0, %v1499_v47  ;;  %v4479_v49 = vperm.slane %v1572_v18, %v4043_v26 }
 0x35d   :  { %v1561_v37 = vsel %vm164_vm1, %v1499_v47, %v1480_v36  ;;  %v1566_v38 = vrot.slane %v1500_v46, 4  ;;  %v1578_v51 = vsel %vm164_vm1, %v1577_v9, %v1502_v42 }
 0x35e   :  { %v1498_v63 = vsel %vm164_vm1, 0.0, %v1497_v15  ;;  %v1565_v19 = vperm.slane %v1561_v37, %v4043_v26  ;;  %v1582_v48 = vperm.slane %v1578_v51, %v4043_v26  ;;  %v1597_v56 = vrot.slane %v4479_v49, 4 }
 0x35f   :  { %v1567_v28 = vsel %vm164_vm1, %v1566_v38, %v1498_v63 }
 0x360   :  { %v1423_v5 = vpop.f32.mrf.mxu3  ;;  %v1571_v55 = vperm.slane %v1567_v28, %v4043_v26  ;;  %v1585_v44 = vrot.slane %v1565_v19, 4  ;;  %v1598_v61 = vsel %vm164_vm1, %v1582_v48, %v1597_v56 }
 0x361   :  { %v1505_v43 = vrot.slane %v1423_v5, 4  ;;  %v1508_v52 = vsel %vm164_vm1, %v1423_v5, %v1507_v45  ;;  %v1446_v35 = vpop.f32.mrf.mxu0  ;;  %v1606_v6 = vperm.slane %v1598_v61, %v4051_v40 }
 0x362   :  { %v1516_v25 = vperm.slane %v1508_v52, %v4043_v26  ;;  %v1517_v59 = vrot.slane %v1446_v35, 4  ;;  %v1520_v27 = vsel %vm164_vm1, %v1446_v35, %v1519_v50  ;;  %v1586_v4 = vsel %vm164_vm1, %v1571_v55, %v1585_v44 }
 0x363   :  { %v1506_v32 = vsel %vm164_vm1, %v1505_v43, %v1377_v1  ;;  %v1528_v53 = vperm.slane %v1520_v27, %v4043_v26  ;;  %v1594_v13 = vperm.slane %v1586_v4, %v4051_v40  ;;  %v1583_v12 = vrot.slane %v1571_v55, 4 }
 0x364   :  { %v1512_v58 = vperm.slane %v1506_v32, %v4043_v26  ;;  %v1543_v57 = vrot.slane %v1516_v25, 4  ;;  %v1518_v60 = vsel %vm164_vm1, %v1517_v59, %v1400_v62  ;;  %v1611_v7 = vrot.slane %v1606_v6, 4 }
 0x365   :  { %v1524_v2 = vperm.slane %v1518_v60, %v4043_v26  ;;  %v1541_v3 = vrot.slane %v1528_v53, 4  ;;  %v1613_v0 = vrot.slane %v1594_v13, 4  ;;  %v1584_v21 = vsel %vm164_vm1, %v1583_v12, %v1565_v19  ;;  %v139_v12 = vld [vmem:[#allocation2 + $0x68] sm:$0xff] }
 0x366   :  { %v1531_v10 = vrot.slane %v1512_v58, 4  ;;  %v1544_v11 = vsel %vm164_vm1, %v1528_v53, %v1543_v57  ;;  %v1612_v54 = vsel %vm164_vm1, %v1611_v7, %v1594_v13  ;;  %v1590_v36 = vperm.slane %v1584_v21, %v4051_v40  ;;  %v140_v13 = vld [vmem:[#allocation2 + $0x70] sm:$0xff] }
 0x367   :  { %v1529_v14 = vrot.slane %v1524_v2, 4  ;;  %v1542_v8 = vsel %vm164_vm1, %v1541_v3, %v1516_v25  ;;  %v1552_v31 = vperm.slane %v1544_v11, %v4051_v40  ;;  %1679 = vrot.lane.b32.xlu1 %v1612_v54, %s3957_s12  ;;  %v1614_v34 = vsel %vm164_vm1, %v1606_v6, %v1613_v0  ;;  %v141_v11 = vld [vmem:[#allocation2 + $0x78] sm:$0xff] }
 0x368   :  { %v1532_v16 = vsel %vm164_vm1, %v1524_v2, %v1531_v10  ;;  %v1548_v20 = vperm.slane %v1542_v8, %v4051_v40  ;;  %1687 = vrot.lane.b32.xlu0 %v1614_v34, %s3958_s13  ;;  %v1595_v1 = vrot.slane %v1582_v48, 4  ;;  %v1609_v9 = vrot.slane %v1590_v36, 4  ;;  %1720 = vmatpush.msra.mxu1 %v141_v11 }
 0x369   :  { %v1530_v22 = vsel %vm164_vm1, %v1529_v14, %v1512_v58  ;;  %v1540_v23 = vperm.slane %v1532_v16, %v4051_v40  ;;  %v1559_v17 = vrot.slane %v1552_v31, 4  ;;  %v138_v14 = vld [vmem:[#allocation2 + $0x60] sm:$0xff] }
 0x36a   :  { %v1536_v24 = vperm.slane %v1530_v22, %v4051_v40  ;;  %v1557_v33 = vrot.slane %v1548_v20, 4  ;;  %v1596_v18 = vsel %vm164_vm1, %v1595_v1, %v4479_v49  ;;  %1721 = vmatpush.msra.mxu1 %v140_v13 }
 0x36b   :  { %v1555_v29 = vrot.slane %v1540_v23, 4  ;;  %v1560_v39 = vsel %vm164_vm1, 0.0, %v1559_v17  ;;  %v1626_v41 = vsel %vm164_vm1, %v1559_v17, %v1548_v20  ;;  %v1602_v63 = vperm.slane %v1596_v18, %v4051_v40  ;;  %v1831_v18 = vld [vmem:[#allocation2 + $0xb0] sm:$0xff] }
 0x36c   :  { %v1553_v15 = vrot.slane %v1536_v24, 4  ;;  %v1558_v47 = vsel %vm164_vm1, 0.0, %v1557_v33  ;;  %v1630_v42 = vperm.slane %v1626_v41, %v4043_v26  ;;  %v1631_v30 = vrot.slane %v1560_v39, 4  ;;  %1722 = vmatpush.msra.mxu1 %v139_v12  ;;  %v3804_v33 = vld [vmem:[%s5194_s4 + $0x3] ss:$0 sm:$0xff] }
 0x36d   :  { %v1556_v62 = vsel %vm164_vm1, 0.0, %v1555_v29  ;;  %v1615_v45 = vsel %vm164_vm1, %v1555_v29, %v1536_v24  ;;  %v1607_v19 = vrot.slane %v1602_v63, 4  ;;  %v1610_v51 = vsel %vm164_vm1, %v1602_v63, %v1609_v9  ;;  %v3895_v29 = vld [vmem:[%s5190_s0] sm:$0xff] }
 0x36e   :  { %v1620_v46 = vrot.slane %v1556_v62, 4  ;;  %v1554_v37 = vsel %vm164_vm1, 0.0, %v1553_v15  ;;  %v1619_v38 = vperm.slane %v1615_v45, %v4043_v26  ;;  %v1632_v50 = vsel %vm164_vm1, %v1631_v30, %v1558_v47  ;;  %1671 = vrot.lane.b32.xlu2 %v1610_v51, %s3951_s24  ;;  %1723 = vmatpush.msra.mxu1 %v138_v14  ;;  %v3896_v47 = vld [vmem:[%s5190_s0 + $0x8] sm:$0xff]  ;;  %v1832_v62 = vld [vmem:[#allocation2 + $0xb8] sm:$0xff]  ;;  %v4570_v63 = vld [vmem:[%s5191_s1] sm:$0xff] }
 0x36f   :  { %v1651_v5 = vrot.slane %v1630_v42, 4  ;;  %v1636_v49 = vperm.slane %v1632_v50, %v4043_v26  ;;  %v1608_v25 = vsel %vm164_vm1, %v1607_v19, %v1590_v36  ;;  %1853 = vmatpush.msrb.mxu3 %v1832_v62  ;;  %v3959_v9 = vmov 32.0   ;;  %v1830_v45 = vld [vmem:[#allocation2 + $0xa8] sm:$0xff] }
 0x370   :  { %v1621_v43 = vsel %vm164_vm1, %v1620_v46, %v1554_v37  ;;  %v1639_v35 = vrot.slane %v1619_v38, 4  ;;  %3849 = vrcp.f32 %v3959_v9  ;;  %v1829_v46 = vld [vmem:[#allocation2 + $0xa0] sm:$0xff]  ;;  %v4577_v50 = vld [vmem:[%s5191_s1 + $0x8] sm:$0xff] }
 0x371   :  { %v1625_v52 = vperm.slane %v1621_v43, %v4043_v26  ;;  %v1652_v48 = vsel %vm164_vm1, %v1636_v49, %v1651_v5  ;;  %v1649_v56 = vrot.slane %v1636_v49, 4  ;;  %1854 = vmatpush.msrb.mxu3 %v1831_v18 }
 0x372   :  { %v1660_v27 = vperm.slane %v1652_v48, %v4051_v40 }
 0x373   :  { %v1640_v59 = vsel %vm164_vm1, %v1625_v52, %v1639_v35  ;;  %v1637_v28 = vrot.slane %v1625_v52, 4  ;;  %v1650_v53 = vsel %vm164_vm1, %v1649_v56, %v1630_v42  ;;  %1855 = vmatpush.msrb.mxu3 %v1830_v45 }
 0x374   :  { %v1648_v32 = vperm.slane %v1640_v59, %v4051_v40  ;;  %v1665_v55 = vrot.slane %v1660_v27, 4  ;;  %v1656_v58 = vperm.slane %v1650_v53, %v4051_v40 }
 0x375   :  { %v1638_v44 = vsel %vm164_vm1, %v1637_v28, %v1619_v38  ;;  %1856 = vmatpush.msrb.mxu3 %v1829_v46 }
 0x376   :  { %v1667_v57 = vrot.slane %v1648_v32, 4  ;;  %v1644_v60 = vperm.slane %v1638_v44, %v4051_v40  ;;  %v1666_v61 = vsel %vm164_vm1, %v1665_v55, %v1648_v32  ;;  %v1661_v2 = vrot.slane %v1656_v58, 4  ;;  %v3850_v37 = vpop.eup %3849  ;;  %3725 = vmatmul.msk.f32.vlgmr.msrb.gmra.mxu3 %vm47_vm0, %v4570_v63  ;;  %v3806_v55 = vld [vmem:[%s5194_s4 + $0x5] ss:$0 sm:$0xff] }
 0x377   :  { %1681 = vrot.lane.b32.xlu0 %v1666_v61, %s3957_s12  ;;  %v1742_v38 = vmul.f32 32.0, %v3850_v37  ;;  %vm1746_vm11 = vweird.f32 %v3850_v37  ;;  %v1796_v61 = vld [vmem:[#allocation2 + $0x98] sm:$0xff] }
 0x378   :  { %v1668_v3 = vsel %vm164_vm1, %v1660_v27, %v1667_v57  ;;  %v1663_v4 = vrot.slane %v1644_v60, 4  ;;  %v1662_v6 = vsel %vm164_vm1, %v1661_v2, %v1644_v60  ;;  %v1795_v2 = vld [vmem:[#allocation2 + $0x90] sm:$0xff]  ;;  %1817 = vmatpush.msra.mxu2 %v1796_v61 }
 0x379   :  { %1689 = vrot.lane.b32.xlu1 %v1668_v3, %s3958_s13  ;;  %v1743_v5 = vsub.f32 1.0, %v1742_v38  ;;  %v1794_v3 = vld [vmem:[#allocation2 + $0x88] sm:$0xff] }
 0x37a   :  { %v1664_v10 = vsel %vm164_vm1, %v1656_v58, %v1663_v4  ;;  %1818 = vmatpush.msra.mxu2 %v1795_v2  ;;  %v1793_v4 = vld [vmem:[#allocation2 + $0x80] sm:$0xff] }
 0x37b   :  { %1673 = vrot.lane.b32.xlu2 %v1664_v10, %s3951_s24  ;;  %v1744_v19 = vmul.f32 %v3850_v37, %v1743_v5 }
 0x37c   :  { %1819 = vmatpush.msra.mxu2 %v1794_v3 }
 0x37d   :  { %v1745_v51 = vadd.f32 %v3850_v37, %v1744_v19 }
 0x37e   :  { %3726 = vmatmul.msk.f32.gmra.mxu3 %vm47_vm0, %v4577_v50  ;;  %1820 = vmatpush.msra.mxu2 %v1793_v4 }
 0x37f   :  { %v4581_v43 = vsel %vm1746_vm11, %v3850_v37, %v1745_v51 }
 0x3c8   :  { %v1672_v8 = vpop.permute.xlu2 %1671 }
 0x3c9   :  { %v1693_v31 = vsel %vm864_vm2, %v1608_v25, %v1672_v8 }
 0x3d5   :  { %v1674_v21 = vpop.permute.xlu2 %1673 }
 0x3d6   :  { %v1694_v22 = vsel %vm864_vm2, %v1662_v6, %v1674_v21 }
 0x3d9   :  { %v1680_v7 = vpop.permute.xlu1 %1679 }
 0x3da   :  { %v1696_v16 = vsel %vm1695_vm9, %v1693_v31, %v1680_v7  ;;  %v1688_v20 = vpop.permute.xlu0 %1687 }
 0x3db   :  { %v1699_v0 = vsel %vm1698_vm10, %v1696_v16, %v1688_v20 }
 0x3dc   :  { %3721 = vmatmul.msk.f32.vlgmr.msra.gmra.mxu1 %vm47_vm0, %v1699_v0  ;;  %v3805_v0 = vld [vmem:[%s5194_s4 + $0xa] ss:$0 sm:$0xff] }
 0x3e9   :  { %v1682_v23 = vpop.permute.xlu0 %1681 }
 0x3ea   :  { %v1697_v17 = vsel %vm1695_vm9, %v1694_v22, %v1682_v23  ;;  %v3807_v23 = vld [vmem:[%s5194_s4 + $0xb] ss:$0 sm:$0xff] }
 0x3eb   :  { %v1690_v54 = vpop.permute.xlu1 %1689 }
 0x3ec   :  { %v1700_v24 = vsel %vm1698_vm10, %v1697_v17, %v1690_v54 }
 0x3ed   :  { %3722 = vmatmul.msk.f32.gmra.mxu1 %vm47_vm0, %v1700_v24 }
 0x3f9   :  { %v1858_v58 = vpop.f32.mrf.mxu3 }
 0x3fa   :  { %v4591_v57 = vadd.f32 %v3806_v55, %v1858_v58 }
 0x3fc   :  { %v2162_v62 = vrot.slane %v4591_v57, 4 }
 0x401   :  { %v1861_v6 = vpop.f32.mrf.mxu3 }
 0x402   :  { %v4599_v10 = vadd.f32 %v3806_v55, %v1861_v6 }
 0x459   :  { %v1725_v34 = vpop.f32.mrf.mxu1 }
 0x45a   :  { %v1726_v36 = vadd.f32 %v3804_v33, %v1725_v34 }
 0x45c   :  { %v1731_v39 = vadd.f32 %v3895_v29, %v1726_v36 }
 0x45e   :  { %v1735_v41 = vsel %vm47_vm0, %v1731_v39, 0.0 }
 0x45f   :  { %1736 = vadd.xlane.f32.xlu2 %v1735_v41 }
 0x46a   :  { %v1728_v1 = vpop.f32.mrf.mxu1 }
 0x46b   :  { %v1729_v15 = vadd.f32 %v3804_v33, %v1728_v1 }
 0x46d   :  { %v1732_v42 = vadd.f32 %v3896_v47, %v1729_v15 }
 0x46f   :  { %v1738_v30 = vsel %vm47_vm0, %v1732_v42, 0.0 }
 0x470   :  { %1739 = vadd.xlane.f32.xlu0 %v1738_v30  ;;  %v1868_v30 = vld [vmem:[#allocation2 + $0xd8] sm:$0xff] }
 0x471   :  { %1883 = vmatpush.msra.mxu0 %v1868_v30 }
 0x484   :  { %2142 = vrot.lane.b32.xlu0 %v4591_v57, %s3954_s9 }
 0x48c   :  { %2156 = vrot.lane.b32.xlu0 %v4599_v10, %s3953_s8 }
 0x4d2   :  { %v1737_v49 = vpop.xlane.xlu2 %1736 }
 0x4d3   :  { %v1748_v52 = vmul.f32 %v4581_v43, %v1737_v49 }
 0x4d5   :  { %v1750_v35 = vsub.f32 %v1731_v39, %v1748_v52 }
 0x4d7   :  { %v1752_v48 = vmul.f32 %v1750_v35, %v1750_v35 }
 0x4d9   :  { %v1754_v56 = vsel %vm47_vm0, %v1752_v48, 0.0 }
 0x4da   :  { %1755 = vadd.xlane.f32.xlu1 %v1754_v56 }
 0x4e3   :  { %v1740_v25 = vpop.xlane.xlu0 %1739 }
 0x4e4   :  { %v1749_v59 = vmul.f32 %v4581_v43, %v1740_v25 }
 0x4e6   :  { %v1751_v27 = vsub.f32 %v1732_v42, %v1749_v59 }
 0x4e8   :  { %v1753_v28 = vmul.f32 %v1751_v27, %v1751_v27 }
 0x4ea   :  { %v1757_v32 = vsel %vm47_vm0, %v1753_v28, 0.0 }
 0x4eb   :  { %1758 = vadd.xlane.f32.xlu2 %v1757_v32 }
 0x4f3   :  { %2148 = vrot.lane.b32.xlu1 %v4591_v57, %s3952_s7 }
 0x4f6   :  { %v2143_v45 = vpop.permute.xlu0 %2142 }
 0x4f7   :  { %v2174_v5 = vrot.slane %v2143_v45, 4 }
 0x4fb   :  { %2150 = vrot.lane.b32.xlu1 %v4599_v10, %s3952_s7 }
 0x4fe   :  { %v2157_v3 = vpop.permute.xlu0 %2156 }
 0x503   :  { %2154 = vrot.lane.b32.xlu2 %v4591_v57, %s3953_s8 }
 0x50b   :  { %2144 = vrot.lane.b32.xlu2 %v4599_v10, %s3954_s9 }
 0x54d   :  { %v1756_v53 = vpop.xlane.xlu1 %1755 }
 0x54e   :  { %v1760_v44 = vmul.f32 %v1756_v53, %v4581_v43 }
 0x550   :  { %v1762_v60 = vadd.f32 1e-05, %v1760_v44 }
 0x552   :  { %3851 = vrsqrt.f32 %v1762_v60  ;;  %vm1770_vm13 = vweird.f32 %v1762_v60 }
 0x558   :  { %v3852_v11 = vpop.eup %3851 }
 0x559   :  { %v1765_v13 = vmul.f32 %v3852_v11, %v1762_v60  ;;  %vm1771_vm12 = vweird.f32 %v3852_v11 }
 0x55a   :  { %vm1772_vm14 = vmor %vm1770_vm13, %vm1771_vm12 }
 0x55b   :  { %v1766_v12 = vmul.f32 %v3852_v11, %v1765_v13 }
 0x55d   :  { %v1767_v31 = vmul.f32 0.5, %v1766_v12 }
 0x55e   :  { %v1759_v14 = vpop.xlane.xlu2 %1758 }
 0x55f   :  { %v1761_v8 = vmul.f32 %v1759_v14, %v4581_v43  ;;  %v1768_v16 = vsub.f32 1.5, %v1767_v31 }
 0x561   :  { %v1763_v7 = vadd.f32 1e-05, %v1761_v8  ;;  %v1769_v20 = vmul.f32 %v3852_v11, %v1768_v16  ;;  %v2228_v8 = vrot.slane %v2157_v3, 4 }
 0x563   :  { %3853 = vrsqrt.f32 %v1763_v7  ;;  %v1773_v21 = vsel %vm1772_vm14, %v3852_v11, %v1769_v20  ;;  %vm1780_vm3 = vweird.f32 %v1763_v7 }
 0x564   :  { %v1784_v22 = vmul.f32 %v1773_v21, %v1750_v35  ;;  %v1867_v21 = vld [vmem:[#allocation2 + $0xd0] sm:$0xff] }
 0x565   :  { %v2149_v9 = vpop.permute.xlu1 %2148  ;;  %1884 = vmatpush.msra.mxu0 %v1867_v21 }
 0x566   :  { %v1787_v54 = vmul.f32 %v3805_v0, %v1784_v22  ;;  %v2155_v42 = vpop.permute.xlu2 %2154  ;;  %v2160_v46 = vrot.slane %v2149_v9, 4  ;;  %v2163_v37 = vsel %vm164_vm1, %v2149_v9, %v2162_v62  ;;  %v1866_v22 = vld [vmem:[#allocation2 + $0xc8] sm:$0xff] }
 0x567   :  { %v2172_v18 = vrot.slane %v2155_v42, 4  ;;  %v2171_v19 = vperm.slane %v2163_v37, %v4043_v26  ;;  %v2175_v35 = vsel %vm164_vm1, %v2155_v42, %v2174_v5  ;;  %1885 = vmatpush.msra.mxu0 %v1866_v22 }
 0x568   :  { %v4614_v33 = vadd.f32 %v3807_v23, %v1787_v54  ;;  %v2161_v52 = vsel %vm164_vm1, %v2160_v46, %v4591_v57  ;;  %v2183_v25 = vperm.slane %v2175_v35, %v4043_v26 }
 0x569   :  { %v3854_v17 = vpop.eup %3853  ;;  %v2173_v38 = vsel %vm164_vm1, %v2172_v18, %v2143_v45  ;;  %v2167_v48 = vperm.slane %v2161_v52, %v4043_v26  ;;  %v2198_v56 = vrot.slane %v2171_v19, 4 }
 0x56a   :  { %v1775_v24 = vmul.f32 %v3854_v17, %v1763_v7  ;;  %3723 = vmatmul.msk.f32.vlgmr.msra.gmra.mxu2 %vm47_vm0, %v4614_v33  ;;  %vm1781_vm15 = vweird.f32 %v3854_v17  ;;  %v2179_v51 = vperm.slane %v2173_v38, %v4043_v26  ;;  %v2196_v55 = vrot.slane %v2183_v25, 4 }
 0x56b   :  { %vm1782_vm4 = vmor %vm1780_vm3, %vm1781_vm15  ;;  %v2186_v32 = vrot.slane %v2167_v48, 4  ;;  %v2199_v44 = vsel %vm164_vm1, %v2183_v25, %v2198_v56 }
 0x56c   :  { %v1776_v34 = vmul.f32 %v3854_v17, %v1775_v24  ;;  %v2184_v59 = vrot.slane %v2179_v51, 4  ;;  %v2207_v57 = vperm.slane %v2199_v44, %v4051_v40  ;;  %v2197_v61 = vsel %vm164_vm1, %v2196_v55, %v2171_v19 }
 0x56d   :  { %v2187_v60 = vsel %vm164_vm1, %v2179_v51, %v2186_v32  ;;  %v2151_v2 = vpop.permute.xlu1 %2150  ;;  %v2203_v6 = vperm.slane %v2197_v61, %v4051_v40 }
 0x56e   :  { %v1777_v36 = vmul.f32 0.5, %v1776_v34  ;;  %v2145_v49 = vpop.permute.xlu2 %2144  ;;  %v2185_v53 = vsel %vm164_vm1, %v2184_v59, %v2167_v48  ;;  %v2195_v4 = vperm.slane %v2187_v60, %v4051_v40  ;;  %v2214_v13 = vrot.slane %v2207_v57, 4 }
 0x56f   :  { %v2230_v28 = vrot.slane %v2145_v49, 4  ;;  %v2191_v58 = vperm.slane %v2185_v53, %v4051_v40  ;;  %v2216_v12 = vrot.slane %v2151_v2, 4  ;;  %v2212_v20 = vrot.slane %v2203_v6, 4 }
 0x570   :  { %v1778_v29 = vsub.f32 1.5, %v1777_v36  ;;  %v2210_v16 = vrot.slane %v2195_v4, 4  ;;  %v2229_v62 = vsel %vm164_vm1, %v2228_v8, %v2145_v49 }
 0x571   :  { %v2208_v11 = vrot.slane %v2191_v58, 4  ;;  %v2231_v31 = vsel %vm164_vm1, %v2157_v3, %v2230_v28  ;;  %v2217_v54 = vsel %vm164_vm1, %v2216_v12, %v4599_v10  ;;  %v2213_v36 = vsel %vm164_vm1, 0.0, %v2212_v20 }
 0x572   :  { %v1779_v39 = vmul.f32 %v3854_v17, %v1778_v29  ;;  %v2211_v34 = vsel %vm164_vm1, 0.0, %v2210_v16  ;;  %v2272_v29 = vsel %vm164_vm1, %v2210_v16, %v2191_v58  ;;  %v2239_v18 = vperm.slane %v2231_v31, %v4043_v26 }
 0x573   :  { %v2209_v7 = vsel %vm164_vm1, 0.0, %v2208_v11  ;;  %v2235_v46 = vperm.slane %v2229_v62, %v4043_v26 }
 0x574   :  { %v1783_v41 = vsel %vm1782_vm4, %v3854_v17, %v1779_v39  ;;  %v2223_v39 = vperm.slane %v2217_v54, %v4043_v26  ;;  %v2252_v19 = vrot.slane %v2239_v18, 4 }
 0x575   :  { %v1785_v1 = vmul.f32 %v1783_v41, %v1751_v27  ;;  %v2218_v27 = vrot.slane %v4599_v10, 4  ;;  %v1865_v41 = vld [vmem:[#allocation2 + $0xc0] sm:$0xff]  ;;  %v2240_v49 = vrot.slane %v2235_v46, 4 }
 0x576   :  { %v2242_v10 = vrot.slane %v2223_v39, 4  ;;  %1886 = vmatpush.msra.mxu0 %v1865_v41 }
 0x577   :  { %v1788_v15 = vmul.f32 %v3805_v0, %v1785_v1  ;;  %v2219_v14 = vsel %vm164_vm1, %v2151_v2, %v2218_v27  ;;  %v2215_v0 = vsel %vm164_vm1, 0.0, %v2214_v13  ;;  %v2276_v1 = vperm.slane %v2272_v29, %v4043_v26  ;;  %3727 = vmatmul.msk.f32.vlgmr.msra.gmra.mxu0 %vm47_vm0, %v4570_v63 }
 0x578   :  { %v2288_v17 = vrot.slane %v2215_v0, 4  ;;  %v2227_v24 = vperm.slane %v2219_v14, %v4043_v26  ;;  %v2243_v35 = vsel %vm164_vm1, %v2235_v46, %v2242_v10  ;;  %v2241_v32 = vsel %vm164_vm1, %v2240_v49, %v2223_v39 }
 0x579   :  { %v4618_v47 = vadd.f32 %v3807_v23, %v1788_v15  ;;  %v2283_v23 = vsel %vm164_vm1, %v2214_v13, %v2203_v6  ;;  %v2277_v15 = vrot.slane %v2211_v34, 4  ;;  %v2296_v38 = vrot.slane %v2276_v1, 4 }
 0x57a   :  { %v2289_v42 = vsel %vm164_vm1, %v2288_v17, %v2213_v36  ;;  %v2254_v30 = vrot.slane %v2227_v24, 4  ;;  %v2287_v9 = vperm.slane %v2283_v23, %v4043_v26  ;;  %v2251_v25 = vperm.slane %v2243_v35, %v4051_v40 }
 0x57b   :  { %3724 = vmatmul.msk.f32.gmra.mxu2 %vm47_vm0, %v4618_v47  ;;  %v2278_v45 = vsel %vm164_vm1, %v2277_v15, %v2209_v7  ;;  %v2293_v37 = vperm.slane %v2289_v42, %v4043_v26  ;;  %v2253_v59 = vsel %vm164_vm1, %v2252_v19, %v2227_v24  ;;  %v2247_v44 = vperm.slane %v2241_v32, %v4051_v40 }
 0x57c   :  { %v2282_v5 = vperm.slane %v2278_v45, %v4043_v26  ;;  %v2255_v51 = vsel %vm164_vm1, %v2239_v18, %v2254_v30  ;;  %v2308_v52 = vrot.slane %v2287_v9, 4  ;;  %v2259_v53 = vperm.slane %v2253_v59, %v4051_v40  ;;  %v3808_v59 = vld [vmem:[%s5194_s4 + $0x4] ss:$0 sm:$0xff] }
 0x57d   :  { %v2263_v48 = vperm.slane %v2255_v51, %v4051_v40  ;;  %v2306_v56 = vrot.slane %v2293_v37, 4  ;;  %v2266_v58 = vrot.slane %v2251_v25, 4  ;;  %v2264_v6 = vrot.slane %v2247_v44, 4 }
 0x57e   :  { %v2294_v27 = vrot.slane %v2282_v5, 4  ;;  %v2297_v28 = vsel %vm164_vm1, %v2282_v5, %v2296_v38  ;;  %v2268_v61 = vrot.slane %v2259_v53, 4  ;;  %v2309_v54 = vsel %vm164_vm1, %v2293_v37, %v2308_v52 }
 0x57f   :  { %v2270_v55 = vrot.slane %v2263_v48, 4  ;;  %v2307_v63 = vsel %vm164_vm1, %v2306_v56, %v2287_v9  ;;  %v2267_v11 = vsel %vm164_vm1, 0.0, %v2266_v58  ;;  %v2265_v16 = vsel %vm164_vm1, 0.0, %v2264_v6  ;;  %3728 = vmatmul.msk.f32.gmra.mxu0 %vm47_vm0, %v4577_v50 }
 0x580   :  { %v2295_v57 = vsel %vm164_vm1, %v2294_v27, %v2276_v1  ;;  %v2313_v60 = vperm.slane %v2307_v63, %v4051_v40  ;;  %v2269_v14 = vsel %vm164_vm1, 0.0, %v2268_v61  ;;  %v2331_v8 = vrot.slane %v2267_v11, 4 }
 0x581   :  { %v2271_v2 = vsel %vm164_vm1, 0.0, %v2270_v55  ;;  %v2337_v3 = vsel %vm164_vm1, %v2270_v55, %v2259_v53  ;;  %v2301_v4 = vperm.slane %v2295_v57, %v4051_v40  ;;  %v2305_v21 = vperm.slane %v2297_v28, %v4051_v40 }
 0x582   :  { %v2341_v13 = vperm.slane %v2337_v3, %v4043_v26  ;;  %v2342_v12 = vrot.slane %v2271_v2, 4  ;;  %v2318_v31 = vrot.slane %v2313_v60, 4  ;;  %v2317_v24 = vperm.slane %v2309_v54, %v4051_v40 }
 0x583   :  { %v2320_v7 = vrot.slane %v2301_v4, 4  ;;  %v2324_v34 = vrot.slane %v2305_v21, 4  ;;  %v2326_v36 = vsel %vm164_vm1, %v2266_v58, %v2247_v44  ;;  %v2332_v29 = vsel %vm164_vm1, %v2331_v8, %v2265_v16 }
 0x584   :  { %v2343_v20 = vsel %vm164_vm1, %v2342_v12, %v2269_v14  ;;  %v2362_v0 = vrot.slane %v2341_v13, 4  ;;  %v2319_v23 = vsel %vm164_vm1, %v2318_v31, %v2301_v4  ;;  %v2330_v50 = vperm.slane %v2326_v36, %v4043_v26 }
 0x585   :  { %v2347_v22 = vperm.slane %v2343_v20, %v4043_v26  ;;  %v2321_v17 = vsel %vm164_vm1, %v2313_v60, %v2320_v7  ;;  %3729 = vmatpush.xpose.msk.msrb.mxu1 %vm864_vm2, %v2319_v23  ;;  %v2336_v39 = vperm.slane %v2332_v29, %v4043_v26  ;;  %v2322_v15 = vrot.slane %v2317_v24, 4 }
 0x586   :  { %3731 = vmatpush.xpose.msk.msrb.mxu2 %vm864_vm2, %v2321_v17  ;;  %v2325_v42 = vsel %vm164_vm1, %v2317_v24, %v2324_v34  ;;  %v2350_v18 = vrot.slane %v2330_v50, 4 }
 0x587   :  { %v2360_v41 = vrot.slane %v2347_v22, 4  ;;  %v2363_v1 = vsel %vm164_vm1, %v2347_v22, %v2362_v0  ;;  %3735 = vmatpush.xpose.msk.msrb.mxu0 %vm864_vm2, %v2325_v42  ;;  %v2348_v10 = vrot.slane %v2336_v39, 4  ;;  %v2323_v9 = vsel %vm164_vm1, %v2322_v15, %v2305_v21 }
 0x588   :  { %v2371_v30 = vperm.slane %v2363_v1, %v4051_v40  ;;  %3733 = vmatpush.xpose.msk.msra.mxu3 %vm864_vm2, %v2323_v9  ;;  %v2351_v38 = vsel %vm164_vm1, %v2336_v39, %v2350_v18 }
 0x589   :  { %v2361_v62 = vsel %vm164_vm1, %v2360_v41, %v2341_v13  ;;  %v2349_v37 = vsel %vm164_vm1, %v2348_v10, %v2330_v50  ;;  %v2359_v51 = vperm.slane %v2351_v38, %v4051_v40 }
 0x58a   :  { %v2367_v45 = vperm.slane %v2361_v62, %v4051_v40  ;;  %v2376_v46 = vrot.slane %v2371_v30, 4  ;;  %v2355_v5 = vperm.slane %v2349_v37, %v4051_v40 }
 0x58b   :  { %v2378_v48 = vrot.slane %v2359_v51, 4 }
 0x58c   :  { %v2372_v19 = vrot.slane %v2367_v45, 4  ;;  %v2374_v49 = vrot.slane %v2355_v5, 4  ;;  %v2377_v35 = vsel %vm164_vm1, %v2376_v46, %v2359_v51 }
 0x58d   :  { %3741 = vmatpush.xpose.msk.msrb.mxu3 %vm864_vm2, %v2377_v35  ;;  %v2379_v25 = vsel %vm164_vm1, %v2371_v30, %v2378_v48 }
 0x58e   :  { %v2373_v52 = vsel %vm164_vm1, %v2372_v19, %v2355_v5  ;;  %v2375_v56 = vsel %vm164_vm1, %v2367_v45, %v2374_v49  ;;  %3743 = vmatpush.xpose.msk.msra.mxu0 %vm864_vm2, %v2379_v25 }
 0x58f   :  { %3737 = vmatpush.xpose.msk.msra.mxu1 %vm864_vm2, %v2373_v52  ;;  %3739 = vmatpush.xpose.msk.msra.mxu2 %vm864_vm2, %v2375_v56 }
 0x5ed   :  { %v1822_v27 = vpop.f32.mrf.mxu2 }
 0x5ee   :  { %v1823_v28 = vadd.f32 %v3808_v59, %v1822_v27 }
 0x5f0   :  { %1908 = vrot.lane.b32.xlu1 %v1823_v28, %s3952_s7  ;;  %1902 = vrot.lane.b32.xlu0 %v1823_v28, %s3954_s9  ;;  %v1922_v44 = vrot.slane %v1823_v28, 4 }
 0x5f8   :  { %1914 = vrot.lane.b32.xlu0 %v1823_v28, %s3953_s8 }
 0x5fe   :  { %v1825_v32 = vpop.f32.mrf.mxu2 }
 0x5ff   :  { %v1826_v53 = vadd.f32 %v3808_v59, %v1825_v32 }
 0x601   :  { %1910 = vrot.lane.b32.xlu1 %v1826_v53, %s3952_s7  ;;  %1904 = vrot.lane.b32.xlu2 %v1826_v53, %s3954_s9  ;;  %v1978_v54 = vrot.slane %v1826_v53, 4 }
 0x602   :  { %1916 = vrot.lane.b32.xlu0 %v1826_v53, %s3953_s8 }
 0x65b   :  { %v1905_v20 = vpop.permute.xlu2 %1904 }
 0x65c   :  { %v1990_v50 = vrot.slane %v1905_v20, 4 }
 0x662   :  { %v1909_v55 = vpop.permute.xlu1 %1908  ;;  %v1903_v63 = vpop.permute.xlu0 %1902 }
 0x663   :  { %v1920_v58 = vrot.slane %v1909_v55, 4  ;;  %v1923_v57 = vsel %vm164_vm1, %v1909_v55, %v1922_v44  ;;  %v1934_v2 = vrot.slane %v1903_v63, 4 }
 0x664   :  { %v1931_v61 = vperm.slane %v1923_v57, %v4043_v26 }
 0x665   :  { %v1921_v60 = vsel %vm164_vm1, %v1920_v58, %v1823_v28 }
 0x666   :  { %v1927_v3 = vperm.slane %v1921_v60, %v4043_v26  ;;  %v1958_v13 = vrot.slane %v1931_v61, 4 }
 0x668   :  { %v1946_v8 = vrot.slane %v1927_v3, 4 }
 0x66a   :  { %v1915_v4 = vpop.permute.xlu0 %1914 }
 0x66b   :  { %v1932_v6 = vrot.slane %v1915_v4, 4  ;;  %v1935_v11 = vsel %vm164_vm1, %v1915_v4, %v1934_v2 }
 0x66c   :  { %v1943_v12 = vperm.slane %v1935_v11, %v4043_v26 }
 0x66d   :  { %v1933_v14 = vsel %vm164_vm1, %v1932_v6, %v1903_v63 }
 0x66e   :  { %v1939_v31 = vperm.slane %v1933_v14, %v4043_v26  ;;  %v1956_v7 = vrot.slane %v1943_v12, 4  ;;  %v1959_v16 = vsel %vm164_vm1, %v1943_v12, %v1958_v13 }
 0x66f   :  { %v1967_v0 = vperm.slane %v1959_v16, %v4051_v40 }
 0x670   :  { %v1944_v21 = vrot.slane %v1939_v31, 4  ;;  %v1947_v22 = vsel %vm164_vm1, %v1939_v31, %v1946_v8  ;;  %v1957_v23 = vsel %vm164_vm1, %v1956_v7, %v1931_v61 }
 0x671   :  { %v1955_v24 = vperm.slane %v1947_v22, %v4051_v40  ;;  %v1963_v34 = vperm.slane %v1957_v23, %v4051_v40  ;;  %v1974_v36 = vrot.slane %v1967_v0, 4 }
 0x672   :  { %v1945_v39 = vsel %vm164_vm1, %v1944_v21, %v1927_v3 }
 0x673   :  { %v1911_v17 = vpop.permute.xlu1 %1910  ;;  %v1951_v1 = vperm.slane %v1945_v39, %v4051_v40  ;;  %v1970_v15 = vrot.slane %v1955_v24, 4  ;;  %v1972_v42 = vrot.slane %v1963_v34, 4  ;;  %v1975_v30 = vsel %vm164_vm1, 0.0, %v1974_v36 }
 0x674   :  { %v1976_v29 = vrot.slane %v1911_v17, 4  ;;  %v1979_v41 = vsel %vm164_vm1, %v1911_v17, %v1978_v54  ;;  %v2043_v10 = vsel %vm164_vm1, %v1974_v36, %v1963_v34  ;;  %v2048_v62 = vrot.slane %v1975_v30, 4  ;;  %v1917_v45 = vpop.permute.xlu0 %1916 }
 0x675   :  { %v1987_v9 = vperm.slane %v1979_v41, %v4043_v26  ;;  %v1968_v46 = vrot.slane %v1951_v1, 4  ;;  %v1971_v37 = vsel %vm164_vm1, 0.0, %v1970_v15  ;;  %v1973_v38 = vsel %vm164_vm1, 0.0, %v1972_v42 }
 0x676   :  { %v1977_v18 = vsel %vm164_vm1, %v1976_v29, %v1826_v53  ;;  %v2032_v5 = vsel %vm164_vm1, %v1970_v15, %v1951_v1  ;;  %v2037_v19 = vrot.slane %v1971_v37, 4  ;;  %v2047_v51 = vperm.slane %v2043_v10, %v4043_v26 }
 0x677   :  { %v2049_v52 = vsel %vm164_vm1, %v2048_v62, %v1973_v38  ;;  %v1983_v49 = vperm.slane %v1977_v18, %v4043_v26  ;;  %v1969_v35 = vsel %vm164_vm1, 0.0, %v1968_v46  ;;  %v2014_v56 = vrot.slane %v1987_v9, 4 }
 0x678   :  { %v2053_v48 = vperm.slane %v2049_v52, %v4043_v26  ;;  %v1988_v25 = vrot.slane %v1917_v45, 4  ;;  %v2068_v59 = vrot.slane %v2047_v51, 4  ;;  %v1991_v28 = vsel %vm164_vm1, %v1917_v45, %v1990_v50 }
 0x679   :  { %v2002_v27 = vrot.slane %v1983_v49, 4  ;;  %v2036_v32 = vperm.slane %v2032_v5, %v4043_v26  ;;  %v1999_v55 = vperm.slane %v1991_v28, %v4043_v26  ;;  %v2038_v63 = vsel %vm164_vm1, %v2037_v19, %v1969_v35 }
 0x67a   :  { %v1989_v53 = vsel %vm164_vm1, %v1988_v25, %v1905_v20  ;;  %v2066_v44 = vrot.slane %v2053_v48, 4  ;;  %v2042_v57 = vperm.slane %v2038_v63, %v4043_v26  ;;  %v2069_v61 = vsel %vm164_vm1, %v2053_v48, %v2068_v59 }
 0x67b   :  { %v1995_v58 = vperm.slane %v1989_v53, %v4043_v26  ;;  %v2056_v60 = vrot.slane %v2036_v32, 4  ;;  %v2012_v2 = vrot.slane %v1999_v55, 4  ;;  %v2015_v3 = vsel %vm164_vm1, %v1999_v55, %v2014_v56 }
 0x67c   :  { %v2077_v4 = vperm.slane %v2069_v61, %v4051_v40  ;;  %v2067_v6 = vsel %vm164_vm1, %v2066_v44, %v2047_v51  ;;  %v2023_v12 = vperm.slane %v2015_v3, %v4051_v40  ;;  %v2054_v22 = vrot.slane %v2042_v57, 4 }
 0x67d   :  { %v2000_v11 = vrot.slane %v1995_v58, 4  ;;  %v2003_v13 = vsel %vm164_vm1, %v1995_v58, %v2002_v27  ;;  %v2057_v14 = vsel %vm164_vm1, %v2042_v57, %v2056_v60  ;;  %v2013_v31 = vsel %vm164_vm1, %v2012_v2, %v1987_v9 }
 0x67e   :  { %v2011_v8 = vperm.slane %v2003_v13, %v4051_v40  ;;  %v2065_v7 = vperm.slane %v2057_v14, %v4051_v40  ;;  %v2082_v16 = vrot.slane %v2077_v4, 4  ;;  %v2019_v0 = vperm.slane %v2013_v31, %v4051_v40  ;;  %v1888_v13 = vpop.f32.mrf.mxu0 }
 0x67f   :  { %v2001_v20 = vsel %vm164_vm1, %v2000_v11, %v1983_v49  ;;  %v2030_v21 = vrot.slane %v2023_v12, 4  ;;  %v2073_v24 = vperm.slane %v2067_v6, %v4051_v40  ;;  %v2055_v50 = vsel %vm164_vm1, %v2054_v22, %v2036_v32 }
 0x680   :  { %v2007_v23 = vperm.slane %v2001_v20, %v4051_v40  ;;  %v2026_v17 = vrot.slane %v2011_v8, 4  ;;  %v2083_v54 = vsel %vm164_vm1, %v2082_v16, %v2065_v7  ;;  %v2028_v34 = vrot.slane %v2019_v0, 4 }
 0x681   :  { %v2031_v36 = vsel %vm164_vm1, 0.0, %v2030_v21  ;;  %v2097_v29 = vsel %vm164_vm1, %v2030_v21, %v2019_v0  ;;  %3734 = vmatmul.msk.f32.vlgmr.msra.gmra.mxu3 %vm864_vm2, %v2083_v54  ;;  %v2061_v62 = vperm.slane %v2055_v50, %v4051_v40  ;;  %v2078_v45 = vrot.slane %v2073_v24, 4  ;;  %v3809_v50 = vld [vmem:[%s5194_s4 + $0x6] ss:$0 sm:$0xff] }
 0x682   :  { %v2024_v39 = vrot.slane %v2007_v23, 4  ;;  %v2027_v41 = vsel %vm164_vm1, 0.0, %v2026_v17  ;;  %v2086_v1 = vsel %vm164_vm1, %v2026_v17, %v2007_v23  ;;  %v2101_v15 = vperm.slane %v2097_v29, %v4043_v26 }
 0x683   :  { %v2029_v42 = vsel %vm164_vm1, 0.0, %v2028_v34  ;;  %v2091_v30 = vrot.slane %v2027_v41, 4  ;;  %v2102_v10 = vrot.slane %v2031_v36, 4  ;;  %v2084_v46 = vrot.slane %v2065_v7, 4 }
 0x684   :  { %v2025_v18 = vsel %vm164_vm1, 0.0, %v2024_v39  ;;  %v2122_v9 = vrot.slane %v2101_v15, 4  ;;  %v2080_v38 = vrot.slane %v2061_v62, 4  ;;  %v2090_v5 = vperm.slane %v2086_v1, %v4043_v26 }
 0x685   :  { %v2103_v37 = vsel %vm164_vm1, %v2102_v10, %v2029_v42  ;;  %v2092_v19 = vsel %vm164_vm1, %v2091_v30, %v2025_v18  ;;  %v2079_v52 = vsel %vm164_vm1, %v2078_v45, %v2061_v62  ;;  %v2085_v49 = vsel %vm164_vm1, %v2077_v4, %v2084_v46 }
 0x686   :  { %v2107_v51 = vperm.slane %v2103_v37, %v4043_v26  ;;  %v2096_v35 = vperm.slane %v2092_v19, %v4043_v26  ;;  %3730 = vmatmul.msk.f32.vlgmr.msrb.gmra.mxu1 %vm864_vm2, %v2079_v52  ;;  %3736 = vmatmul.msk.f32.vlgmr.msrb.gmra.mxu0 %vm864_vm2, %v2085_v49  ;;  %v2081_v48 = vsel %vm164_vm1, %v2073_v24, %v2080_v38  ;;  %v2110_v56 = vrot.slane %v2090_v5, 4  ;;  %v1891_v12 = vpop.f32.mrf.mxu0 }
 0x687   :  { %3732 = vmatmul.msk.f32.vlgmr.msrb.gmra.mxu2 %vm864_vm2, %v2081_v48  ;;  %v4829_v39 = vadd.f32 %v3809_v50, %v1888_v13  ;;  %v4831_v41 = vadd.f32 %v3809_v50, %v1891_v12 }
 0x688   :  { %v2123_v25 = vsel %vm164_vm1, %v2107_v51, %v2122_v9  ;;  %v2108_v59 = vrot.slane %v2096_v35, 4  ;;  %v2120_v27 = vrot.slane %v2107_v51, 4  ;;  %v2111_v28 = vsel %vm164_vm1, %v2096_v35, %v2110_v56 }
 0x689   :  { %v2131_v32 = vperm.slane %v2123_v25, %v4051_v40  ;;  %v2119_v53 = vperm.slane %v2111_v28, %v4051_v40  ;;  %v3786_v1 = vpack.i.bf16 %v4831_v41, %v4829_v39 }
 0x68a   :  { %v2109_v55 = vsel %vm164_vm1, %v2108_v59, %v2090_v5  ;;  %v2121_v63 = vsel %vm164_vm1, %v2120_v27, %v2101_v15 }
 0x68b   :  { %v2136_v44 = vrot.slane %v2131_v32, 4  ;;  %v2115_v58 = vperm.slane %v2109_v55, %v4051_v40  ;;  %v2127_v57 = vperm.slane %v2121_v63, %v4051_v40  ;;  %v2138_v60 = vrot.slane %v2119_v53, 4 }
 0x68d   :  { %v2137_v61 = vsel %vm164_vm1, %v2136_v44, %v2119_v53  ;;  %v2132_v2 = vrot.slane %v2127_v57, 4  ;;  %v2134_v3 = vrot.slane %v2115_v58, 4  ;;  %v2139_v4 = vsel %vm164_vm1, %v2131_v32, %v2138_v60 }
 0x68e   :  { %3742 = vmatmul.msk.f32.vlgmr.msrb.gmra.mxu3 %vm864_vm2, %v2137_v61  ;;  %3744 = vmatmul.msk.f32.vlgmr.msra.gmra.mxu0 %vm864_vm2, %v2139_v4 }
 0x68f   :  { %v2133_v6 = vsel %vm164_vm1, %v2132_v2, %v2115_v58  ;;  %v2135_v11 = vsel %vm164_vm1, %v2127_v57, %v2134_v3 }
 0x690   :  { %3738 = vmatmul.msk.f32.vlgmr.msra.gmra.mxu1 %vm864_vm2, %v2133_v6  ;;  %3740 = vmatmul.msk.f32.vlgmr.msra.gmra.mxu2 %vm864_vm2, %v2135_v11 }
 0x703   :  { %v2643_v14 = vpop.f32.mrf.mxu1  ;;  %v2721_v8 = vpop.f32.mrf.mxu0 }
 0x704   :  { %v2837_v31 = vsel %vm864_vm2, %v2721_v8, -inf  ;;  %v2828_v7 = vsel %vm864_vm2, %v2643_v14, -inf  ;;  %v2695_v16 = vpop.f32.mrf.mxu3 }
 0x705   :  { %2838 = vmax.xlane.f32.xlu2 %v2837_v31  ;;  %2829 = vmax.xlane.f32.xlu0 %v2828_v7  ;;  %v2834_v21 = vsel %vm864_vm2, %v2695_v16, -inf }
 0x70a   :  { %v2669_v20 = vpop.f32.mrf.mxu2 }
 0x70b   :  { %v2831_v0 = vsel %vm864_vm2, %v2669_v20, -inf  ;;  %v2825_v22 = vpop.f32.mrf.mxu0 }
 0x70c   :  { %2832 = vmax.xlane.f32.xlu1 %v2831_v0  ;;  %v2849_v54 = vsel %vm864_vm2, %v2825_v22, -inf  ;;  %v2402_v0 = vrot.slane %v4829_v39, 4 }
 0x70d   :  { %2835 = vmax.xlane.f32.xlu2 %v2834_v21  ;;  %v4819_v23 = vpop.f32.mrf.mxu1 }
 0x70e   :  { %v2840_v34 = vsel %vm864_vm2, %v4819_v23, -inf }
 0x711   :  { %v2799_v36 = vpop.f32.mrf.mxu3 }
 0x712   :  { %v2846_v29 = vsel %vm864_vm2, %v2799_v36, -inf }
 0x713   :  { %v2773_v17 = vpop.f32.mrf.mxu2 }
 0x714   :  { %v2843_v24 = vsel %vm864_vm2, %v2773_v17, -inf  ;;  %2850 = vmax.xlane.f32.xlu1 %v2849_v54 }
 0x715   :  { %2844 = vmax.xlane.f32.xlu0 %v2843_v24  ;;  %2841 = vmax.xlane.f32.xlu2 %v2840_v34 }
 0x71c   :  { %2847 = vmax.xlane.f32.xlu1 %v2846_v29 }
 0x729   :  { %3787 = vrot.lane.b32.xlu0 %v3786_v1, %s3954_s9 }
 0x72d   :  { %3792 = vrot.lane.b32.xlu2 %v3786_v1, %s3952_s7 }
 0x735   :  { %3797 = vrot.lane.b32.xlu1 %v3786_v1, %s3953_s8 }
 0x778   :  { %v2839_v15 = vpop.xlane.xlu2 %2838  ;;  %v2830_v42 = vpop.xlane.xlu0 %2829 }
 0x779   :  { %v2852_v30 = vsub.f32 %v2643_v14, %v2830_v42  ;;  %v2855_v37 = vsub.f32 %v2721_v8, %v2839_v15 }
 0x77b   :  { %v2860_v10 = vmul.f32 1.442695, %v2852_v30  ;;  %v2866_v51 = vmul.f32 1.442695, %v2855_v37 }
 0x77d   :  { %3855 = vpow2.f32 %v2860_v10 }
 0x77f   :  { %v2833_v62 = vpop.xlane.xlu1 %2832 }
 0x780   :  { %v2836_v18 = vpop.xlane.xlu2 %2835  ;;  %v2853_v9 = vsub.f32 %v2669_v20, %v2833_v62 }
 0x781   :  { %v2854_v45 = vsub.f32 %v2695_v16, %v2836_v18  ;;  %v2458_v16 = vrot.slane %v4831_v41, 4 }
 0x782   :  { %v2862_v46 = vmul.f32 1.442695, %v2853_v9 }
 0x783   :  { %v2864_v38 = vmul.f32 1.442695, %v2854_v45  ;;  %v4838_v5 = vpop.eup %3855 }
 0x784   :  { %3857 = vpow2.f32 %v2862_v46  ;;  %v2876_v19 = vsel %vm864_vm2, %v4838_v5, 0.0 }
 0x785   :  { %3859 = vpow2.f32 %v2864_v38  ;;  %2877 = vadd.xlane.f32.xlu1 %v2876_v19 }
 0x786   :  { %3861 = vpow2.f32 %v2866_v51 }
 0x787   :  { %v2851_v52 = vpop.xlane.xlu1 %2850 }
 0x788   :  { %v2859_v49 = vsub.f32 %v2825_v22, %v2851_v52  ;;  %v2845_v35 = vpop.xlane.xlu0 %2844  ;;  %v2842_v32 = vpop.xlane.xlu2 %2841 }
 0x789   :  { %v2857_v59 = vsub.f32 %v2773_v17, %v2845_v35  ;;  %v2856_v57 = vsub.f32 %v4819_v23, %v2842_v32 }
 0x78a   :  { %v4842_v48 = vpop.eup %3857  ;;  %v2874_v56 = vmul.f32 1.442695, %v2859_v49 }
 0x78b   :  { %v4844_v25 = vpop.eup %3859  ;;  %v2879_v27 = vsel %vm864_vm2, %v4842_v48, 0.0  ;;  %v2870_v53 = vmul.f32 1.442695, %v2857_v59  ;;  %v2868_v3 = vmul.f32 1.442695, %v2856_v57 }
 0x78c   :  { %3863 = vpow2.f32 %v2874_v56  ;;  %v2882_v28 = vsel %vm864_vm2, %v4844_v25, 0.0  ;;  %2880 = vadd.xlane.f32.xlu2 %v2879_v27  ;;  %v4850_v44 = vpop.eup %3861 }
 0x78d   :  { %2883 = vadd.xlane.f32.xlu0 %v2882_v28  ;;  %3865 = vpow2.f32 %v2870_v53  ;;  %v2885_v61 = vsel %vm864_vm2, %v4850_v44, 0.0 }
 0x78f   :  { %v2848_v55 = vpop.xlane.xlu1 %2847 }
 0x790   :  { %v2858_v63 = vsub.f32 %v2799_v36, %v2848_v55  ;;  %v3793_v6 = vpop.permute.xlu2 %3792 }
 0x791   :  { %v3794_v12 = vunpack.i.l.bf16 %v3793_v6  ;;  %v3795_v8 = vunpack.i.h.bf16 %v3793_v6 }
 0x792   :  { %v4852_v58 = vpop.eup %3863  ;;  %v2872_v60 = vmul.f32 1.442695, %v2858_v63 }
 0x793   :  { %v2897_v2 = vsel %vm864_vm2, %v4852_v58, 0.0  ;;  %v4859_v4 = vpop.eup %3865  ;;  %v2400_v7 = vrot.slane %v3794_v12, 4  ;;  %v2456_v21 = vrot.slane %v3795_v8, 4  ;;  %v2459_v22 = vsel %vm164_vm1, %v3795_v8, %v2458_v16 }
 0x794   :  { %3867 = vpow2.f32 %v2872_v60  ;;  %2898 = vadd.xlane.f32.xlu1 %v2897_v2  ;;  %v2891_v14 = vsel %vm864_vm2, %v4859_v4, 0.0  ;;  %v2403_v54 = vsel %vm164_vm1, %v3794_v12, %v2402_v0  ;;  %v2467_v29 = vperm.slane %v2459_v22, %v4043_v26 }
 0x795   :  { %2886 = vadd.xlane.f32.xlu0 %v2885_v61  ;;  %3869 = vpow2.f32 %v2868_v3  ;;  %v2401_v17 = vsel %vm164_vm1, %v2400_v7, %v4829_v39  ;;  %v2457_v36 = vsel %vm164_vm1, %v2456_v21, %v4831_v41  ;;  %v2411_v1 = vperm.slane %v2403_v54, %v4043_v26 }
 0x796   :  { %v2407_v50 = vperm.slane %v2401_v17, %v4043_v26  ;;  %v2463_v39 = vperm.slane %v2457_v36, %v4043_v26  ;;  %v2494_v19 = vrot.slane %v2467_v29, 4 }
 0x797   :  { %v2438_v41 = vrot.slane %v2411_v1, 4 }
 0x798   :  { %v2426_v51 = vrot.slane %v2407_v50, 4  ;;  %v2482_v28 = vrot.slane %v2463_v39, 4 }
 0x79a   :  { %v4861_v11 = vpop.eup %3867 }
 0x79b   :  { %v2894_v13 = vsel %vm864_vm2, %v4861_v11, 0.0  ;;  %v4867_v31 = vpop.eup %3869  ;;  %v3788_v20 = vpop.permute.xlu0 %3787 }
 0x79c   :  { %2895 = vadd.xlane.f32.xlu2 %v2894_v13  ;;  %v2888_v23 = vsel %vm864_vm2, %v4867_v31, 0.0  ;;  %v3790_v24 = vunpack.i.h.bf16 %v3788_v20  ;;  %v3789_v34 = vunpack.i.l.bf16 %v3788_v20 }
 0x79d   :  { %2892 = vadd.xlane.f32.xlu0 %v2891_v14 }
 0x79e   :  { %v2470_v42 = vrot.slane %v3790_v24, 4  ;;  %v2414_v30 = vrot.slane %v3789_v34, 4 }
 0x7a4   :  { %2889 = vadd.xlane.f32.xlu2 %v2888_v23 }
 0x7a7   :  { %v3798_v15 = vpop.permute.xlu1 %3797 }
 0x7a8   :  { %v3800_v10 = vunpack.i.h.bf16 %v3798_v15  ;;  %v3799_v62 = vunpack.i.l.bf16 %v3798_v15 }
 0x7aa   :  { %v2468_v18 = vrot.slane %v3800_v10, 4  ;;  %v2412_v9 = vrot.slane %v3799_v62, 4  ;;  %v2415_v45 = vsel %vm164_vm1, %v3799_v62, %v2414_v30  ;;  %v2471_v46 = vsel %vm164_vm1, %v3800_v10, %v2470_v42 }
 0x7ab   :  { %v2423_v37 = vperm.slane %v2415_v45, %v4043_v26  ;;  %v2479_v38 = vperm.slane %v2471_v46, %v4043_v26 }
 0x7ac   :  { %v2413_v52 = vsel %vm164_vm1, %v2412_v9, %v3789_v34  ;;  %v2469_v49 = vsel %vm164_vm1, %v2468_v18, %v3790_v24 }
 0x7ad   :  { %v2419_v35 = vperm.slane %v2413_v52, %v4043_v26  ;;  %v2436_v56 = vrot.slane %v2423_v37, 4  ;;  %v2439_v59 = vsel %vm164_vm1, %v2423_v37, %v2438_v41  ;;  %v2475_v27 = vperm.slane %v2469_v49, %v4043_v26 }
 0x7ae   :  { %v2447_v32 = vperm.slane %v2439_v59, %v4051_v40  ;;  %v2492_v53 = vrot.slane %v2479_v38, 4  ;;  %v2495_v55 = vsel %vm164_vm1, %v2479_v38, %v2494_v19 }
 0x7af   :  { %v2424_v63 = vrot.slane %v2419_v35, 4  ;;  %v2427_v57 = vsel %vm164_vm1, %v2419_v35, %v2426_v51  ;;  %v2437_v60 = vsel %vm164_vm1, %v2436_v56, %v2411_v1  ;;  %v2480_v61 = vrot.slane %v2475_v27, 4 }
 0x7b0   :  { %v2435_v2 = vperm.slane %v2427_v57, %v4051_v40  ;;  %v2443_v3 = vperm.slane %v2437_v60, %v4051_v40  ;;  %v2454_v6 = vrot.slane %v2447_v32, 4  ;;  %v2483_v13 = vsel %vm164_vm1, %v2475_v27, %v2482_v28 }
 0x7b1   :  { %v2425_v12 = vsel %vm164_vm1, %v2424_v63, %v2407_v50  ;;  %v2481_v14 = vsel %vm164_vm1, %v2480_v61, %v2463_v39  ;;  %v2491_v8 = vperm.slane %v2483_v13, %v4051_v40  ;;  %v2493_v7 = vsel %vm164_vm1, %v2492_v53, %v2467_v29 }
 0x7b2   :  { %v2431_v16 = vperm.slane %v2425_v12, %v4051_v40  ;;  %v2450_v20 = vrot.slane %v2435_v2, 4  ;;  %v2452_v0 = vrot.slane %v2443_v3, 4  ;;  %v2455_v21 = vsel %vm164_vm1, 0.0, %v2454_v6 }
 0x7b3   :  { %v2487_v22 = vperm.slane %v2481_v14, %v4051_v40  ;;  %v2499_v23 = vperm.slane %v2493_v7, %v4051_v40  ;;  %v2503_v17 = vperm.slane %v2495_v55, %v4051_v40  ;;  %v2506_v54 = vrot.slane %v2491_v8, 4 }
 0x7b4   :  { %v2451_v24 = vsel %vm164_vm1, 0.0, %v2450_v20  ;;  %v2523_v34 = vsel %vm164_vm1, %v2454_v6, %v2443_v3  ;;  %v2528_v36 = vrot.slane %v2455_v21, 4  ;;  %v2448_v50 = vrot.slane %v2431_v16, 4 }
 0x7b5   :  { %v2507_v29 = vsel %vm164_vm1, 0.0, %v2506_v54  ;;  %v2508_v1 = vrot.slane %v2499_v23, 4  ;;  %v2510_v15 = vrot.slane %v2503_v17, 4  ;;  %v2517_v42 = vrot.slane %v2451_v24, 4 }
 0x7b6   :  { %v2571_v30 = vrot.slane %v2507_v29, 4  ;;  %v2449_v10 = vsel %vm164_vm1, 0.0, %v2448_v50  ;;  %v2453_v62 = vsel %vm164_vm1, 0.0, %v2452_v0  ;;  %v2512_v39 = vsel %vm164_vm1, %v2450_v20, %v2431_v16 }
 0x7b7   :  { %v2511_v18 = vsel %vm164_vm1, 0.0, %v2510_v15  ;;  %v2577_v9 = vsel %vm164_vm1, %v2510_v15, %v2499_v23  ;;  %v2516_v45 = vperm.slane %v2512_v39, %v4043_v26  ;;  %v2518_v46 = vsel %vm164_vm1, %v2517_v42, %v2449_v10 }
 0x7b8   :  { %v2582_v41 = vrot.slane %v2511_v18, 4  ;;  %v2522_v37 = vperm.slane %v2518_v46, %v4043_v26  ;;  %v2527_v38 = vperm.slane %v2523_v34, %v4043_v26  ;;  %v2529_v19 = vsel %vm164_vm1, %v2528_v36, %v2453_v62 }
 0x7b9   :  { %v2533_v51 = vperm.slane %v2529_v19, %v4043_v26  ;;  %v2536_v52 = vrot.slane %v2516_v45, 4  ;;  %v2504_v49 = vrot.slane %v2487_v22, 4  ;;  %v2509_v35 = vsel %vm164_vm1, 0.0, %v2508_v1 }
 0x7ba   :  { %v2548_v56 = vrot.slane %v2527_v38, 4  ;;  %v2566_v59 = vsel %vm164_vm1, %v2506_v54, %v2487_v22  ;;  %v2581_v27 = vperm.slane %v2577_v9, %v4043_v26  ;;  %v2583_v28 = vsel %vm164_vm1, %v2582_v41, %v2509_v35 }
 0x7bb   :  { %v2537_v32 = vsel %vm164_vm1, %v2522_v37, %v2536_v52  ;;  %v2505_v53 = vsel %vm164_vm1, 0.0, %v2504_v49  ;;  %v2570_v55 = vperm.slane %v2566_v59, %v4043_v26  ;;  %v2587_v63 = vperm.slane %v2583_v28, %v4043_v26 }
 0x7bc   :  { %v2545_v57 = vperm.slane %v2537_v32, %v4051_v40  ;;  %v2549_v60 = vsel %vm164_vm1, %v2533_v51, %v2548_v56  ;;  %v2572_v61 = vsel %vm164_vm1, %v2571_v30, %v2505_v53  ;;  %v2602_v2 = vrot.slane %v2581_v27, 4 }
 0x7bd   :  { %v2557_v3 = vperm.slane %v2549_v60, %v4051_v40  ;;  %v2576_v6 = vperm.slane %v2572_v61, %v4043_v26  ;;  %v2590_v13 = vrot.slane %v2570_v55, 4  ;;  %v2534_v12 = vrot.slane %v2522_v37, 4 }
 0x7be   :  { %v2603_v14 = vsel %vm164_vm1, %v2587_v63, %v2602_v2  ;;  %v2546_v8 = vrot.slane %v2533_v51, 4  ;;  %v2564_v7 = vrot.slane %v2545_v57, 4  ;;  %v2600_v16 = vrot.slane %v2587_v63, 4 }
 0x7bf   :  { %v2562_v20 = vrot.slane %v2557_v3, 4  ;;  %v2591_v0 = vsel %vm164_vm1, %v2576_v6, %v2590_v13  ;;  %v2611_v21 = vperm.slane %v2603_v14, %v4051_v40  ;;  %v2535_v22 = vsel %vm164_vm1, %v2534_v12, %v2516_v45 }
 0x7c0   :  { %v2599_v23 = vperm.slane %v2591_v0, %v4051_v40  ;;  %v2541_v17 = vperm.slane %v2535_v22, %v4051_v40  ;;  %v2547_v54 = vsel %vm164_vm1, %v2546_v8, %v2527_v38  ;;  %v2565_v24 = vsel %vm164_vm1, %v2557_v3, %v2564_v7 }
 0x7c1   :  { %v2563_v34 = vsel %vm164_vm1, %v2562_v20, %v2545_v57  ;;  %v2616_v36 = vrot.slane %v2611_v21, 4  ;;  %v2553_v50 = vperm.slane %v2547_v54, %v4051_v40  ;;  %3107 = vmatpush.msrb.mxu0 %v2565_v24  ;;  %v2588_v29 = vrot.slane %v2576_v6, 4 }
 0x7c2   :  { %3084 = vmatpush.msra.mxu3 %v2563_v34  ;;  %v2601_v1 = vsel %vm164_vm1, %v2600_v16, %v2581_v27  ;;  %v2618_v15 = vrot.slane %v2599_v23, 4  ;;  %v2560_v42 = vrot.slane %v2541_v17, 4 }
 0x7c3   :  { %v2617_v30 = vsel %vm164_vm1, %v2616_v36, %v2599_v23  ;;  %v2558_v10 = vrot.slane %v2553_v50, 4  ;;  %v2589_v62 = vsel %vm164_vm1, %v2588_v29, %v2570_v55  ;;  %v2607_v39 = vperm.slane %v2601_v1, %v4051_v40 }
 0x7c4   :  { %3176 = vmatpush.msrb.mxu3 %v2617_v30  ;;  %v2595_v18 = vperm.slane %v2589_v62, %v4051_v40  ;;  %v2619_v9 = vsel %vm164_vm1, %v2611_v21, %v2618_v15  ;;  %v2561_v45 = vsel %vm164_vm1, %v2553_v50, %v2560_v42 }
 0x7c5   :  { %v2559_v46 = vsel %vm164_vm1, %v2558_v10, %v2541_v17  ;;  %v2612_v41 = vrot.slane %v2607_v39, 4  ;;  %3199 = vmatpush.msra.mxu0 %v2619_v9  ;;  %3061 = vmatpush.msrb.mxu2 %v2561_v45 }
 0x7c6   :  { %3038 = vmatpush.msrb.mxu1 %v2559_v46  ;;  %v2614_v37 = vrot.slane %v2595_v18, 4 }
 0x7c7   :  { %v2613_v38 = vsel %vm164_vm1, %v2612_v41, %v2595_v18 }
 0x7c8   :  { %3130 = vmatpush.msra.mxu1 %v2613_v38  ;;  %v2615_v19 = vsel %vm164_vm1, %v2607_v39, %v2614_v37 }
 0x7c9   :  { %3153 = vmatpush.msra.mxu2 %v2615_v19 }
 0x7f8   :  { %v2878_v51 = vpop.xlane.xlu1 %2877 }
 0x7f9   :  { %3871 = vrcp.f32 %v2878_v51  ;;  %v2911_v27 = vand.u32 2147483648, %v2878_v51  ;;  %v2909_v32 = vand.u32 2147483647, %v2878_v51  ;;  %vm2905_vm6 = vweird.f32 %v2878_v51 }
 0x7fb   :  { %v2912_v60 = vor.u32 1.1754944e-38, %v2911_v27  ;;  %vm2910_vm8 = vcmp.eq.f32.partialorder %v2909_v32, 8.507059e+37 }
 0x7ff   :  { %v2881_v52 = vpop.xlane.xlu2 %2880  ;;  %v3872_v49 = vpop.eup %3871 }
 0x800   :  { %3873 = vrcp.f32 %v2881_v52  ;;  %v2884_v35 = vpop.xlane.xlu0 %2883  ;;  %v2901_v56 = vmul.f32 %v3872_v49, %v2878_v51  ;;  %vm2906_vm5 = vweird.f32 %v3872_v49  ;;  %vm2919_vm11 = vweird.f32 %v2881_v52 }
 0x801   :  { %3875 = vrcp.f32 %v2884_v35  ;;  %vm2907_vm7 = vmor %vm2905_vm6, %vm2906_vm5  ;;  %v2925_v7 = vand.u32 2147483648, %v2881_v52  ;;  %v2939_v20 = vand.u32 2147483648, %v2884_v35  ;;  %v2923_v21 = vand.u32 2147483647, %v2881_v52 }
 0x802   :  { %v2902_v59 = vsub.f32 1.0, %v2901_v56  ;;  %v2937_v22 = vand.u32 2147483647, %v2884_v35  ;;  %vm2933_vm15 = vweird.f32 %v2884_v35 }
 0x803   :  { %v2926_v50 = vor.u32 1.1754944e-38, %v2925_v7  ;;  %v2940_v1 = vor.u32 1.1754944e-38, %v2939_v20  ;;  %vm2924_vm4 = vcmp.eq.f32.partialorder %v2923_v21, 8.507059e+37 }
 0x804   :  { %v2903_v28 = vmul.f32 %v3872_v49, %v2902_v59  ;;  %vm2938_vm5 = vcmp.eq.f32.partialorder %v2937_v22, 8.507059e+37 }
 0x806   :  { %v3874_v53 = vpop.eup %3873  ;;  %v2904_v63 = vadd.f32 %v3872_v49, %v2903_v28 }
 0x807   :  { %v3876_v55 = vpop.eup %3875  ;;  %v2915_v57 = vmul.f32 %v3874_v53, %v2881_v52  ;;  %v4955_v2 = vpop.xlane.xlu1 %2898  ;;  %vm2920_vm12 = vweird.f32 %v3874_v53 }
 0x808   :  { %v2929_v61 = vmul.f32 %v3876_v55, %v2884_v35  ;;  %v2887_v3 = vpop.xlane.xlu0 %2886  ;;  %v2908_v6 = vsel %vm2907_vm7, %v3872_v49, %v2904_v63  ;;  %3877 = vrcp.f32 %v4955_v2  ;;  %vm2934_vm13 = vweird.f32 %v3876_v55  ;;  %vm4959_vm14 = vmor %vm2919_vm11, %vm2920_vm12 }
 0x809   :  { %v2916_v13 = vsub.f32 1.0, %v2915_v57  ;;  %v2913_v12 = vsel %vm2910_vm8, %v2912_v60, %v2908_v6  ;;  %3879 = vrcp.f32 %v2887_v3  ;;  %vm2935_vm3 = vmor %vm2933_vm15, %vm2934_vm13  ;;  %v2951_v9 = vand.u32 2147483647, %v2887_v3 }
 0x80a   :  { %v2930_v14 = vsub.f32 1.0, %v2929_v61  ;;  %v3012_v23 = vmul.f32 %v4838_v5, %v2913_v12  ;;  %v2953_v45 = vand.u32 2147483648, %v2887_v3  ;;  %vm3003_vm7 = vweird.f32 %v4955_v2 }
 0x80b   :  { %v2917_v8 = vmul.f32 %v3874_v53, %v2916_v13  ;;  %v3007_v52 = vand.u32 2147483647, %v4955_v2  ;;  %vm2947_vm8 = vweird.f32 %v2887_v3  ;;  %vm2952_vm13 = vcmp.eq.f32.partialorder %v2951_v9, 8.507059e+37 }
 0x80c   :  { %v2931_v16 = vmul.f32 %v3876_v55, %v2930_v14  ;;  %3745 = vmatmul.msk.f32.vlgmr.msrb.gmra.mxu1 %vm864_vm2, %v3012_v23  ;;  %v2954_v35 = vor.u32 1.1754944e-38, %v2953_v45  ;;  %v3009_v32 = vand.u32 2147483648, %v4955_v2 }
 0x80d   :  { %v2918_v0 = vadd.f32 %v3874_v53, %v2917_v8 }
 0x80e   :  { %v2932_v54 = vadd.f32 %v3876_v55, %v2931_v16  ;;  %v4963_v24 = vpop.eup %3877  ;;  %v3010_v8 = vor.u32 1.1754944e-38, %v3009_v32 }
 0x80f   :  { %v2922_v34 = vsel %vm4959_vm14, %v3874_v53, %v2918_v0  ;;  %v4968_v36 = vpop.xlane.xlu2 %2895  ;;  %v2999_v5 = vmul.f32 %v4963_v24, %v4955_v2  ;;  %v3880_v42 = vpop.eup %3879  ;;  %vm3004_vm11 = vweird.f32 %v4963_v24 }
 0x810   :  { %v2936_v29 = vsel %vm2935_vm3, %v3876_v55, %v2932_v54  ;;  %v4972_v15 = vpop.xlane.xlu0 %2892  ;;  %3881 = vrcp.f32 %v4968_v36  ;;  %v2927_v30 = vsel %vm2924_vm4, %v2926_v50, %v2922_v34  ;;  %v2943_v39 = vmul.f32 %v3880_v42, %v2887_v3  ;;  %vm4998_vm15 = vmor %vm3003_vm7, %vm3004_vm11 }
 0x811   :  { %v2941_v10 = vsel %vm2938_vm5, %v2940_v1, %v2936_v29  ;;  %v3000_v62 = vsub.f32 1.0, %v2999_v5  ;;  %3883 = vrcp.f32 %v4972_v15  ;;  %v3013_v46 = vmul.f32 %v4842_v48, %v2927_v30 }
 0x812   :  { %v2944_v18 = vsub.f32 1.0, %v2943_v39  ;;  %v3014_v41 = vmul.f32 %v4844_v25, %v2941_v10  ;;  %vm2948_vm6 = vweird.f32 %v3880_v42  ;;  %v2993_v55 = vand.u32 2147483647, %v4968_v36 }
 0x813   :  { %v3001_v37 = vmul.f32 %v4963_v24, %v3000_v62  ;;  %3746 = vmatmul.msk.f32.vlgmr.msrb.gmra.mxu2 %vm864_vm2, %v3013_v46  ;;  %vm2949_vm12 = vmor %vm2947_vm8, %vm2948_vm6  ;;  %v2995_v63 = vand.u32 2147483648, %v4968_v36  ;;  %vm2989_vm3 = vweird.f32 %v4968_v36  ;;  %v2979_v6 = vand.u32 2147483647, %v4972_v15 }
 0x814   :  { %v2945_v38 = vmul.f32 %v3880_v42, %v2944_v18  ;;  %3747 = vmatmul.msk.f32.vlgmr.msra.gmra.mxu3 %vm864_vm2, %v3014_v41  ;;  %v2981_v13 = vand.u32 2147483648, %v4972_v15  ;;  %vm3008_vm5 = vcmp.eq.f32.partialorder %v3007_v52, 8.507059e+37  ;;  %vm2994_vm7 = vcmp.eq.f32.partialorder %v2993_v55, 8.507059e+37 }
 0x815   :  { %v3002_v56 = vadd.f32 %v4963_v24, %v3001_v37  ;;  %v2996_v7 = vor.u32 1.1754944e-38, %v2995_v63  ;;  %vm2975_vm8 = vweird.f32 %v4972_v15 }
 0x816   :  { %v3882_v19 = vpop.eup %3881  ;;  %v2946_v49 = vadd.f32 %v3880_v42, %v2945_v38  ;;  %v2982_v23 = vor.u32 1.1754944e-38, %v2981_v13 }
 0x817   :  { %v4982_v51 = vpop.xlane.xlu2 %2889  ;;  %v2985_v48 = vmul.f32 %v3882_v19, %v4968_v36  ;;  %v3884_v25 = vpop.eup %3883  ;;  %vm2990_vm14 = vweird.f32 %v3882_v19  ;;  %v3006_v12 = vsel %vm4998_vm15, %v4963_v24, %v3002_v56 }
 0x818   :  { %3885 = vrcp.f32 %v4982_v51  ;;  %v2950_v59 = vsel %vm2949_vm12, %v3880_v42, %v2946_v49  ;;  %v2971_v28 = vmul.f32 %v3884_v25, %v4972_v15  ;;  %vm2976_vm4 = vweird.f32 %v3884_v25  ;;  %vm2991_vm6 = vmor %vm2989_vm3, %vm2990_vm14 }
 0x819   :  { %v2986_v27 = vsub.f32 1.0, %v2985_v48  ;;  %v2955_v53 = vsel %vm2952_vm13, %v2954_v35, %v2950_v59  ;;  %v3011_v21 = vsel %vm3008_vm5, %v3010_v8, %v3006_v12  ;;  %vm2977_vm11 = vmor %vm2975_vm8, %vm2976_vm4  ;;  %vm2980_vm12 = vcmp.eq.f32.partialorder %v2979_v6, 8.507059e+37 }
 0x81a   :  { %v2972_v60 = vsub.f32 1.0, %v2971_v28  ;;  %v3015_v61 = vmul.f32 %v4850_v44, %v2955_v53  ;;  %v2965_v36 = vand.u32 2147483647, %v4982_v51  ;;  %v2967_v50 = vand.u32 2147483648, %v4982_v51 }
 0x81b   :  { %v2987_v57 = vmul.f32 %v3882_v19, %v2986_v27  ;;  %v3019_v5 = vmul.f32 %v4852_v58, %v3011_v21  ;;  %vm2961_vm14 = vweird.f32 %v4982_v51 }
 0x81c   :  { %v2973_v44 = vmul.f32 %v3884_v25, %v2972_v60  ;;  %3748 = vmatmul.msk.f32.vlgmr.msrb.gmra.mxu0 %vm864_vm2, %v3015_v61  ;;  %vm2966_vm3 = vcmp.eq.f32.partialorder %v2965_v36, 8.507059e+37 }
 0x81d   :  { %v2988_v14 = vadd.f32 %v3882_v19, %v2987_v57 }
 0x81e   :  { %v3886_v2 = vpop.eup %3885  ;;  %v2974_v20 = vadd.f32 %v3884_v25, %v2973_v44 }
 0x81f   :  { %v2992_v16 = vsel %vm2991_vm6, %v3882_v19, %v2988_v14  ;;  %v2957_v0 = vmul.f32 %v3886_v2, %v4982_v51  ;;  %vm2962_vm13 = vweird.f32 %v3886_v2  ;;  %vm3586_vm6 = vcmask 523264  }
 0x820   :  { %v2997_v22 = vsel %vm2994_vm7, %v2996_v7, %v2992_v16  ;;  %v2978_v17 = vsel %vm2977_vm11, %v3884_v25, %v2974_v20  ;;  %vm2963_vm15 = vmor %vm2961_vm14, %vm2962_vm13 }
 0x821   :  { %v2958_v54 = vsub.f32 1.0, %v2957_v0  ;;  %v3018_v24 = vmul.f32 %v4861_v11, %v2997_v22  ;;  %v2983_v34 = vsel %vm2980_vm12, %v2982_v23, %v2978_v17  ;;  %v2968_v11 = vor.u32 1.1754944e-38, %v2967_v50 }
 0x822   :  { %v3017_v1 = vmul.f32 %v4859_v4, %v2983_v34 }
 0x823   :  { %v2959_v29 = vmul.f32 %v3886_v2, %v2958_v54  ;;  %3751 = vmatmul.msk.f32.vlgmr.msrb.gmra.mxu3 %vm864_vm2, %v3018_v24 }
 0x824   :  { %3750 = vmatmul.msk.f32.vlgmr.msra.gmra.mxu2 %vm864_vm2, %v3017_v1  ;;  %3752 = vmatmul.msk.f32.vlgmr.msra.gmra.mxu0 %vm864_vm2, %v3019_v5 }
 0x825   :  { %v2960_v15 = vadd.f32 %v3886_v2, %v2959_v29 }
 0x827   :  { %v2964_v42 = vsel %vm2963_vm15, %v3886_v2, %v2960_v15 }
 0x828   :  { %v2969_v30 = vsel %vm2966_vm3, %v2968_v11, %v2964_v42 }
 0x829   :  { %v3016_v10 = vmul.f32 %v4867_v31, %v2969_v30 }
 0x82b   :  { %3749 = vmatmul.msk.f32.vlgmr.msra.gmra.mxu1 %vm864_vm2, %v3016_v10 }
 0x889   :  { %v3040_v4 = vpop.f32.mrf.mxu1 }
 0x88a   :  { %v3206_v62 = vrot.slane %v3040_v4, 4 }
 0x896   :  { %v3063_v39 = vpop.f32.mrf.mxu2 }
 0x897   :  { %v3086_v58 = vpop.f32.mrf.mxu3  ;;  %v3218_v18 = vrot.slane %v3063_v39, 4 }
 0x898   :  { %v3204_v9 = vrot.slane %v3086_v58, 4  ;;  %v3207_v45 = vsel %vm164_vm1, %v3086_v58, %v3206_v62 }
 0x899   :  { %v3109_v46 = vpop.f32.mrf.mxu0  ;;  %v3215_v41 = vperm.slane %v3207_v45, %v4043_v26 }
 0x89a   :  { %v3216_v37 = vrot.slane %v3109_v46, 4  ;;  %v3205_v38 = vsel %vm164_vm1, %v3204_v9, %v3040_v4  ;;  %v3219_v19 = vsel %vm164_vm1, %v3109_v46, %v3218_v18 }
 0x89b   :  { %v3211_v31 = vperm.slane %v3205_v38, %v4043_v26  ;;  %v3242_v51 = vrot.slane %v3215_v41, 4  ;;  %v3227_v49 = vperm.slane %v3219_v19, %v4043_v26 }
 0x89c   :  { %v3217_v52 = vsel %vm164_vm1, %v3216_v37, %v3063_v39 }
 0x89d   :  { %v3223_v48 = vperm.slane %v3217_v52, %v4043_v26  ;;  %v3230_v25 = vrot.slane %v3211_v31, 4  ;;  %v3240_v35 = vrot.slane %v3227_v49, 4  ;;  %v3243_v56 = vsel %vm164_vm1, %v3227_v49, %v3242_v51 }
 0x89e   :  { %v3251_v27 = vperm.slane %v3243_v56, %v4051_v40 }
 0x89f   :  { %v3228_v59 = vrot.slane %v3223_v48, 4  ;;  %v3231_v28 = vsel %vm164_vm1, %v3223_v48, %v3230_v25  ;;  %v3241_v32 = vsel %vm164_vm1, %v3240_v35, %v3215_v41 }
 0x8a0   :  { %v3239_v55 = vperm.slane %v3231_v28, %v4051_v40  ;;  %v3247_v63 = vperm.slane %v3241_v32, %v4051_v40  ;;  %v3258_v57 = vrot.slane %v3251_v27, 4 }
 0x8a1   :  { %v3229_v53 = vsel %vm164_vm1, %v3228_v59, %v3211_v31  ;;  %v3201_v61 = vpop.f32.mrf.mxu0 }
 0x8a2   :  { %v3235_v60 = vperm.slane %v3229_v53, %v4051_v40  ;;  %v3254_v3 = vrot.slane %v3239_v55, 4  ;;  %v3256_v6 = vrot.slane %v3247_v63, 4  ;;  %v3259_v13 = vsel %vm164_vm1, 0.0, %v3258_v57 }
 0x8a3   :  { %v3327_v12 = vsel %vm164_vm1, %v3258_v57, %v3247_v63  ;;  %v3332_v2 = vrot.slane %v3259_v13, 4  ;;  %v3272_v16 = vrot.slane %v3201_v61, 4 }
 0x8a4   :  { %v3252_v14 = vrot.slane %v3235_v60, 4  ;;  %v3331_v44 = vperm.slane %v3327_v12, %v4043_v26  ;;  %v3255_v8 = vsel %vm164_vm1, 0.0, %v3254_v3  ;;  %v3257_v7 = vsel %vm164_vm1, 0.0, %v3256_v6 }
 0x8a5   :  { %v3316_v0 = vsel %vm164_vm1, %v3254_v3, %v3235_v60  ;;  %v3321_v21 = vrot.slane %v3255_v8, 4  ;;  %v3333_v34 = vsel %vm164_vm1, %v3332_v2, %v3257_v7 }
 0x8a6   :  { %v3178_v20 = vpop.f32.mrf.mxu3  ;;  %v3253_v23 = vsel %vm164_vm1, 0.0, %v3252_v14  ;;  %v3320_v17 = vperm.slane %v3316_v0, %v4043_v26  ;;  %v3352_v36 = vrot.slane %v3331_v44, 4  ;;  %v3337_v30 = vperm.slane %v3333_v34, %v4043_v26 }
 0x8a7   :  { %v3260_v22 = vrot.slane %v3178_v20, 4  ;;  %v3155_v54 = vpop.f32.mrf.mxu2  ;;  %v3322_v42 = vsel %vm164_vm1, %v3321_v21, %v3253_v23 }
 0x8a8   :  { %v3132_v24 = vpop.f32.mrf.mxu1  ;;  %v3273_v50 = vsel %vm164_vm1, %v3272_v16, %v3155_v54  ;;  %v3274_v29 = vrot.slane %v3155_v54, 4  ;;  %v3326_v62 = vperm.slane %v3322_v42, %v4043_v26  ;;  %v3340_v39 = vrot.slane %v3320_v17, 4 }
 0x8a9   :  { %v3261_v1 = vsel %vm164_vm1, %v3260_v22, %v3132_v24  ;;  %v3262_v5 = vrot.slane %v3132_v24, 4  ;;  %v3279_v15 = vperm.slane %v3273_v50, %v4043_v26  ;;  %v3353_v41 = vsel %vm164_vm1, %v3337_v30, %v3352_v36 }
 0x8aa   :  { %v3267_v11 = vperm.slane %v3261_v1, %v4043_v26  ;;  %v3275_v10 = vsel %vm164_vm1, %v3201_v61, %v3274_v29  ;;  %v3341_v46 = vsel %vm164_vm1, %v3326_v62, %v3340_v39  ;;  %v3338_v37 = vrot.slane %v3326_v62, 4 }
 0x8ab   :  { %v3263_v4 = vsel %vm164_vm1, %v3178_v20, %v3262_v5  ;;  %v3283_v58 = vperm.slane %v3275_v10, %v4043_v26  ;;  %v3284_v18 = vrot.slane %v3279_v15, 4  ;;  %v3350_v38 = vrot.slane %v3337_v30, 4 }
 0x8ac   :  { %v3271_v9 = vperm.slane %v3263_v4, %v4043_v26  ;;  %v3286_v45 = vrot.slane %v3267_v11, 4  ;;  %v3349_v25 = vperm.slane %v3341_v46, %v4051_v40  ;;  %v3361_v35 = vperm.slane %v3353_v41, %v4051_v40 }
 0x8ad   :  { %v3296_v19 = vrot.slane %v3283_v58, 4  ;;  %v3285_v31 = vsel %vm164_vm1, %v3284_v18, %v3267_v11  ;;  %v3339_v27 = vsel %vm164_vm1, %v3338_v37, %v3320_v17  ;;  %v3351_v28 = vsel %vm164_vm1, %v3350_v38, %v3331_v44 }
 0x8ae   :  { %v3287_v51 = vsel %vm164_vm1, %v3279_v15, %v3286_v45  ;;  %v3298_v52 = vrot.slane %v3271_v9, 4  ;;  %v3291_v49 = vperm.slane %v3285_v31, %v4051_v40  ;;  %v3366_v57 = vrot.slane %v3361_v35, 4 }
 0x8af   :  { %v3295_v48 = vperm.slane %v3287_v51, %v4051_v40  ;;  %v3297_v56 = vsel %vm164_vm1, %v3296_v19, %v3271_v9  ;;  %v3368_v60 = vrot.slane %v3349_v25, 4  ;;  %v3345_v61 = vperm.slane %v3339_v27, %v4051_v40  ;;  %v1898_v51 = vld [vmem:[#allocation2 + $0xf8] sm:$0xff] }
 0x8b0   :  { %v3299_v59 = vsel %vm164_vm1, %v3283_v58, %v3298_v52  ;;  %v3303_v32 = vperm.slane %v3297_v56, %v4051_v40  ;;  %v3308_v55 = vrot.slane %v3291_v49, 4  ;;  %v3357_v3 = vperm.slane %v3351_v28, %v4051_v40  ;;  %3473 = vmatpush.msrb.mxu1 %v1898_v51  ;;  %v1896_v52 = vld [vmem:[#allocation2 + $0xe8] sm:$0xff] }
 0x8b1   :  { %v3307_v53 = vperm.slane %v3299_v59, %v4051_v40  ;;  %v3310_v63 = vrot.slane %v3295_v48, 4  ;;  %v3367_v8 = vsel %vm164_vm1, %v3366_v57, %v3349_v25  ;;  %v3369_v7 = vsel %vm164_vm1, %v3361_v35, %v3368_v60  ;;  %v3810_v60 = vld [vmem:[%s5194_s4 + $0x7] ss:$0 sm:$0xff] }
 0x8b2   :  { %v3309_v6 = vsel %vm164_vm1, 0.0, %v3308_v55  ;;  %v3312_v12 = vrot.slane %v3303_v32, 4  ;;  %3434 = vrot.lane.b32.xlu2 %v3367_v8, %s3957_s12  ;;  %3442 = vrot.lane.b32.xlu1 %v3369_v7, %s3958_s13  ;;  %v3362_v0 = vrot.slane %v3357_v3, 4  ;;  %v3364_v21 = vrot.slane %v3345_v61, 4 }
 0x8b3   :  { %v3311_v13 = vsel %vm164_vm1, 0.0, %v3310_v63  ;;  %v3314_v14 = vrot.slane %v3307_v53, 4  ;;  %v3370_v44 = vsel %vm164_vm1, %v3310_v63, %v3291_v49  ;;  %v1895_v49 = vld [vmem:[#allocation2 + $0xe0] sm:$0xff] }
 0x8b4   :  { %v3375_v2 = vrot.slane %v3311_v13, 4  ;;  %v3313_v16 = vsel %vm164_vm1, 0.0, %v3312_v12  ;;  %v3374_v23 = vperm.slane %v3370_v44, %v4043_v26  ;;  %v3365_v24 = vsel %vm164_vm1, %v3357_v3, %v3364_v21 }
 0x8b5   :  { %v3315_v20 = vsel %vm164_vm1, 0.0, %v3314_v14  ;;  %v3381_v54 = vsel %vm164_vm1, %v3314_v14, %v3303_v32  ;;  %v3363_v50 = vsel %vm164_vm1, %v3362_v0, %v3345_v61  ;;  %3426 = vrot.lane.b32.xlu0 %v3365_v24, %s3951_s24  ;;  %v3540_v24 = vld [vmem:[#allocation2 + $0x108] sm:$0xff] }
 0x8b6   :  { %v3386_v22 = vrot.slane %v3315_v20, 4  ;;  %v3376_v17 = vsel %vm164_vm1, %v3375_v2, %v3309_v6  ;;  %v3385_v36 = vperm.slane %v3381_v54, %v4043_v26  ;;  %v3394_v1 = vrot.slane %v3374_v23, 4  ;;  %v3541_v54 = vld [vmem:[#allocation2 + $0x110] sm:$0xff] }
 0x8b7   :  { %v3380_v34 = vperm.slane %v3376_v17, %v4043_v26 }
 0x8b8   :  { %v3387_v29 = vsel %vm164_vm1, %v3386_v22, %v3313_v16  ;;  %v3406_v15 = vrot.slane %v3385_v36, 4 }
 0x8b9   :  { %v3391_v5 = vperm.slane %v3387_v29, %v4043_v26  ;;  %v3392_v11 = vrot.slane %v3380_v34, 4  ;;  %v3395_v42 = vsel %vm164_vm1, %v3380_v34, %v3394_v1  ;;  %v3539_v34 = vld [vmem:[#allocation2 + $0x100] sm:$0xff] }
 0x8ba   :  { %v3403_v18 = vperm.slane %v3395_v42, %v4051_v40 }
 0x8bb   :  { %v3407_v30 = vsel %vm164_vm1, %v3391_v5, %v3406_v15  ;;  %v3393_v10 = vsel %vm164_vm1, %v3392_v11, %v3374_v23  ;;  %v3404_v4 = vrot.slane %v3391_v5, 4  ;;  %v3583_v15 = vld [vmem:[%s5193_s3 + $0x38] sm:$0xff]  ;;  %v3582_v11 = vld [vmem:[%s5193_s3 + $0x30] sm:$0xff] }
 0x8bc   :  { %v3415_v62 = vperm.slane %v3407_v30, %v4051_v40  ;;  %v3399_v39 = vperm.slane %v3393_v10, %v4051_v40  ;;  %v3422_v19 = vrot.slane %v3403_v18, 4  ;;  %3601 = vmatpush.msra.mxu3 %v3583_v15  ;;  %v3581_v30 = vld [vmem:[%s5193_s3 + $0x28] sm:$0xff] }
 0x8bd   :  { %v3405_v58 = vsel %vm164_vm1, %v3404_v4, %v3385_v36 }
 0x8be   :  { %v3420_v9 = vrot.slane %v3415_v62, 4  ;;  %v3411_v26 = vperm.slane %v3405_v58, %v4051_v40  ;;  %v3418_v45 = vrot.slane %v3399_v39, 4  ;;  %v3423_v31 = vsel %vm164_vm1, %v3415_v62, %v3422_v19  ;;  %v1897_v40 = vld [vmem:[#allocation2 + $0xf0] sm:$0xff]  ;;  %3602 = vmatpush.msra.mxu3 %v3582_v11 }
 0x8bf   :  { %3474 = vmatpush.msrb.mxu1 %v1897_v40 }
 0x8c0   :  { %v3421_v46 = vsel %vm164_vm1, %v3420_v9, %v3403_v18  ;;  %v3416_v41 = vrot.slane %v3411_v26, 4  ;;  %v3419_v37 = vsel %vm164_vm1, %v3411_v26, %v3418_v45  ;;  %3603 = vmatpush.msra.mxu3 %v3581_v30  ;;  %v3579_v9 = vld [vmem:[%s5193_s3 + $0x18] sm:$0xff]  ;;  %v3811_v45 = vld [vmem:[%s5194_s4 + $0xc] ss:$0 sm:$0xff] }
 0x8c1   :  { %3436 = vrot.lane.b32.xlu2 %v3421_v46, %s3957_s12  ;;  %3428 = vrot.lane.b32.xlu0 %v3419_v37, %s3951_s24  ;;  %v3812_v37 = vld [vmem:[%s5194_s4 + $0xd] ss:$0 sm:$0xff]  ;;  %s3676_s12 = sshll.u32 %s3960_s11, 4  ;;  %s3677_s12 = int_to_ptr.vmem [resolvable:$true] %s3676_s12 }
 0x8c2   :  { %v3417_v38 = vsel %vm164_vm1, %v3416_v41, %v3399_v39  ;;  %3475 = vmatpush.msrb.mxu1 %v1896_v52  ;;  %v3580_v39 = vld [vmem:[%s5193_s3 + $0x20] sm:$0xff] }
 0x8c3   :  { %3604 = vmatpush.msra.mxu3 %v3580_v39 }
 0x8c4   :  { %3476 = vmatpush.msrb.mxu1 %v1895_v49 }
 0x8c5   :  { %3605 = vmatpush.msra.mxu3 %v3579_v9 }
 0x8c9   :  { %3444 = vrot.lane.b32.xlu0 %v3423_v31, %s3958_s13 }
 0x90c   :  { %v3435_v25 = vpop.permute.xlu2 %3434 }
 0x91b   :  { %v3437_v53 = vpop.permute.xlu2 %3436 }
 0x924   :  { %v3443_v56 = vpop.permute.xlu1 %3442 }
 0x927   :  { %v3427_v48 = vpop.permute.xlu0 %3426 }
 0x928   :  { %v3448_v35 = vsel %vm864_vm2, %v3363_v50, %v3427_v48 }
 0x929   :  { %v3450_v59 = vsel %vm1695_vm9, %v3448_v35, %v3435_v25 }
 0x92a   :  { %v3452_v27 = vsel %vm1698_vm10, %v3450_v59, %v3443_v56 }
 0x92b   :  { %3753 = vmatmul.msk.f32.vlgmr.msrb.gmra.mxu1 %vm47_vm0, %v3452_v27  ;;  %v3578_v27 = vld [vmem:[%s5193_s3 + $0x10] sm:$0xff] }
 0x92c   :  { %3606 = vmatpush.msra.mxu3 %v3578_v27 }
 0x933   :  { %v3429_v28 = vpop.permute.xlu0 %3428 }
 0x934   :  { %v3449_v32 = vsel %vm864_vm2, %v3417_v38, %v3429_v28  ;;  %v3577_v28 = vld [vmem:[%s5193_s3 + $0x8] sm:$0xff] }
 0x935   :  { %v3451_v63 = vsel %vm1695_vm9, %v3449_v32, %v3437_v53  ;;  %v3576_v32 = vld [vmem:[%s5193_s3] sm:$0xff]  ;;  %3607 = vmatpush.msra.mxu3 %v3577_v28  ;;  %v3813_v53 = vld [vmem:[%s5194_s4 + $0x8] ss:$0 sm:$0xff] }
 0x937   :  { %3608 = vmatpush.msra.mxu3 %v3576_v32 }
 0x93b   :  { %v3445_v55 = vpop.permute.xlu0 %3444 }
 0x93c   :  { %v3453_v57 = vsel %vm1698_vm10, %v3451_v63, %v3445_v55 }
 0x93d   :  { %3754 = vmatmul.msk.f32.gmra.mxu1 %vm47_vm0, %v3453_v57 }
 0x9a8   :  { %v3478_v61 = vpop.f32.mrf.mxu1 }
 0x9a9   :  { %v3479_v3 = vadd.f32 %v3810_v60, %v3478_v61 }
 0x9ab   :  { %v3484_v6 = vadd.f32 %v3479_v3, %v4614_v33 }
 0x9ad   :  { %v3488_v13 = vsel %vm47_vm0, %v3484_v6, 0.0 }
 0x9ae   :  { %3489 = vadd.xlane.f32.xlu1 %v3488_v13 }
 0x9ba   :  { %v3481_v12 = vpop.f32.mrf.mxu1 }
 0x9bb   :  { %v3482_v14 = vadd.f32 %v3810_v60, %v3481_v12 }
 0x9bd   :  { %v3485_v44 = vadd.f32 %v3482_v14, %v4618_v47  ;;  %v3542_v47 = vld [vmem:[#allocation2 + $0x118] sm:$0xff] }
 0x9be   :  { %3563 = vmatpush.msrb.mxu2 %v3542_v47 }
 0x9bf   :  { %v3491_v2 = vsel %vm47_vm0, %v3485_v44, 0.0 }
 0x9c0   :  { %3492 = vadd.xlane.f32.xlu2 %v3491_v2  ;;  %3564 = vmatpush.msrb.mxu2 %v3541_v54 }
 0x9c2   :  { %3565 = vmatpush.msrb.mxu2 %v3540_v24 }
 0x9c4   :  { %3566 = vmatpush.msrb.mxu2 %v3539_v34 }
 0xa21   :  { %v3490_v8 = vpop.xlane.xlu1 %3489 }
 0xa22   :  { %v3494_v7 = vmul.f32 %v3490_v8, %v4581_v43 }
 0xa24   :  { %v3496_v16 = vsub.f32 %v3484_v6, %v3494_v7  ;;  %v3814_v6 = vld [vmem:[%s5194_s4 + $0x9] ss:$0 sm:$0xff] }
 0xa26   :  { %v3498_v20 = vmul.f32 %v3496_v16, %v3496_v16 }
 0xa28   :  { %v3500_v0 = vsel %vm47_vm0, %v3498_v20, 0.0 }
 0xa29   :  { %3501 = vadd.xlane.f32.xlu0 %v3500_v0 }
 0xa33   :  { %v3493_v21 = vpop.xlane.xlu2 %3492 }
 0xa34   :  { %v3495_v33 = vmul.f32 %v3493_v21, %v4581_v43 }
 0xa36   :  { %v3497_v22 = vsub.f32 %v3485_v44, %v3495_v33 }
 0xa38   :  { %v3499_v23 = vmul.f32 %v3497_v22, %v3497_v22 }
 0xa3a   :  { %v3503_v17 = vsel %vm47_vm0, %v3499_v23, 0.0 }
 0xa3b   :  { %3504 = vadd.xlane.f32.xlu1 %v3503_v17 }
 0xa9c   :  { %v3502_v36 = vpop.xlane.xlu0 %3501 }
 0xa9d   :  { %v3506_v50 = vmul.f32 %v3502_v36, %v4581_v43 }
 0xa9f   :  { %v3508_v29 = vadd.f32 1e-05, %v3506_v50 }
 0xaa1   :  { %3887 = vrsqrt.f32 %v3508_v29  ;;  %vm3516_vm2 = vweird.f32 %v3508_v29 }
 0xaa7   :  { %v3888_v1 = vpop.eup %3887 }
 0xaa8   :  { %v3511_v5 = vmul.f32 %v3888_v1, %v3508_v29  ;;  %vm3517_vm1 = vweird.f32 %v3888_v1 }
 0xaa9   :  { %vm3518_vm9 = vmor %vm3516_vm2, %vm3517_vm1 }
 0xaaa   :  { %v3512_v42 = vmul.f32 %v3888_v1, %v3511_v5 }
 0xaac   :  { %v3513_v4 = vmul.f32 0.5, %v3512_v42 }
 0xaae   :  { %v3505_v10 = vpop.xlane.xlu1 %3504  ;;  %v3514_v58 = vsub.f32 1.5, %v3513_v4 }
 0xaaf   :  { %v3507_v62 = vmul.f32 %v3505_v10, %v4581_v43 }
 0xab0   :  { %v3515_v26 = vmul.f32 %v3888_v1, %v3514_v58 }
 0xab1   :  { %v3509_v18 = vadd.f32 1e-05, %v3507_v62  ;;  %v3815_v62 = vld [vmem:[%s5194_s4 + $0xe] ss:$0 sm:$0xff] }
 0xab2   :  { %v3519_v46 = vsel %vm3518_vm9, %v3888_v1, %v3515_v26 }
 0xab3   :  { %3889 = vrsqrt.f32 %v3509_v18  ;;  %v3530_v41 = vmul.f32 %v3519_v46, %v3496_v16  ;;  %vm3526_vm4 = vweird.f32 %v3509_v18 }
 0xab5   :  { %v3533_v38 = vmul.f32 %v3811_v45, %v3530_v41 }
 0xab7   :  { %v3536_v51 = vadd.f32 %v3812_v37, %v3533_v38 }
 0xab9   :  { %v3890_v19 = vpop.eup %3889  ;;  %3755 = vmatmul.msk.f32.vlgmr.msrb.gmra.mxu2 %vm47_vm0, %v3536_v51 }
 0xaba   :  { %v3521_v31 = vmul.f32 %v3890_v19, %v3509_v18  ;;  %vm3527_vm10 = vweird.f32 %v3890_v19  ;;  %v3816_v18 = vld [vmem:[%s5194_s4 + $0xf] ss:$0 sm:$0xff]  ;;  %s3678_s4 = sshll.u32 %s5195_s5, 4  ;;  %s3679_s4 = int_to_ptr.hbm [resolvable:$true] %s3678_s4 }
 0xabb   :  { %vm3528_vm5 = vmor %vm3526_vm4, %vm3527_vm10 }
 0xabc   :  { %v3522_v40 = vmul.f32 %v3890_v19, %v3521_v31 }
 0xabe   :  { %v3523_v52 = vmul.f32 0.5, %v3522_v40 }
 0xac0   :  { %v3524_v49 = vsub.f32 1.5, %v3523_v52 }
 0xac2   :  { %v3525_v48 = vmul.f32 %v3890_v19, %v3524_v49 }
 0xac4   :  { %v3529_v25 = vsel %vm3528_vm5, %v3890_v19, %v3525_v48 }
 0xac5   :  { %v3531_v35 = vmul.f32 %v3529_v25, %v3497_v22 }
 0xac7   :  { %v3534_v56 = vmul.f32 %v3811_v45, %v3531_v35 }
 0xac9   :  { %v3537_v59 = vadd.f32 %v3812_v37, %v3534_v56 }
 0xacb   :  { %3756 = vmatmul.msk.f32.gmra.mxu2 %vm47_vm0, %v3537_v59 }
 0xb3c   :  { %v3568_v55 = vpop.f32.mrf.mxu2 }
 0xb3d   :  { %v3569_v63 = vadd.f32 %v3813_v53, %v3568_v55 }
 0xb3f   :  { %v3574_v57 = vmax.f32 %v3569_v63, 0.0 }
 0xb41   :  { %3757 = vmatmul.msk.f32.vlgmr.msra.gmra.mxu3 %vm3586_vm6, %v3574_v57 }
 0xb4e   :  { %v3571_v60 = vpop.f32.mrf.mxu2 }
 0xb4f   :  { %v3572_v61 = vadd.f32 %v3813_v53, %v3571_v60 }
 0xb51   :  { %v3575_v3 = vmax.f32 %v3572_v61, 0.0 }
 0xb53   :  { %3758 = vmatmul.msk.f32.gmra.mxu3 %vm3586_vm6, %v3575_v3 }
 0xbc4   :  { %v3610_v13 = vpop.f32.mrf.mxu3 }
 0xbc5   :  { %v3611_v12 = vadd.f32 %v3814_v6, %v3610_v13 }
 0xbc7   :  { %v3616_v14 = vadd.f32 %v3611_v12, %v3536_v51 }
 0xbc9   :  { %v3620_v44 = vsel %vm47_vm0, %v3616_v14, 0.0 }
 0xbca   :  { %3621 = vadd.xlane.f32.xlu2 %v3620_v44 }
 0xbd6   :  { %v3613_v2 = vpop.f32.mrf.mxu3 }
 0xbd7   :  { %v3614_v8 = vadd.f32 %v3814_v6, %v3613_v2 }
 0xbd9   :  { %v3617_v7 = vadd.f32 %v3614_v8, %v3537_v59 }
 0xbdb   :  { %v3623_v16 = vsel %vm47_vm0, %v3617_v7, 0.0 }
 0xbdc   :  { %3624 = vadd.xlane.f32.xlu0 %v3623_v16 }
 0xc3d   :  { %v3622_v20 = vpop.xlane.xlu2 %3621 }
 0xc3e   :  { %v3626_v0 = vmul.f32 %v3622_v20, %v4581_v43 }
 0xc40   :  { %v3628_v21 = vsub.f32 %v3616_v14, %v3626_v0 }
 0xc42   :  { %v3630_v33 = vmul.f32 %v3628_v21, %v3628_v21 }
 0xc44   :  { %v3632_v22 = vsel %vm47_vm0, %v3630_v33, 0.0 }
 0xc45   :  { %3633 = vadd.xlane.f32.xlu1 %v3632_v22 }
 0xc4f   :  { %v3625_v23 = vpop.xlane.xlu0 %3624 }
 0xc50   :  { %v3627_v17 = vmul.f32 %v3625_v23, %v4581_v43 }
 0xc52   :  { %v3629_v47 = vsub.f32 %v3617_v7, %v3627_v17 }
 0xc54   :  { %v3631_v54 = vmul.f32 %v3629_v47, %v3629_v47 }
 0xc56   :  { %v3635_v24 = vsel %vm47_vm0, %v3631_v54, 0.0 }
 0xc57   :  { %3636 = vadd.xlane.f32.xlu2 %v3635_v24 }
 0xcb8   :  { %v3634_v34 = vpop.xlane.xlu1 %3633 }
 0xcb9   :  { %v3638_v36 = vmul.f32 %v3634_v34, %v4581_v43 }
 0xcbb   :  { %v3640_v50 = vadd.f32 1e-05, %v3638_v36 }
 0xcbd   :  { %3891 = vrsqrt.f32 %v3640_v50  ;;  %vm3648_vm8 = vweird.f32 %v3640_v50 }
 0xcc3   :  { %v3892_v29 = vpop.eup %3891 }
 0xcc4   :  { %v3643_v1 = vmul.f32 %v3892_v29, %v3640_v50  ;;  %vm3649_vm7 = vweird.f32 %v3892_v29 }
 0xcc5   :  { %vm3650_vm11 = vmor %vm3648_vm8, %vm3649_vm7 }
 0xcc6   :  { %v3644_v5 = vmul.f32 %v3892_v29, %v3643_v1 }
 0xcc8   :  { %v3645_v11 = vmul.f32 0.5, %v3644_v5 }
 0xcca   :  { %v3637_v15 = vpop.xlane.xlu2 %3636  ;;  %v3646_v30 = vsub.f32 1.5, %v3645_v11 }
 0xccb   :  { %v3639_v42 = vmul.f32 %v3637_v15, %v4581_v43 }
 0xccc   :  { %v3647_v4 = vmul.f32 %v3892_v29, %v3646_v30 }
 0xccd   :  { %v3641_v10 = vadd.f32 1e-05, %v3639_v42 }
 0xcce   :  { %v3651_v39 = vsel %vm3650_vm11, %v3892_v29, %v3647_v4 }
 0xccf   :  { %3893 = vrsqrt.f32 %v3641_v10  ;;  %v3662_v58 = vmul.f32 %v3651_v39, %v3628_v21  ;;  %vm3658_vm13 = vweird.f32 %v3641_v10 }
 0xcd1   :  { %v3665_v9 = vmul.f32 %v3815_v62, %v3662_v58 }
 0xcd3   :  { %v3668_v45 = vadd.f32 %v3816_v18, %v3665_v9 }
 0xcd5   :  { %v3894_v26 = vpop.eup %3893  ;;  %3670 = vst.msk [vmem:[#allocation5] sm:$0xff] %vm47_vm0, %v3668_v45 }
 0xcd6   :  { %v3653_v43 = vmul.f32 %v3894_v26, %v3641_v10  ;;  %vm3659_vm12 = vweird.f32 %v3894_v26 }
 0xcd7   :  { %vm3660_vm14 = vmor %vm3658_vm13, %vm3659_vm12 }
 0xcd8   :  { %v3654_v46 = vmul.f32 %v3894_v26, %v3653_v43 }
 0xcda   :  { %v3655_v41 = vmul.f32 0.5, %v3654_v46 }
 0xcdc   :  { %v3656_v37 = vsub.f32 1.5, %v3655_v41 }
 0xcde   :  { %v3657_v38 = vmul.f32 %v3894_v26, %v3656_v37 }
 0xce0   :  { %v3661_v19 = vsel %vm3660_vm14, %v3894_v26, %v3657_v38 }
 0xce1   :  { %v3663_v31 = vmul.f32 %v3661_v19, %v3629_v47 }
 0xce3   :  { %v3666_v51 = vmul.f32 %v3815_v62, %v3663_v31 }
 0xce5   :  { %v3669_v40 = vadd.f32 %v3816_v18, %v3666_v51 }
 0xce7   :  { %3671 = vst.msk [vmem:[#allocation5 + $0x8] sm:$0xff] %vm47_vm0, %v3669_v40 }
 0xce8   :  { %3684 = dma.vmem_to_hbm [thread:$0]  %s3677_s12, 256, %s3679_s4, [#allocation4], %s3950_s23, %s3950_s23, %s3951_s24  }
 0xce9   :  { %3947 = dma.done.wait [#allocation4], 256  }
 0xcea   :  { %3948 = vsyncadd [#allocation4], 4294967040 }
 0xceb   :  { %3689 = vsyncpa [#allocation3], 1 }
 0xcec   :  { %3690 = vsyncpa [#allocation4], 1 }

</bundles_post_ra>
